<compile_context>
chip_gen: v6e
topology: v6e:2x2x1
jax: 0.10.0
libtpu: 0.0.40
codegen_flags: <defaults>
</compile_context>

<pallas_src>
import jax
import jax.numpy as jnp
import numpy as np
from jax.experimental import pallas as pl
from jax.experimental.pallas import tpu as pltpu


# ------------------------------- kernel ------------------------------------ #

def _make_kernel(C, C4, N, BB):
    bf = jnp.bfloat16
    f32 = jnp.float32

    def kernel(x_ref, convw_ref, vecs_ref, wqkv_ref, wt_ref, o_ref):
        # x_ref:     (C, BB*N)      f32   lane-packed batch pair
        # convw_ref: (2, C, C)      bf16  conv1/conv2 weights (BN scale folded in)
        # vecs_ref:  (C, 10)        f32   [bn1 shift, bn2 shift, (bv_l, shift'_l) x4]
        # wqkv_ref:  (4, C4+C, C)   bf16  stacked shared-q/k and v weights per layer
        # wt_ref:    (4, C, C)      bf16  trans_conv weights (after_norm scale folded in)
        # o_ref:     (4C, BB*N)     f32   channel-concatenated output slab
        vecs = vecs_ref[...]                                        # (C, 10)
        x = x_ref[...]                                              # (C, BB*N) f32

        # --- conv1+bn1+relu, conv2+bn2+relu (Conv1d k=1 == channel matmul) ---
        for s in range(2):
            y = jnp.dot(convw_ref[s], x.astype(bf),
                        preferred_element_type=f32)                 # (C, BB*N)
            x = jnp.maximum(y + vecs[:, s:s + 1], 0.0)

        # --- 4 stacked SA layers; each writes its channel slice of the output ---
        for l in range(4):
            bv = vecs[:, 2 + 2 * l:3 + 2 * l]                       # v_conv bias
            tsh = vecs[:, 3 + 2 * l:4 + 2 * l]                      # folded BN shift

            x_bf = x.astype(bf)
            # one stacked projection: rows [0:C4) = shared q/k, rows [C4:) = v
            proj = jnp.dot(wqkv_ref[l], x_bf,
                           preferred_element_type=f32)              # (C4+C, BB*N)
            qk = proj[:C4, :]                                       # (C4, BB*N)
            xv = proj[C4:, :] + bv                                  # (C, BB*N)

            xr_parts = []
            for b in range(BB):                                     # per-batch (N,N) block
                qk_b = qk[:, b * N:(b + 1) * N].astype(bf)          # (C4, N)
                # energy = x_q @ x_k = qk^T @ qk (Gram over the C/4 dim)
                energy = jax.lax.dot_general(
                    qk_b, qk_b, (((0,), (0,)), ((), ())),
                    preferred_element_type=f32)                     # (N, N)
                p = jnp.exp(energy - jnp.max(energy, axis=-1, keepdims=True))
                attn = p * (1.0 / jnp.sum(p, axis=-1, keepdims=True))   # exact softmax
                colsum = jnp.sum(attn, axis=0, keepdims=True)       # (1, N)
                xr = jnp.dot(xv[:, b * N:(b + 1) * N].astype(bf), attn.astype(bf),
                             preferred_element_type=f32)            # (C, N)
                # column normalisation moved after the value matmul (identical math)
                xr_parts.append(xr * (1.0 / (1e-9 + colsum)))
            x_r = xr_parts[0] if BB == 1 else jnp.concatenate(xr_parts, axis=1)

            # trans_conv(x - x_r) -> BN(eval, scale folded) -> ReLU -> residual
            t = jnp.dot(wt_ref[l], (x - x_r).astype(bf),
                        preferred_element_type=f32) + tsh
            x = x + jnp.maximum(t, 0.0)

            o_ref[l * C:(l + 1) * C, :] = x                         # cat(dim=1)

    return kernel


# ------------------------------- wrapper ----------------------------------- #

def pack_params(params):
    """Fold eval-mode BN scales into weights, stack q/k+v, pack channel vectors."""
    bf = jnp.bfloat16
    s1, t1 = params["bn1"]
    s2, t2 = params["bn2"]
    conv_w = jnp.stack([s1 * params["conv1_w"],
                        s2 * params["conv2_w"]]).astype(bf)          # (2, C, C)
    cols = [t1, t2]
    wqkv, wt = [], []
    for p in params["sa"]:
        # PCT ties q_conv.weight == k_conv.weight; "wqk" is that shared weight.
        wqkv.append(jnp.concatenate([p["wqk"], p["wv"]], axis=0))    # (C4+C, C)
        wt.append(p["bn_scale"] * p["wt"])                           # scale folded into rows
        cols.append(p["bv"])
        cols.append(p["bn_scale"] * p["bt"] + p["bn_shift"])         # folded shift
    return {
        "conv_w": conv_w,
        "wqkv": jnp.stack(wqkv).astype(bf),                          # (4, C4+C, C)
        "wt": jnp.stack(wt).astype(bf),                              # (4, C, C)
        "vecs": jnp.concatenate(cols, axis=1).astype(jnp.float32),   # (C, 10)
    }


@jax.jit
def stacked_attention(x, packed):
    B, C, N = x.shape
    C4 = packed["wqkv"].shape[1] - C
    BB = 2 if B % 2 == 0 else 1          # lane-pack 2 batch elems per grid step
    G = B // BB

    # layout plumbing: (B, C, N) -> lane-dense (C, B*N) slab
    x2 = jnp.transpose(x, (1, 0, 2)).reshape(C, B * N)

    flops = B * (2 * 2 * C * C * N
                 + 4 * (2 * (C4 + C) * C * N      # stacked q/k + v projection
                        + 2 * C4 * N * N          # energy
                        + 2 * C * N * N           # value matmul
                        + 2 * C * C * N))         # trans_conv
    bytes_accessed = (x.size * 4 + B * 4 * C * N * 4
                      + packed["conv_w"].size * 2 + packed["wqkv"].size * 2
                      + packed["wt"].size * 2 + packed["vecs"].size * 4)

    def wspec(shape):
        # Constant block index -> fetched once, kept VMEM-resident across the grid.
        return pl.BlockSpec(shape, lambda i: (0,) * len(shape))

    out2 = pl.pallas_call(
        _make_kernel(C, C4, N, BB),
        out_shape=jax.ShapeDtypeStruct((4 * C, B * N), jnp.float32),
        grid=(G,),
        in_specs=[
            pl.BlockSpec((C, BB * N), lambda i: (0, i)),   # batch-pair slab of x
            wspec((2, C, C)),                              # conv1/conv2 weights
            wspec((C, 10)),                                # packed per-channel vectors
            wspec((4, C4 + C, C)),                         # stacked q/k + v weights
            wspec((4, C, C)),                              # trans_conv weights
        ],
        out_specs=pl.BlockSpec((4 * C, BB * N), lambda i: (0, i)),
        compiler_params=pltpu.CompilerParams(
            dimension_semantics=("parallel",)),            # batch pairs -> 2 TCs on v7x
        cost_estimate=pl.CostEstimate(flops=flops,
                                      transcendentals=B * 4 * N * N,
                                      bytes_accessed=bytes_accessed),
    )(x2, packed["conv_w"], packed["vecs"], packed["wqkv"], packed["wt"])

    return jnp.transpose(out2.reshape(4 * C, B, N), (1, 0, 2))       # (B, 4C, N)


# --------------------------- params / references ---------------------------- #

def _fold_bn(gamma, beta, mean, var, eps=1e-5):
    scale = gamma / jnp.sqrt(var + eps)
    shift = beta - mean * scale
    return (scale.reshape(-1, 1).astype(jnp.float32),
            shift.reshape(-1, 1).astype(jnp.float32))


def init_params(key, C):
    keys = iter(jax.random.split(key, 64))

    def w(shape, s):
        return (jax.random.normal(next(keys), shape, jnp.float32) * s).astype(jnp.float32)

    def bn():
        gamma = 1.0 + 0.1 * jax.random.normal(next(keys), (C,), jnp.float32)
        beta = 0.1 * jax.random.normal(next(keys), (C,), jnp.float32)
        mean = 0.1 * jax.random.normal(next(keys), (C,), jnp.float32)
        var = 1.0 + 0.1 * jnp.abs(jax.random.normal(next(keys), (C,), jnp.float32))
        return _fold_bn(gamma, beta, mean, var)

    params = {
        "conv1_w": w((C, C), 1.0 / np.sqrt(C)), "bn1": bn(),
        "conv2_w": w((C, C), 1.0 / np.sqrt(C)), "bn2": bn(),
        "sa": [],
    }
    for _ in range(4):
        p = {
            "wqk": w((C // 4, C), 1.0 / np.sqrt(C)),  # q_conv.weight == k_conv.weight
            "wv": w((C, C), 1.0 / np.sqrt(C)),
            "bv": w((C, 1), 0.1),
            "wt": w((C, C), 1.0 / np.sqrt(C)),
            "bt": w((C, 1), 0.1),
        }
        p["bn_scale"], p["bn_shift"] = bn()
        params["sa"].append(p)
    return params


def ref_from_packed(x, packed):
    """Pure-JAX mirror of the kernel's exact math (same folded bf16 weights,
    same bf16 cast points, f32 accumulation, exact divisions)."""
    bf = jnp.bfloat16
    conv_w, vecs, wqkv, wt = (packed["conv_w"], packed["vecs"],
                              packed["wqkv"], packed["wt"])
    C = conv_w.shape[1]
    C4 = wqkv.shape[1] - C

    def mm(w_bf, h):
        return jnp.einsum("oc,bcn->bon", w_bf, h.astype(bf),
                          preferred_element_type=jnp.float32)

    h = x
    for s in range(2):
        h = jnp.maximum(mm(conv_w[s], h) + vecs[None, :, s:s + 1], 0.0)
    outs = []
    for l in range(4):
        bv = vecs[None, :, 2 + 2 * l:3 + 2 * l]
        tsh = vecs[None, :, 3 + 2 * l:4 + 2 * l]
        proj = mm(wqkv[l], h)
        qk, xv = proj[:, :C4, :], proj[:, C4:, :] + bv
        qk_bf = qk.astype(bf)
        energy = jnp.einsum("bcn,bcm->bnm", qk_bf, qk_bf,
                            preferred_element_type=jnp.float32)
        p = jnp.exp(energy - jnp.max(energy, axis=-1, keepdims=True))
        attn = p * (1.0 / jnp.sum(p, axis=-1, keepdims=True))
        colsum = jnp.sum(attn, axis=1, keepdims=True)
        xr = jnp.einsum("bcn,bnm->bcm", xv.astype(bf), attn.astype(bf),
                        preferred_element_type=jnp.float32)
        xr = xr * (1.0 / (1e-9 + colsum))
        t = mm(wt[l], h - xr) + tsh
        h = h + jnp.maximum(t, 0.0)
        outs.append(h)
    return jnp.concatenate(outs, axis=1)


def ref_stacked_attention_f32(x, params):
    """Full-f32 PyTorch-faithful reference (eval-mode BN, unfolded params)."""
    hp = jax.lax.Precision.HIGHEST

    def conv(h, w, b=None):
        y = jnp.einsum("oc,bcn->bon", w, h, precision=hp)
        return y if b is None else y + b[None]

    def bnrelu(h, sc, sh):
        return jnp.maximum(h * sc[None] + sh[None], 0.0)

    def sa(h, p):
        qk = conv(h, p["wqk"])
        xv = conv(h, p["wv"], p["bv"])
        energy = jnp.einsum("bcn,bcm->bnm", qk, qk, precision=hp)
        attn = jax.nn.softmax(energy, axis=-1)
        attn = attn / (1e-9 + attn.sum(axis=1, keepdims=True))
        xr = jnp.einsum("bcn,bnm->bcm", xv, attn, precision=hp)
        t = conv(h - xr, p["wt"], p["bt"])
        return h + jnp.maximum(t * p["bn_scale"][None] + p["bn_shift"][None], 0.0)

    s1, t1 = params["bn1"]
    s2, t2 = params["bn2"]
    h = bnrelu(conv(x, params["conv1_w"]), s1, t1)
    h = bnrelu(conv(h, params["conv2_w"]), s2, t2)
    outs = []
    for p in params["sa"]:
        h = sa(h, p)
        outs.append(h)
    return jnp.concatenate(outs, axis=1)


# ---------------------------------- main ------------------------------------ #

if __name__ == "__main__":
    B, C, N = 2, 64, 128   # batch, channels, points
    key = jax.random.PRNGKey(0)
    kx, kp = jax.random.split(key)
    x = jax.random.normal(kx, (B, C, N), jnp.float32)
    params = init_params(kp, C)
    packed = pack_params(params)

    out = jax.block_until_ready(stacked_attention(x, packed))
    assert out.shape == (B, 4 * C, N), out.shape
    assert bool(jnp.all(jnp.isfinite(out)))

    # Structural check vs a pure-JAX reference using the SAME folded bf16 weights
    # and the SAME precision policy / exact divisions as the kernel.
    ref_b = ref_from_packed(x, packed)
    np.testing.assert_allclose(np.asarray(out), np.asarray(ref_b),
                               rtol=5e-2, atol=5e-2)

    # Semantic check vs the full-f32 PyTorch-faithful reference
    # (loose: absorbs bf16 MXU / folded-weight quantization drift).
    ref32 = ref_stacked_attention_f32(x, params)
    rel_err = float(jnp.linalg.norm(out - ref32) / jnp.linalg.norm(ref32))
    assert rel_err < 0.1, rel_err

    print("KERNEL_OK")
</pallas_src>

<mosaic_0001>
module attributes {stable_mosaic.version = 11 : i64} {
  func.func @kernel(%arg0: i32, %arg1: memref<64x256xf32, #tpu.memory_space<vmem>>, %arg2: memref<2x64x64xbf16, #tpu.memory_space<vmem>>, %arg3: memref<64x10xf32, #tpu.memory_space<vmem>>, %arg4: memref<4x80x64xbf16, #tpu.memory_space<vmem>>, %arg5: memref<4x64x64xbf16, #tpu.memory_space<vmem>>, %arg6: memref<256x256xf32, #tpu.memory_space<vmem>>) attributes {dimension_semantics = [#tpu.dimension_semantics<parallel>], iteration_bounds = array<i64: 1>, scalar_prefetch = 0 : i64, scratch_operands = 0 : i64, tpu.core_type = #tpu.core_type<tc>, window_params = [{transform_indices = @transform_0, window_bounds = array<i64: 64, 256>}, {pipeline_mode = #tpu.pipeline_mode<synchronous>, transform_indices = @transform_1, window_bounds = array<i64: 2, 64, 64>}, {pipeline_mode = #tpu.pipeline_mode<synchronous>, transform_indices = @transform_2, window_bounds = array<i64: 64, 10>}, {pipeline_mode = #tpu.pipeline_mode<synchronous>, transform_indices = @transform_3, window_bounds = array<i64: 4, 80, 64>}, {pipeline_mode = #tpu.pipeline_mode<synchronous>, transform_indices = @transform_4, window_bounds = array<i64: 4, 64, 64>}, {transform_indices = @transform_5, window_bounds = array<i64: 256, 256>}]} {
    %c0 = arith.constant 0 : index
    %c0_0 = arith.constant 0 : index
    %0 = vector.load %arg3[%c0, %c0_0] : memref<64x10xf32, #tpu.memory_space<vmem>>, vector<64x10xf32>
    %c0_1 = arith.constant 0 : index
    %c0_2 = arith.constant 0 : index
    %1 = vector.load %arg1[%c0_1, %c0_2] : memref<64x256xf32, #tpu.memory_space<vmem>>, vector<64x256xf32>
    %c0_3 = arith.constant 0 : index
    %c0_4 = arith.constant 0 : index
    %c0_5 = arith.constant 0 : index
    %2 = vector.load %arg2[%c0_3, %c0_4, %c0_5] : memref<2x64x64xbf16, #tpu.memory_space<vmem>>, vector<1x64x64xbf16>
    %3 = vector.shape_cast %2 : vector<1x64x64xbf16> to vector<64x64xbf16>
    %4 = arith.truncf %1 : vector<64x256xf32> to vector<64x256xbf16>
    %cst = arith.constant dense<0.000000e+00> : vector<64x256xf32>
    %5 = tpu.matmul %3, %4, %cst {dimension_numbers = #tpu.dot_dimension_numbers<[1], [0], [0], [1], [0, 0, 1, 1], [], []>} : vector<64x64xbf16>, vector<64x256xbf16>, vector<64x256xf32> -> vector<64x256xf32>
    %6 = vector.extract_strided_slice %0 {offsets = [0, 0], sizes = [64, 1], strides = [1, 1]} : vector<64x10xf32> to vector<64x1xf32>
    %7 = vector.broadcast %6 : vector<64x1xf32> to vector<64x256xf32>
    %8 = arith.addf %5, %7 : vector<64x256xf32>
    %cst_6 = arith.constant 0.000000e+00 : f32
    %9 = vector.broadcast %cst_6 : f32 to vector<64x256xf32>
    %10 = arith.maximumf %8, %9 : vector<64x256xf32>
    %c1 = arith.constant 1 : index
    %c0_7 = arith.constant 0 : index
    %c0_8 = arith.constant 0 : index
    %11 = vector.load %arg2[%c1, %c0_7, %c0_8] : memref<2x64x64xbf16, #tpu.memory_space<vmem>>, vector<1x64x64xbf16>
    %12 = vector.shape_cast %11 : vector<1x64x64xbf16> to vector<64x64xbf16>
    %13 = arith.truncf %10 : vector<64x256xf32> to vector<64x256xbf16>
    %cst_9 = arith.constant dense<0.000000e+00> : vector<64x256xf32>
    %14 = tpu.matmul %12, %13, %cst_9 {dimension_numbers = #tpu.dot_dimension_numbers<[1], [0], [0], [1], [0, 0, 1, 1], [], []>} : vector<64x64xbf16>, vector<64x256xbf16>, vector<64x256xf32> -> vector<64x256xf32>
    %15 = vector.extract_strided_slice %0 {offsets = [0, 1], sizes = [64, 1], strides = [1, 1]} : vector<64x10xf32> to vector<64x1xf32>
    %16 = vector.broadcast %15 : vector<64x1xf32> to vector<64x256xf32>
    %17 = arith.addf %14, %16 : vector<64x256xf32>
    %cst_10 = arith.constant 0.000000e+00 : f32
    %18 = vector.broadcast %cst_10 : f32 to vector<64x256xf32>
    %19 = arith.maximumf %17, %18 : vector<64x256xf32>
    %20 = vector.extract_strided_slice %0 {offsets = [0, 2], sizes = [64, 1], strides = [1, 1]} : vector<64x10xf32> to vector<64x1xf32>
    %21 = vector.extract_strided_slice %0 {offsets = [0, 3], sizes = [64, 1], strides = [1, 1]} : vector<64x10xf32> to vector<64x1xf32>
    %22 = arith.truncf %19 : vector<64x256xf32> to vector<64x256xbf16>
    %c0_11 = arith.constant 0 : index
    %c0_12 = arith.constant 0 : index
    %c0_13 = arith.constant 0 : index
    %23 = vector.load %arg4[%c0_11, %c0_12, %c0_13] : memref<4x80x64xbf16, #tpu.memory_space<vmem>>, vector<1x80x64xbf16>
    %24 = vector.shape_cast %23 : vector<1x80x64xbf16> to vector<80x64xbf16>
    %cst_14 = arith.constant dense<0.000000e+00> : vector<80x256xf32>
    %25 = tpu.matmul %24, %22, %cst_14 {dimension_numbers = #tpu.dot_dimension_numbers<[1], [0], [0], [1], [0, 0, 1, 1], [], []>} : vector<80x64xbf16>, vector<64x256xbf16>, vector<80x256xf32> -> vector<80x256xf32>
    %26 = vector.extract_strided_slice %25 {offsets = [0, 0], sizes = [16, 256], strides = [1, 1]} : vector<80x256xf32> to vector<16x256xf32>
    %27 = vector.extract_strided_slice %25 {offsets = [16, 0], sizes = [64, 256], strides = [1, 1]} : vector<80x256xf32> to vector<64x256xf32>
    %28 = vector.broadcast %20 : vector<64x1xf32> to vector<64x256xf32>
    %29 = arith.addf %27, %28 : vector<64x256xf32>
    %30 = vector.extract_strided_slice %26 {offsets = [0, 0], sizes = [16, 128], strides = [1, 1]} : vector<16x256xf32> to vector<16x128xf32>
    %31 = arith.truncf %30 : vector<16x128xf32> to vector<16x128xbf16>
    %cst_15 = arith.constant dense<0.000000e+00> : vector<128x128xf32>
    %32 = tpu.matmul %31, %31, %cst_15 {dimension_numbers = #tpu.dot_dimension_numbers<[0], [0], [1], [1], [0, 1, 1, 1], [], []>} : vector<16x128xbf16>, vector<16x128xbf16>, vector<128x128xf32> -> vector<128x128xf32>
    %cst_16 = arith.constant dense<0xFF800000> : vector<128xf32>
    %33 = vector.multi_reduction <maximumf>, %32, %cst_16 [1] : vector<128x128xf32> to vector<128xf32>
    %34 = vector.shape_cast %33 : vector<128xf32> to vector<128x1xf32>
    %35 = vector.broadcast %34 : vector<128x1xf32> to vector<128x128xf32>
    %36 = arith.subf %32, %35 : vector<128x128xf32>
    %37 = math.exp %36 : vector<128x128xf32>
    %cst_17 = arith.constant dense<0.000000e+00> : vector<128xf32>
    %38 = vector.multi_reduction <add>, %37, %cst_17 [1] : vector<128x128xf32> to vector<128xf32>
    %39 = vector.shape_cast %38 : vector<128xf32> to vector<128x1xf32>
    %cst_18 = arith.constant 1.000000e+00 : f32
    %40 = vector.broadcast %cst_18 : f32 to vector<128x1xf32>
    %41 = arith.divf %40, %39 : vector<128x1xf32>
    %42 = vector.broadcast %41 : vector<128x1xf32> to vector<128x128xf32>
    %43 = arith.mulf %37, %42 : vector<128x128xf32>
    %cst_19 = arith.constant dense<0.000000e+00> : vector<128xf32>
    %44 = vector.multi_reduction <add>, %43, %cst_19 [0] : vector<128x128xf32> to vector<128xf32>
    %45 = vector.shape_cast %44 : vector<128xf32> to vector<1x128xf32>
    %46 = vector.extract_strided_slice %29 {offsets = [0, 0], sizes = [64, 128], strides = [1, 1]} : vector<64x256xf32> to vector<64x128xf32>
    %47 = arith.truncf %46 : vector<64x128xf32> to vector<64x128xbf16>
    %48 = arith.truncf %43 : vector<128x128xf32> to vector<128x128xbf16>
    %cst_20 = arith.constant dense<0.000000e+00> : vector<64x128xf32>
    %49 = tpu.matmul %47, %48, %cst_20 {dimension_numbers = #tpu.dot_dimension_numbers<[1], [0], [0], [1], [0, 0, 1, 1], [], []>} : vector<64x128xbf16>, vector<128x128xbf16>, vector<64x128xf32> -> vector<64x128xf32>
    %cst_21 = arith.constant 9.99999971E-10 : f32
    %50 = vector.broadcast %cst_21 : f32 to vector<1x128xf32>
    %51 = arith.addf %50, %45 : vector<1x128xf32>
    %cst_22 = arith.constant 1.000000e+00 : f32
    %52 = vector.broadcast %cst_22 : f32 to vector<1x128xf32>
    %53 = arith.divf %52, %51 : vector<1x128xf32>
    %54 = vector.broadcast %53 : vector<1x128xf32> to vector<64x128xf32>
    %55 = arith.mulf %49, %54 : vector<64x128xf32>
    %56 = vector.extract_strided_slice %26 {offsets = [0, 128], sizes = [16, 128], strides = [1, 1]} : vector<16x256xf32> to vector<16x128xf32>
    %57 = arith.truncf %56 : vector<16x128xf32> to vector<16x128xbf16>
    %cst_23 = arith.constant dense<0.000000e+00> : vector<128x128xf32>
    %58 = tpu.matmul %57, %57, %cst_23 {dimension_numbers = #tpu.dot_dimension_numbers<[0], [0], [1], [1], [0, 1, 1, 1], [], []>} : vector<16x128xbf16>, vector<16x128xbf16>, vector<128x128xf32> -> vector<128x128xf32>
    %cst_24 = arith.constant dense<0xFF800000> : vector<128xf32>
    %59 = vector.multi_reduction <maximumf>, %58, %cst_24 [1] : vector<128x128xf32> to vector<128xf32>
    %60 = vector.shape_cast %59 : vector<128xf32> to vector<128x1xf32>
    %61 = vector.broadcast %60 : vector<128x1xf32> to vector<128x128xf32>
    %62 = arith.subf %58, %61 : vector<128x128xf32>
    %63 = math.exp %62 : vector<128x128xf32>
    %cst_25 = arith.constant dense<0.000000e+00> : vector<128xf32>
    %64 = vector.multi_reduction <add>, %63, %cst_25 [1] : vector<128x128xf32> to vector<128xf32>
    %65 = vector.shape_cast %64 : vector<128xf32> to vector<128x1xf32>
    %cst_26 = arith.constant 1.000000e+00 : f32
    %66 = vector.broadcast %cst_26 : f32 to vector<128x1xf32>
    %67 = arith.divf %66, %65 : vector<128x1xf32>
    %68 = vector.broadcast %67 : vector<128x1xf32> to vector<128x128xf32>
    %69 = arith.mulf %63, %68 : vector<128x128xf32>
    %cst_27 = arith.constant dense<0.000000e+00> : vector<128xf32>
    %70 = vector.multi_reduction <add>, %69, %cst_27 [0] : vector<128x128xf32> to vector<128xf32>
    %71 = vector.shape_cast %70 : vector<128xf32> to vector<1x128xf32>
    %72 = vector.extract_strided_slice %29 {offsets = [0, 128], sizes = [64, 128], strides = [1, 1]} : vector<64x256xf32> to vector<64x128xf32>
    %73 = arith.truncf %72 : vector<64x128xf32> to vector<64x128xbf16>
    %74 = arith.truncf %69 : vector<128x128xf32> to vector<128x128xbf16>
    %cst_28 = arith.constant dense<0.000000e+00> : vector<64x128xf32>
    %75 = tpu.matmul %73, %74, %cst_28 {dimension_numbers = #tpu.dot_dimension_numbers<[1], [0], [0], [1], [0, 0, 1, 1], [], []>} : vector<64x128xbf16>, vector<128x128xbf16>, vector<64x128xf32> -> vector<64x128xf32>
    %cst_29 = arith.constant 9.99999971E-10 : f32
    %76 = vector.broadcast %cst_29 : f32 to vector<1x128xf32>
    %77 = arith.addf %76, %71 : vector<1x128xf32>
    %cst_30 = arith.constant 1.000000e+00 : f32
    %78 = vector.broadcast %cst_30 : f32 to vector<1x128xf32>
    %79 = arith.divf %78, %77 : vector<1x128xf32>
    %80 = vector.broadcast %79 : vector<1x128xf32> to vector<64x128xf32>
    %81 = arith.mulf %75, %80 : vector<64x128xf32>
    %82 = tpu.concatenate %55, %81 in 1 : vector<64x128xf32>, vector<64x128xf32> -> vector<64x256xf32>
    %c0_31 = arith.constant 0 : index
    %c0_32 = arith.constant 0 : index
    %c0_33 = arith.constant 0 : index
    %83 = vector.load %arg5[%c0_31, %c0_32, %c0_33] : memref<4x64x64xbf16, #tpu.memory_space<vmem>>, vector<1x64x64xbf16>
    %84 = vector.shape_cast %83 : vector<1x64x64xbf16> to vector<64x64xbf16>
    %85 = arith.subf %19, %82 : vector<64x256xf32>
    %86 = arith.truncf %85 : vector<64x256xf32> to vector<64x256xbf16>
    %cst_34 = arith.constant dense<0.000000e+00> : vector<64x256xf32>
    %87 = tpu.matmul %84, %86, %cst_34 {dimension_numbers = #tpu.dot_dimension_numbers<[1], [0], [0], [1], [0, 0, 1, 1], [], []>} : vector<64x64xbf16>, vector<64x256xbf16>, vector<64x256xf32> -> vector<64x256xf32>
    %88 = vector.broadcast %21 : vector<64x1xf32> to vector<64x256xf32>
    %89 = arith.addf %87, %88 : vector<64x256xf32>
    %cst_35 = arith.constant 0.000000e+00 : f32
    %90 = vector.broadcast %cst_35 : f32 to vector<64x256xf32>
    %91 = arith.maximumf %89, %90 : vector<64x256xf32>
    %92 = arith.addf %19, %91 : vector<64x256xf32>
    %c0_36 = arith.constant 0 : index
    %c0_37 = arith.constant 0 : index
    %93 = vector.load %arg6[%c0_36, %c0_37] : memref<256x256xf32, #tpu.memory_space<vmem>>, vector<64x256xf32>
    tpu.vector_store %arg6[%c0_36, %c0_37], %92 {strides = array<i32>} : memref<256x256xf32, #tpu.memory_space<vmem>>, vector<64x256xf32>,
    %94 = vector.extract_strided_slice %0 {offsets = [0, 4], sizes = [64, 1], strides = [1, 1]} : vector<64x10xf32> to vector<64x1xf32>
    %95 = vector.extract_strided_slice %0 {offsets = [0, 5], sizes = [64, 1], strides = [1, 1]} : vector<64x10xf32> to vector<64x1xf32>
    %96 = arith.truncf %92 : vector<64x256xf32> to vector<64x256xbf16>
    %c1_38 = arith.constant 1 : index
    %c0_39 = arith.constant 0 : index
    %c0_40 = arith.constant 0 : index
    %97 = vector.load %arg4[%c1_38, %c0_39, %c0_40] : memref<4x80x64xbf16, #tpu.memory_space<vmem>>, vector<1x80x64xbf16>
    %98 = vector.shape_cast %97 : vector<1x80x64xbf16> to vector<80x64xbf16>
    %cst_41 = arith.constant dense<0.000000e+00> : vector<80x256xf32>
    %99 = tpu.matmul %98, %96, %cst_41 {dimension_numbers = #tpu.dot_dimension_numbers<[1], [0], [0], [1], [0, 0, 1, 1], [], []>} : vector<80x64xbf16>, vector<64x256xbf16>, vector<80x256xf32> -> vector<80x256xf32>
    %100 = vector.extract_strided_slice %99 {offsets = [0, 0], sizes = [16, 256], strides = [1, 1]} : vector<80x256xf32> to vector<16x256xf32>
    %101 = vector.extract_strided_slice %99 {offsets = [16, 0], sizes = [64, 256], strides = [1, 1]} : vector<80x256xf32> to vector<64x256xf32>
    %102 = vector.broadcast %94 : vector<64x1xf32> to vector<64x256xf32>
    %103 = arith.addf %101, %102 : vector<64x256xf32>
    %104 = vector.extract_strided_slice %100 {offsets = [0, 0], sizes = [16, 128], strides = [1, 1]} : vector<16x256xf32> to vector<16x128xf32>
    %105 = arith.truncf %104 : vector<16x128xf32> to vector<16x128xbf16>
    %cst_42 = arith.constant dense<0.000000e+00> : vector<128x128xf32>
    %106 = tpu.matmul %105, %105, %cst_42 {dimension_numbers = #tpu.dot_dimension_numbers<[0], [0], [1], [1], [0, 1, 1, 1], [], []>} : vector<16x128xbf16>, vector<16x128xbf16>, vector<128x128xf32> -> vector<128x128xf32>
    %cst_43 = arith.constant dense<0xFF800000> : vector<128xf32>
    %107 = vector.multi_reduction <maximumf>, %106, %cst_43 [1] : vector<128x128xf32> to vector<128xf32>
    %108 = vector.shape_cast %107 : vector<128xf32> to vector<128x1xf32>
    %109 = vector.broadcast %108 : vector<128x1xf32> to vector<128x128xf32>
    %110 = arith.subf %106, %109 : vector<128x128xf32>
    %111 = math.exp %110 : vector<128x128xf32>
    %cst_44 = arith.constant dense<0.000000e+00> : vector<128xf32>
    %112 = vector.multi_reduction <add>, %111, %cst_44 [1] : vector<128x128xf32> to vector<128xf32>
    %113 = vector.shape_cast %112 : vector<128xf32> to vector<128x1xf32>
    %cst_45 = arith.constant 1.000000e+00 : f32
    %114 = vector.broadcast %cst_45 : f32 to vector<128x1xf32>
    %115 = arith.divf %114, %113 : vector<128x1xf32>
    %116 = vector.broadcast %115 : vector<128x1xf32> to vector<128x128xf32>
    %117 = arith.mulf %111, %116 : vector<128x128xf32>
    %cst_46 = arith.constant dense<0.000000e+00> : vector<128xf32>
    %118 = vector.multi_reduction <add>, %117, %cst_46 [0] : vector<128x128xf32> to vector<128xf32>
    %119 = vector.shape_cast %118 : vector<128xf32> to vector<1x128xf32>
    %120 = vector.extract_strided_slice %103 {offsets = [0, 0], sizes = [64, 128], strides = [1, 1]} : vector<64x256xf32> to vector<64x128xf32>
    %121 = arith.truncf %120 : vector<64x128xf32> to vector<64x128xbf16>
    %122 = arith.truncf %117 : vector<128x128xf32> to vector<128x128xbf16>
    %cst_47 = arith.constant dense<0.000000e+00> : vector<64x128xf32>
    %123 = tpu.matmul %121, %122, %cst_47 {dimension_numbers = #tpu.dot_dimension_numbers<[1], [0], [0], [1], [0, 0, 1, 1], [], []>} : vector<64x128xbf16>, vector<128x128xbf16>, vector<64x128xf32> -> vector<64x128xf32>
    %cst_48 = arith.constant 9.99999971E-10 : f32
    %124 = vector.broadcast %cst_48 : f32 to vector<1x128xf32>
    %125 = arith.addf %124, %119 : vector<1x128xf32>
    %cst_49 = arith.constant 1.000000e+00 : f32
    %126 = vector.broadcast %cst_49 : f32 to vector<1x128xf32>
    %127 = arith.divf %126, %125 : vector<1x128xf32>
    %128 = vector.broadcast %127 : vector<1x128xf32> to vector<64x128xf32>
    %129 = arith.mulf %123, %128 : vector<64x128xf32>
    %130 = vector.extract_strided_slice %100 {offsets = [0, 128], sizes = [16, 128], strides = [1, 1]} : vector<16x256xf32> to vector<16x128xf32>
    %131 = arith.truncf %130 : vector<16x128xf32> to vector<16x128xbf16>
    %cst_50 = arith.constant dense<0.000000e+00> : vector<128x128xf32>
    %132 = tpu.matmul %131, %131, %cst_50 {dimension_numbers = #tpu.dot_dimension_numbers<[0], [0], [1], [1], [0, 1, 1, 1], [], []>} : vector<16x128xbf16>, vector<16x128xbf16>, vector<128x128xf32> -> vector<128x128xf32>
    %cst_51 = arith.constant dense<0xFF800000> : vector<128xf32>
    %133 = vector.multi_reduction <maximumf>, %132, %cst_51 [1] : vector<128x128xf32> to vector<128xf32>
    %134 = vector.shape_cast %133 : vector<128xf32> to vector<128x1xf32>
    %135 = vector.broadcast %134 : vector<128x1xf32> to vector<128x128xf32>
    %136 = arith.subf %132, %135 : vector<128x128xf32>
    %137 = math.exp %136 : vector<128x128xf32>
    %cst_52 = arith.constant dense<0.000000e+00> : vector<128xf32>
    %138 = vector.multi_reduction <add>, %137, %cst_52 [1] : vector<128x128xf32> to vector<128xf32>
    %139 = vector.shape_cast %138 : vector<128xf32> to vector<128x1xf32>
    %cst_53 = arith.constant 1.000000e+00 : f32
    %140 = vector.broadcast %cst_53 : f32 to vector<128x1xf32>
    %141 = arith.divf %140, %139 : vector<128x1xf32>
    %142 = vector.broadcast %141 : vector<128x1xf32> to vector<128x128xf32>
    %143 = arith.mulf %137, %142 : vector<128x128xf32>
    %cst_54 = arith.constant dense<0.000000e+00> : vector<128xf32>
    %144 = vector.multi_reduction <add>, %143, %cst_54 [0] : vector<128x128xf32> to vector<128xf32>
    %145 = vector.shape_cast %144 : vector<128xf32> to vector<1x128xf32>
    %146 = vector.extract_strided_slice %103 {offsets = [0, 128], sizes = [64, 128], strides = [1, 1]} : vector<64x256xf32> to vector<64x128xf32>
    %147 = arith.truncf %146 : vector<64x128xf32> to vector<64x128xbf16>
    %148 = arith.truncf %143 : vector<128x128xf32> to vector<128x128xbf16>
    %cst_55 = arith.constant dense<0.000000e+00> : vector<64x128xf32>
    %149 = tpu.matmul %147, %148, %cst_55 {dimension_numbers = #tpu.dot_dimension_numbers<[1], [0], [0], [1], [0, 0, 1, 1], [], []>} : vector<64x128xbf16>, vector<128x128xbf16>, vector<64x128xf32> -> vector<64x128xf32>
    %cst_56 = arith.constant 9.99999971E-10 : f32
    %150 = vector.broadcast %cst_56 : f32 to vector<1x128xf32>
    %151 = arith.addf %150, %145 : vector<1x128xf32>
    %cst_57 = arith.constant 1.000000e+00 : f32
    %152 = vector.broadcast %cst_57 : f32 to vector<1x128xf32>
    %153 = arith.divf %152, %151 : vector<1x128xf32>
    %154 = vector.broadcast %153 : vector<1x128xf32> to vector<64x128xf32>
    %155 = arith.mulf %149, %154 : vector<64x128xf32>
    %156 = tpu.concatenate %129, %155 in 1 : vector<64x128xf32>, vector<64x128xf32> -> vector<64x256xf32>
    %c1_58 = arith.constant 1 : index
    %c0_59 = arith.constant 0 : index
    %c0_60 = arith.constant 0 : index
    %157 = vector.load %arg5[%c1_58, %c0_59, %c0_60] : memref<4x64x64xbf16, #tpu.memory_space<vmem>>, vector<1x64x64xbf16>
    %158 = vector.shape_cast %157 : vector<1x64x64xbf16> to vector<64x64xbf16>
    %159 = arith.subf %92, %156 : vector<64x256xf32>
    %160 = arith.truncf %159 : vector<64x256xf32> to vector<64x256xbf16>
    %cst_61 = arith.constant dense<0.000000e+00> : vector<64x256xf32>
    %161 = tpu.matmul %158, %160, %cst_61 {dimension_numbers = #tpu.dot_dimension_numbers<[1], [0], [0], [1], [0, 0, 1, 1], [], []>} : vector<64x64xbf16>, vector<64x256xbf16>, vector<64x256xf32> -> vector<64x256xf32>
    %162 = vector.broadcast %95 : vector<64x1xf32> to vector<64x256xf32>
    %163 = arith.addf %161, %162 : vector<64x256xf32>
    %cst_62 = arith.constant 0.000000e+00 : f32
    %164 = vector.broadcast %cst_62 : f32 to vector<64x256xf32>
    %165 = arith.maximumf %163, %164 : vector<64x256xf32>
    %166 = arith.addf %92, %165 : vector<64x256xf32>
    %c64 = arith.constant 64 : index
    %c0_63 = arith.constant 0 : index
    %167 = vector.load %arg6[%c64, %c0_63] : memref<256x256xf32, #tpu.memory_space<vmem>>, vector<64x256xf32>
    tpu.vector_store %arg6[%c64, %c0_63], %166 {strides = array<i32>} : memref<256x256xf32, #tpu.memory_space<vmem>>, vector<64x256xf32>,
    %168 = vector.extract_strided_slice %0 {offsets = [0, 6], sizes = [64, 1], strides = [1, 1]} : vector<64x10xf32> to vector<64x1xf32>
    %169 = vector.extract_strided_slice %0 {offsets = [0, 7], sizes = [64, 1], strides = [1, 1]} : vector<64x10xf32> to vector<64x1xf32>
    %170 = arith.truncf %166 : vector<64x256xf32> to vector<64x256xbf16>
    %c2 = arith.constant 2 : index
    %c0_64 = arith.constant 0 : index
    %c0_65 = arith.constant 0 : index
    %171 = vector.load %arg4[%c2, %c0_64, %c0_65] : memref<4x80x64xbf16, #tpu.memory_space<vmem>>, vector<1x80x64xbf16>
    %172 = vector.shape_cast %171 : vector<1x80x64xbf16> to vector<80x64xbf16>
    %cst_66 = arith.constant dense<0.000000e+00> : vector<80x256xf32>
    %173 = tpu.matmul %172, %170, %cst_66 {dimension_numbers = #tpu.dot_dimension_numbers<[1], [0], [0], [1], [0, 0, 1, 1], [], []>} : vector<80x64xbf16>, vector<64x256xbf16>, vector<80x256xf32> -> vector<80x256xf32>
    %174 = vector.extract_strided_slice %173 {offsets = [0, 0], sizes = [16, 256], strides = [1, 1]} : vector<80x256xf32> to vector<16x256xf32>
    %175 = vector.extract_strided_slice %173 {offsets = [16, 0], sizes = [64, 256], strides = [1, 1]} : vector<80x256xf32> to vector<64x256xf32>
    %176 = vector.broadcast %168 : vector<64x1xf32> to vector<64x256xf32>
    %177 = arith.addf %175, %176 : vector<64x256xf32>
    %178 = vector.extract_strided_slice %174 {offsets = [0, 0], sizes = [16, 128], strides = [1, 1]} : vector<16x256xf32> to vector<16x128xf32>
    %179 = arith.truncf %178 : vector<16x128xf32> to vector<16x128xbf16>
    %cst_67 = arith.constant dense<0.000000e+00> : vector<128x128xf32>
    %180 = tpu.matmul %179, %179, %cst_67 {dimension_numbers = #tpu.dot_dimension_numbers<[0], [0], [1], [1], [0, 1, 1, 1], [], []>} : vector<16x128xbf16>, vector<16x128xbf16>, vector<128x128xf32> -> vector<128x128xf32>
    %cst_68 = arith.constant dense<0xFF800000> : vector<128xf32>
    %181 = vector.multi_reduction <maximumf>, %180, %cst_68 [1] : vector<128x128xf32> to vector<128xf32>
    %182 = vector.shape_cast %181 : vector<128xf32> to vector<128x1xf32>
    %183 = vector.broadcast %182 : vector<128x1xf32> to vector<128x128xf32>
    %184 = arith.subf %180, %183 : vector<128x128xf32>
    %185 = math.exp %184 : vector<128x128xf32>
    %cst_69 = arith.constant dense<0.000000e+00> : vector<128xf32>
    %186 = vector.multi_reduction <add>, %185, %cst_69 [1] : vector<128x128xf32> to vector<128xf32>
    %187 = vector.shape_cast %186 : vector<128xf32> to vector<128x1xf32>
    %cst_70 = arith.constant 1.000000e+00 : f32
    %188 = vector.broadcast %cst_70 : f32 to vector<128x1xf32>
    %189 = arith.divf %188, %187 : vector<128x1xf32>
    %190 = vector.broadcast %189 : vector<128x1xf32> to vector<128x128xf32>
    %191 = arith.mulf %185, %190 : vector<128x128xf32>
    %cst_71 = arith.constant dense<0.000000e+00> : vector<128xf32>
    %192 = vector.multi_reduction <add>, %191, %cst_71 [0] : vector<128x128xf32> to vector<128xf32>
    %193 = vector.shape_cast %192 : vector<128xf32> to vector<1x128xf32>
    %194 = vector.extract_strided_slice %177 {offsets = [0, 0], sizes = [64, 128], strides = [1, 1]} : vector<64x256xf32> to vector<64x128xf32>
    %195 = arith.truncf %194 : vector<64x128xf32> to vector<64x128xbf16>
    %196 = arith.truncf %191 : vector<128x128xf32> to vector<128x128xbf16>
    %cst_72 = arith.constant dense<0.000000e+00> : vector<64x128xf32>
    %197 = tpu.matmul %195, %196, %cst_72 {dimension_numbers = #tpu.dot_dimension_numbers<[1], [0], [0], [1], [0, 0, 1, 1], [], []>} : vector<64x128xbf16>, vector<128x128xbf16>, vector<64x128xf32> -> vector<64x128xf32>
    %cst_73 = arith.constant 9.99999971E-10 : f32
    %198 = vector.broadcast %cst_73 : f32 to vector<1x128xf32>
    %199 = arith.addf %198, %193 : vector<1x128xf32>
    %cst_74 = arith.constant 1.000000e+00 : f32
    %200 = vector.broadcast %cst_74 : f32 to vector<1x128xf32>
    %201 = arith.divf %200, %199 : vector<1x128xf32>
    %202 = vector.broadcast %201 : vector<1x128xf32> to vector<64x128xf32>
    %203 = arith.mulf %197, %202 : vector<64x128xf32>
    %204 = vector.extract_strided_slice %174 {offsets = [0, 128], sizes = [16, 128], strides = [1, 1]} : vector<16x256xf32> to vector<16x128xf32>
    %205 = arith.truncf %204 : vector<16x128xf32> to vector<16x128xbf16>
    %cst_75 = arith.constant dense<0.000000e+00> : vector<128x128xf32>
    %206 = tpu.matmul %205, %205, %cst_75 {dimension_numbers = #tpu.dot_dimension_numbers<[0], [0], [1], [1], [0, 1, 1, 1], [], []>} : vector<16x128xbf16>, vector<16x128xbf16>, vector<128x128xf32> -> vector<128x128xf32>
    %cst_76 = arith.constant dense<0xFF800000> : vector<128xf32>
    %207 = vector.multi_reduction <maximumf>, %206, %cst_76 [1] : vector<128x128xf32> to vector<128xf32>
    %208 = vector.shape_cast %207 : vector<128xf32> to vector<128x1xf32>
    %209 = vector.broadcast %208 : vector<128x1xf32> to vector<128x128xf32>
    %210 = arith.subf %206, %209 : vector<128x128xf32>
    %211 = math.exp %210 : vector<128x128xf32>
    %cst_77 = arith.constant dense<0.000000e+00> : vector<128xf32>
    %212 = vector.multi_reduction <add>, %211, %cst_77 [1] : vector<128x128xf32> to vector<128xf32>
    %213 = vector.shape_cast %212 : vector<128xf32> to vector<128x1xf32>
    %cst_78 = arith.constant 1.000000e+00 : f32
    %214 = vector.broadcast %cst_78 : f32 to vector<128x1xf32>
    %215 = arith.divf %214, %213 : vector<128x1xf32>
    %216 = vector.broadcast %215 : vector<128x1xf32> to vector<128x128xf32>
    %217 = arith.mulf %211, %216 : vector<128x128xf32>
    %cst_79 = arith.constant dense<0.000000e+00> : vector<128xf32>
    %218 = vector.multi_reduction <add>, %217, %cst_79 [0] : vector<128x128xf32> to vector<128xf32>
    %219 = vector.shape_cast %218 : vector<128xf32> to vector<1x128xf32>
    %220 = vector.extract_strided_slice %177 {offsets = [0, 128], sizes = [64, 128], strides = [1, 1]} : vector<64x256xf32> to vector<64x128xf32>
    %221 = arith.truncf %220 : vector<64x128xf32> to vector<64x128xbf16>
    %222 = arith.truncf %217 : vector<128x128xf32> to vector<128x128xbf16>
    %cst_80 = arith.constant dense<0.000000e+00> : vector<64x128xf32>
    %223 = tpu.matmul %221, %222, %cst_80 {dimension_numbers = #tpu.dot_dimension_numbers<[1], [0], [0], [1], [0, 0, 1, 1], [], []>} : vector<64x128xbf16>, vector<128x128xbf16>, vector<64x128xf32> -> vector<64x128xf32>
    %cst_81 = arith.constant 9.99999971E-10 : f32
    %224 = vector.broadcast %cst_81 : f32 to vector<1x128xf32>
    %225 = arith.addf %224, %219 : vector<1x128xf32>
    %cst_82 = arith.constant 1.000000e+00 : f32
    %226 = vector.broadcast %cst_82 : f32 to vector<1x128xf32>
    %227 = arith.divf %226, %225 : vector<1x128xf32>
    %228 = vector.broadcast %227 : vector<1x128xf32> to vector<64x128xf32>
    %229 = arith.mulf %223, %228 : vector<64x128xf32>
    %230 = tpu.concatenate %203, %229 in 1 : vector<64x128xf32>, vector<64x128xf32> -> vector<64x256xf32>
    %c2_83 = arith.constant 2 : index
    %c0_84 = arith.constant 0 : index
    %c0_85 = arith.constant 0 : index
    %231 = vector.load %arg5[%c2_83, %c0_84, %c0_85] : memref<4x64x64xbf16, #tpu.memory_space<vmem>>, vector<1x64x64xbf16>
    %232 = vector.shape_cast %231 : vector<1x64x64xbf16> to vector<64x64xbf16>
    %233 = arith.subf %166, %230 : vector<64x256xf32>
    %234 = arith.truncf %233 : vector<64x256xf32> to vector<64x256xbf16>
    %cst_86 = arith.constant dense<0.000000e+00> : vector<64x256xf32>
    %235 = tpu.matmul %232, %234, %cst_86 {dimension_numbers = #tpu.dot_dimension_numbers<[1], [0], [0], [1], [0, 0, 1, 1], [], []>} : vector<64x64xbf16>, vector<64x256xbf16>, vector<64x256xf32> -> vector<64x256xf32>
    %236 = vector.broadcast %169 : vector<64x1xf32> to vector<64x256xf32>
    %237 = arith.addf %235, %236 : vector<64x256xf32>
    %cst_87 = arith.constant 0.000000e+00 : f32
    %238 = vector.broadcast %cst_87 : f32 to vector<64x256xf32>
    %239 = arith.maximumf %237, %238 : vector<64x256xf32>
    %240 = arith.addf %166, %239 : vector<64x256xf32>
    %c128 = arith.constant 128 : index
    %c0_88 = arith.constant 0 : index
    %241 = vector.load %arg6[%c128, %c0_88] : memref<256x256xf32, #tpu.memory_space<vmem>>, vector<64x256xf32>
    tpu.vector_store %arg6[%c128, %c0_88], %240 {strides = array<i32>} : memref<256x256xf32, #tpu.memory_space<vmem>>, vector<64x256xf32>,
    %242 = vector.extract_strided_slice %0 {offsets = [0, 8], sizes = [64, 1], strides = [1, 1]} : vector<64x10xf32> to vector<64x1xf32>
    %243 = vector.extract_strided_slice %0 {offsets = [0, 9], sizes = [64, 1], strides = [1, 1]} : vector<64x10xf32> to vector<64x1xf32>
    %244 = arith.truncf %240 : vector<64x256xf32> to vector<64x256xbf16>
    %c3 = arith.constant 3 : index
    %c0_89 = arith.constant 0 : index
    %c0_90 = arith.constant 0 : index
    %245 = vector.load %arg4[%c3, %c0_89, %c0_90] : memref<4x80x64xbf16, #tpu.memory_space<vmem>>, vector<1x80x64xbf16>
    %246 = vector.shape_cast %245 : vector<1x80x64xbf16> to vector<80x64xbf16>
    %cst_91 = arith.constant dense<0.000000e+00> : vector<80x256xf32>
    %247 = tpu.matmul %246, %244, %cst_91 {dimension_numbers = #tpu.dot_dimension_numbers<[1], [0], [0], [1], [0, 0, 1, 1], [], []>} : vector<80x64xbf16>, vector<64x256xbf16>, vector<80x256xf32> -> vector<80x256xf32>
    %248 = vector.extract_strided_slice %247 {offsets = [0, 0], sizes = [16, 256], strides = [1, 1]} : vector<80x256xf32> to vector<16x256xf32>
    %249 = vector.extract_strided_slice %247 {offsets = [16, 0], sizes = [64, 256], strides = [1, 1]} : vector<80x256xf32> to vector<64x256xf32>
    %250 = vector.broadcast %242 : vector<64x1xf32> to vector<64x256xf32>
    %251 = arith.addf %249, %250 : vector<64x256xf32>
    %252 = vector.extract_strided_slice %248 {offsets = [0, 0], sizes = [16, 128], strides = [1, 1]} : vector<16x256xf32> to vector<16x128xf32>
    %253 = arith.truncf %252 : vector<16x128xf32> to vector<16x128xbf16>
    %cst_92 = arith.constant dense<0.000000e+00> : vector<128x128xf32>
    %254 = tpu.matmul %253, %253, %cst_92 {dimension_numbers = #tpu.dot_dimension_numbers<[0], [0], [1], [1], [0, 1, 1, 1], [], []>} : vector<16x128xbf16>, vector<16x128xbf16>, vector<128x128xf32> -> vector<128x128xf32>
    %cst_93 = arith.constant dense<0xFF800000> : vector<128xf32>
    %255 = vector.multi_reduction <maximumf>, %254, %cst_93 [1] : vector<128x128xf32> to vector<128xf32>
    %256 = vector.shape_cast %255 : vector<128xf32> to vector<128x1xf32>
    %257 = vector.broadcast %256 : vector<128x1xf32> to vector<128x128xf32>
    %258 = arith.subf %254, %257 : vector<128x128xf32>
    %259 = math.exp %258 : vector<128x128xf32>
    %cst_94 = arith.constant dense<0.000000e+00> : vector<128xf32>
    %260 = vector.multi_reduction <add>, %259, %cst_94 [1] : vector<128x128xf32> to vector<128xf32>
    %261 = vector.shape_cast %260 : vector<128xf32> to vector<128x1xf32>
    %cst_95 = arith.constant 1.000000e+00 : f32
    %262 = vector.broadcast %cst_95 : f32 to vector<128x1xf32>
    %263 = arith.divf %262, %261 : vector<128x1xf32>
    %264 = vector.broadcast %263 : vector<128x1xf32> to vector<128x128xf32>
    %265 = arith.mulf %259, %264 : vector<128x128xf32>
    %cst_96 = arith.constant dense<0.000000e+00> : vector<128xf32>
    %266 = vector.multi_reduction <add>, %265, %cst_96 [0] : vector<128x128xf32> to vector<128xf32>
    %267 = vector.shape_cast %266 : vector<128xf32> to vector<1x128xf32>
    %268 = vector.extract_strided_slice %251 {offsets = [0, 0], sizes = [64, 128], strides = [1, 1]} : vector<64x256xf32> to vector<64x128xf32>
    %269 = arith.truncf %268 : vector<64x128xf32> to vector<64x128xbf16>
    %270 = arith.truncf %265 : vector<128x128xf32> to vector<128x128xbf16>
    %cst_97 = arith.constant dense<0.000000e+00> : vector<64x128xf32>
    %271 = tpu.matmul %269, %270, %cst_97 {dimension_numbers = #tpu.dot_dimension_numbers<[1], [0], [0], [1], [0, 0, 1, 1], [], []>} : vector<64x128xbf16>, vector<128x128xbf16>, vector<64x128xf32> -> vector<64x128xf32>
    %cst_98 = arith.constant 9.99999971E-10 : f32
    %272 = vector.broadcast %cst_98 : f32 to vector<1x128xf32>
    %273 = arith.addf %272, %267 : vector<1x128xf32>
    %cst_99 = arith.constant 1.000000e+00 : f32
    %274 = vector.broadcast %cst_99 : f32 to vector<1x128xf32>
    %275 = arith.divf %274, %273 : vector<1x128xf32>
    %276 = vector.broadcast %275 : vector<1x128xf32> to vector<64x128xf32>
    %277 = arith.mulf %271, %276 : vector<64x128xf32>
    %278 = vector.extract_strided_slice %248 {offsets = [0, 128], sizes = [16, 128], strides = [1, 1]} : vector<16x256xf32> to vector<16x128xf32>
    %279 = arith.truncf %278 : vector<16x128xf32> to vector<16x128xbf16>
    %cst_100 = arith.constant dense<0.000000e+00> : vector<128x128xf32>
    %280 = tpu.matmul %279, %279, %cst_100 {dimension_numbers = #tpu.dot_dimension_numbers<[0], [0], [1], [1], [0, 1, 1, 1], [], []>} : vector<16x128xbf16>, vector<16x128xbf16>, vector<128x128xf32> -> vector<128x128xf32>
    %cst_101 = arith.constant dense<0xFF800000> : vector<128xf32>
    %281 = vector.multi_reduction <maximumf>, %280, %cst_101 [1] : vector<128x128xf32> to vector<128xf32>
    %282 = vector.shape_cast %281 : vector<128xf32> to vector<128x1xf32>
    %283 = vector.broadcast %282 : vector<128x1xf32> to vector<128x128xf32>
    %284 = arith.subf %280, %283 : vector<128x128xf32>
    %285 = math.exp %284 : vector<128x128xf32>
    %cst_102 = arith.constant dense<0.000000e+00> : vector<128xf32>
    %286 = vector.multi_reduction <add>, %285, %cst_102 [1] : vector<128x128xf32> to vector<128xf32>
    %287 = vector.shape_cast %286 : vector<128xf32> to vector<128x1xf32>
    %cst_103 = arith.constant 1.000000e+00 : f32
    %288 = vector.broadcast %cst_103 : f32 to vector<128x1xf32>
    %289 = arith.divf %288, %287 : vector<128x1xf32>
    %290 = vector.broadcast %289 : vector<128x1xf32> to vector<128x128xf32>
    %291 = arith.mulf %285, %290 : vector<128x128xf32>
    %cst_104 = arith.constant dense<0.000000e+00> : vector<128xf32>
    %292 = vector.multi_reduction <add>, %291, %cst_104 [0] : vector<128x128xf32> to vector<128xf32>
    %293 = vector.shape_cast %292 : vector<128xf32> to vector<1x128xf32>
    %294 = vector.extract_strided_slice %251 {offsets = [0, 128], sizes = [64, 128], strides = [1, 1]} : vector<64x256xf32> to vector<64x128xf32>
    %295 = arith.truncf %294 : vector<64x128xf32> to vector<64x128xbf16>
    %296 = arith.truncf %291 : vector<128x128xf32> to vector<128x128xbf16>
    %cst_105 = arith.constant dense<0.000000e+00> : vector<64x128xf32>
    %297 = tpu.matmul %295, %296, %cst_105 {dimension_numbers = #tpu.dot_dimension_numbers<[1], [0], [0], [1], [0, 0, 1, 1], [], []>} : vector<64x128xbf16>, vector<128x128xbf16>, vector<64x128xf32> -> vector<64x128xf32>
    %cst_106 = arith.constant 9.99999971E-10 : f32
    %298 = vector.broadcast %cst_106 : f32 to vector<1x128xf32>
    %299 = arith.addf %298, %293 : vector<1x128xf32>
    %cst_107 = arith.constant 1.000000e+00 : f32
    %300 = vector.broadcast %cst_107 : f32 to vector<1x128xf32>
    %301 = arith.divf %300, %299 : vector<1x128xf32>
    %302 = vector.broadcast %301 : vector<1x128xf32> to vector<64x128xf32>
    %303 = arith.mulf %297, %302 : vector<64x128xf32>
    %304 = tpu.concatenate %277, %303 in 1 : vector<64x128xf32>, vector<64x128xf32> -> vector<64x256xf32>
    %c3_108 = arith.constant 3 : index
    %c0_109 = arith.constant 0 : index
    %c0_110 = arith.constant 0 : index
    %305 = vector.load %arg5[%c3_108, %c0_109, %c0_110] : memref<4x64x64xbf16, #tpu.memory_space<vmem>>, vector<1x64x64xbf16>
    %306 = vector.shape_cast %305 : vector<1x64x64xbf16> to vector<64x64xbf16>
    %307 = arith.subf %240, %304 : vector<64x256xf32>
    %308 = arith.truncf %307 : vector<64x256xf32> to vector<64x256xbf16>
    %cst_111 = arith.constant dense<0.000000e+00> : vector<64x256xf32>
    %309 = tpu.matmul %306, %308, %cst_111 {dimension_numbers = #tpu.dot_dimension_numbers<[1], [0], [0], [1], [0, 0, 1, 1], [], []>} : vector<64x64xbf16>, vector<64x256xbf16>, vector<64x256xf32> -> vector<64x256xf32>
    %310 = vector.broadcast %243 : vector<64x1xf32> to vector<64x256xf32>
    %311 = arith.addf %309, %310 : vector<64x256xf32>
    %cst_112 = arith.constant 0.000000e+00 : f32
    %312 = vector.broadcast %cst_112 : f32 to vector<64x256xf32>
    %313 = arith.maximumf %311, %312 : vector<64x256xf32>
    %314 = arith.addf %240, %313 : vector<64x256xf32>
    %c192 = arith.constant 192 : index
    %c0_113 = arith.constant 0 : index
    %315 = vector.load %arg6[%c192, %c0_113] : memref<256x256xf32, #tpu.memory_space<vmem>>, vector<64x256xf32>
    tpu.vector_store %arg6[%c192, %c0_113], %314 {strides = array<i32>} : memref<256x256xf32, #tpu.memory_space<vmem>>, vector<64x256xf32>,
    return
  }
  func.func @transform_0(%arg0: i32) -> (i32, i32) {
    %c0_i32 = arith.constant 0 : i32
    %c0_i32_0 = arith.constant 0 : i32
    return %c0_i32, %arg0 : i32, i32
  }
  func.func @transform_1(%arg0: i32) -> (i32, i32, i32) {
    %c0_i32 = arith.constant 0 : i32
    %c0_i32_0 = arith.constant 0 : i32
    %c0_i32_1 = arith.constant 0 : i32
    %c0_i32_2 = arith.constant 0 : i32
    return %c0_i32, %c0_i32_0, %c0_i32_1 : i32, i32, i32
  }
  func.func @transform_2(%arg0: i32) -> (i32, i32) {
    %c0_i32 = arith.constant 0 : i32
    %c0_i32_0 = arith.constant 0 : i32
    %c0_i32_1 = arith.constant 0 : i32
    return %c0_i32, %c0_i32_0 : i32, i32
  }
  func.func @transform_3(%arg0: i32) -> (i32, i32, i32) {
    %c0_i32 = arith.constant 0 : i32
    %c0_i32_0 = arith.constant 0 : i32
    %c0_i32_1 = arith.constant 0 : i32
    %c0_i32_2 = arith.constant 0 : i32
    return %c0_i32, %c0_i32_0, %c0_i32_1 : i32, i32, i32
  }
  func.func @transform_4(%arg0: i32) -> (i32, i32, i32) {
    %c0_i32 = arith.constant 0 : i32
    %c0_i32_0 = arith.constant 0 : i32
    %c0_i32_1 = arith.constant 0 : i32
    %c0_i32_2 = arith.constant 0 : i32
    return %c0_i32, %c0_i32_0, %c0_i32_1 : i32, i32, i32
  }
  func.func @transform_5(%arg0: i32) -> (i32, i32) {
    %c0_i32 = arith.constant 0 : i32
    %c0_i32_0 = arith.constant 0 : i32
    return %c0_i32, %arg0 : i32, i32
  }
}

</mosaic_0001>

<bundles_post_ra>
// kernel: stacked_attention.1
= control target key start
LH: loop header
LB: loop body
LE: loop exit
PB: predicated region body
PF: predicated region fallthrough
CT: control target
= control target key end

     0   :  { %v9484_v3 = vmov 0   ;;  %vm121_vm0 = vcmask 523264   ;;  %v6694_v37 = vmov 1   ;;  %vm599_vm1 = vcmask 130048   ;;  %s9478_s0 = inlined_call_operand.vmem [shape: f32[64,256], index: 0, kind: input, shape index: {}]   ;;  %s9479_s1 = inlined_call_operand.vmem [shape: bf16[2,64,64], index: 1, kind: input, shape index: {}]   ;;  %s9480_s2 = inlined_call_operand.vmem [shape: f32[64,10], index: 2, kind: input, shape index: {}]   ;;  %s9481_s3 = inlined_call_operand.vmem [shape: bf16[4,80,64], index: 3, kind: input, shape index: {}]   ;;  %s9482_s4 = inlined_call_operand.vmem [shape: bf16[4,64,64], index: 4, kind: input, shape index: {}]   ;;  %s9483_s5 = inlined_call_operand.vmem [shape: f32[256,256], index: 5, kind: output, shape index: {}]  }
   0x1   :  { %v42_v0 = vld [vmem:[%s9478_s0 + $0x68] sm:$0xff]  ;;  %v44_v1 = vld [vmem:[%s9478_s0 + $0x78] sm:$0xff]  ;;  %v41_v2 = vld [vmem:[%s9478_s0 + $0x60] sm:$0xff]  ;;  %166 = vmatprep.mubr.bf16.mxu0 %v9484_v3  ;;  %186 = vmatprep.mubr.bf16.mxu1 %v9484_v3 }
   0x2   :  { %v60_v4 = vpack.c.bf16 %v44_v1, %v42_v0  ;;  %v43_v5 = vld [vmem:[%s9478_s0 + $0x70] sm:$0xff]  ;;  %v38_v6 = vld [vmem:[%s9478_s0 + $0x48] sm:$0xff]  ;;  %v40_v7 = vld [vmem:[%s9478_s0 + $0x58] sm:$0xff]  ;;  %6021 = vset.pattern.permute.xlu1 %v9484_v3  ;;  %6020 = vset.pattern.permute.xlu0 %v9484_v3 }
   0x3   :  { %v59_v8 = vpack.c.bf16 %v43_v5, %v41_v2  ;;  %v58_v9 = vpack.c.bf16 %v40_v7, %v38_v6  ;;  %v37_v10 = vld [vmem:[%s9478_s0 + $0x40] sm:$0xff]  ;;  %v39_v11 = vld [vmem:[%s9478_s0 + $0x50] sm:$0xff]  ;;  %v34_v12 = vld [vmem:[%s9478_s0 + $0x28] sm:$0xff] }
   0x4   :  { %142 = vmatprep.subr.bf16.mxu0 %v60_v4  ;;  %6002 = vmatprep.subr.bf16.mxu1 %v60_v4  ;;  %v36_v13 = vld [vmem:[%s9478_s0 + $0x38] sm:$0xff]  ;;  %v57_v14 = vpack.c.bf16 %v39_v11, %v37_v10  ;;  %v33_v15 = vld [vmem:[%s9478_s0 + $0x20] sm:$0xff]  ;;  %v35_v16 = vld [vmem:[%s9478_s0 + $0x30] sm:$0xff] }
   0x5   :  { %143 = vmatpush1.bf16.msra.mxu0 %v59_v8  ;;  %6006 = vmatpush1.bf16.msra.mxu1 %v59_v8  ;;  %v56_v17 = vpack.c.bf16 %v36_v13, %v34_v12  ;;  %v30_v18 = vld [vmem:[%s9478_s0 + $0x8] sm:$0xff]  ;;  %v32_v19 = vld [vmem:[%s9478_s0 + $0x18] sm:$0xff]  ;;  %v55_v20 = vpack.c.bf16 %v35_v16, %v33_v15  ;;  %v29_v21 = vld [vmem:[%s9478_s0] sm:$0xff] }
   0x6   :  { %144 = vmatprep.subr.bf16.mxu0 %v58_v9  ;;  %6003 = vmatprep.subr.bf16.mxu1 %v58_v9  ;;  %v54_v22 = vpack.c.bf16 %v32_v19, %v30_v18  ;;  %v31_v23 = vld [vmem:[%s9478_s0 + $0x10] sm:$0xff]  ;;  %v25_v25 = vld [vmem:[%s9480_s2 + $0x20] sm:$0xff]  ;;  %v28_v26 = vld [vmem:[%s9480_s2 + $0x38] sm:$0xff] }
   0x7   :  { %v27_v24 = vld [vmem:[%s9480_s2 + $0x30] sm:$0xff]  ;;  %83 = vperm.xlu1 %6021, %v25_v25   ;;  %v26_v27 = vld [vmem:[%s9480_s2 + $0x28] sm:$0xff]  ;;  %v53_v28 = vpack.c.bf16 %v31_v23, %v29_v21  ;;  %v6040_v29 = vld [vmem:[%s9479_s1] sm:$0xff]  }
   0x8   :  { %93 = vperm.xlu0 %6020, %v27_v24   ;;  %v6041_v30 = vld [vmem:[%s9479_s1 + $0x10] sm:$0xff]   ;;  %v24_v31 = vld [vmem:[%s9480_s2 + $0x18] sm:$0xff]  ;;  %v22_v33 = vld [vmem:[%s9480_s2 + $0x8] sm:$0xff] }
   0x9   :  { %145 = vmatpush1.bf16.msra.mxu0 %v57_v14  ;;  %6007 = vmatpush1.bf16.msra.mxu1 %v57_v14  ;;  %v23_v32 = vld [vmem:[%s9480_s2 + $0x10] sm:$0xff]  ;;  %v21_v34 = vld [vmem:[%s9480_s2] sm:$0xff]  ;;  %v6042_v35 = vld [vmem:[%s9479_s1 + $0x8] sm:$0xff]  }
   0xa   :  { %146 = vmatprep.subr.bf16.mxu0 %v56_v17  ;;  %6004 = vmatprep.subr.bf16.mxu1 %v56_v17  ;;  %v6043_v36 = vld [vmem:[%s9479_s1 + $0x18] sm:$0xff]  }
   0xb   :  { %88 = vperm.xlu1 %6021, %v26_v27  }
   0xc   :  { %98 = vperm.xlu0 %6020, %v28_v26  }
   0xd   :  { %147 = vmatpush1.bf16.msra.mxu0 %v55_v20  ;;  %6008 = vmatpush1.bf16.msra.mxu1 %v55_v20 }
   0xe   :  { %148 = vmatprep.subr.bf16.mxu0 %v54_v22  ;;  %6005 = vmatprep.subr.bf16.mxu1 %v54_v22 }
   0xf   :  { %78 = vperm.xlu1 %6021, %v24_v31  }
  0x10   :  { %73 = vperm.xlu0 %6020, %v23_v32  }
  0x11   :  { %149 = vmatpush1.bf16.msra.mxu0 %v53_v28  ;;  %6009 = vmatpush1.bf16.msra.mxu1 %v53_v28 }
  0x13   :  { %68 = vperm.xlu1 %6021, %v22_v33  }
  0x14   :  { %5288 = vmatmul.mubr.msk.bf16.vlgmr.msra.gmra.mxu0 %vm121_vm0, %v6040_v29  ;;  %5290 = vmatmul.mubr.msk.bf16.vlgmr.msra.gmra.mxu1 %vm121_vm0, %v6041_v30 }
  0x15   :  { %176 = vmatprep.mubr.bf16.mxu0 %v9484_v3  ;;  %196 = vmatprep.mubr.bf16.mxu1 %v9484_v3 }
  0x16   :  { %63 = vperm.xlu0 %6020, %v21_v34  }
  0x17   :  { %6023 = vset.pattern.permute.xlu1 %v6694_v37 }
  0x18   :  { %269 = vperm.xlu1 %6023, %v28_v26  }
  0x1a   :  { %6022 = vset.pattern.permute.xlu0 %v6694_v37 }
  0x1b   :  { %265 = vperm.xlu0 %6022, %v27_v24  }
  0x1c   :  { %5289 = vmatmul.mubr.msk.bf16.gmra.mxu0 %vm121_vm0, %v6042_v35  ;;  %5291 = vmatmul.mubr.msk.bf16.gmra.mxu1 %vm121_vm0, %v6043_v36 }
  0x1d   :  { %336 = vmatprep.mubr.bf16.mxu1 %v9484_v3  ;;  %483 = vmatprep.mubr.bf16.mxu0 %v9484_v3 }
  0x1e   :  { %257 = vperm.xlu1 %6023, %v25_v25  }
  0x1f   :  { %261 = vperm.xlu0 %6022, %v26_v27  }
  0x22   :  { %249 = vperm.xlu1 %6023, %v23_v32  }
  0x23   :  { %253 = vperm.xlu0 %6022, %v24_v31  }
  0x26   :  { %241 = vperm.xlu1 %6023, %v21_v34  }
  0x27   :  { %245 = vperm.xlu0 %6022, %v22_v33  }
  0x82   :  { %v84_v39 = vpop.permute.xlu1 %83 }
  0x83   :  { %v94_v38 = vpop.permute.xlu0 %93 }
  0x86   :  { %v89_v47 = vpop.permute.xlu1 %88 }
  0x87   :  { %v99_v46 = vpop.permute.xlu0 %98 }
  0x8a   :  { %v79_v54 = vpop.permute.xlu1 %78 }
  0x8b   :  { %v74_v55 = vpop.permute.xlu0 %73 }
  0x8e   :  { %v69_v10 = vpop.permute.xlu1 %68 }
  0x91   :  { %v64_v11 = vpop.permute.xlu0 %63 }
  0xd4   :  { %v168_v40 = vpop.f32.mrf.mxu0  ;;  %v188_v41 = vpop.f32.mrf.mxu1 }
  0xd5   :  { %v189_v9 = vadd.f32 %v188_v41, %v84_v39  ;;  %v169_v28 = vadd.f32 %v168_v40, %v64_v11  ;;  %v6045_v40 = vld [vmem:[%s9479_s1 + $0x28] sm:$0xff]   ;;  %v6046_v41 = vld [vmem:[%s9479_s1 + $0x30] sm:$0xff]  }
  0xd6   :  { %v170_v42 = vpop.f32.mrf.mxu0  ;;  %v190_v43 = vpop.f32.mrf.mxu1 }
  0xd7   :  { %v191_v0 = vadd.f32 %v190_v43, %v84_v39  ;;  %v171_v20 = vadd.f32 %v170_v42, %v64_v11  ;;  %v215_v23 = vmax.f32 %v189_v9, 0.0  ;;  %v207_v35 = vmax.f32 %v169_v28, 0.0  ;;  %v6044_v39 = vld [vmem:[%s9479_s1 + $0x20] sm:$0xff]   ;;  %v6047_v42 = vld [vmem:[%s9479_s1 + $0x38] sm:$0xff]  }
  0xd8   :  { %v172_v44 = vpop.f32.mrf.mxu0  ;;  %v192_v45 = vpop.f32.mrf.mxu1 }
  0xd9   :  { %v193_v2 = vadd.f32 %v192_v45, %v89_v47  ;;  %v216_v13 = vmax.f32 %v191_v0, 0.0  ;;  %v173_v27 = vadd.f32 %v172_v44, %v69_v10  ;;  %v208_v31 = vmax.f32 %v171_v20, 0.0 }
  0xda   :  { %v174_v48 = vpop.f32.mrf.mxu0  ;;  %v194_v49 = vpop.f32.mrf.mxu1 }
  0xdb   :  { %v195_v58 = vadd.f32 %v194_v49, %v89_v47  ;;  %v217_v16 = vmax.f32 %v193_v2, 0.0  ;;  %v175_v19 = vadd.f32 %v174_v48, %v69_v10  ;;  %v209_v34 = vmax.f32 %v173_v27, 0.0 }
  0xdc   :  { %v178_v50 = vpop.f32.mrf.mxu0  ;;  %v198_v51 = vpop.f32.mrf.mxu1 }
  0xdd   :  { %v199_v61 = vadd.f32 %v198_v51, %v94_v38  ;;  %v218_v5 = vmax.f32 %v195_v58, 0.0  ;;  %v179_v24 = vadd.f32 %v178_v50, %v74_v55  ;;  %v236_v26 = vpack.c.bf16 %v217_v16, %v215_v23 }
  0xde   :  { %v180_v52 = vpop.f32.mrf.mxu0  ;;  %v200_v53 = vpop.f32.mrf.mxu1  ;;  %v210_v30 = vmax.f32 %v175_v19, 0.0 }
  0xdf   :  { %v201_v59 = vadd.f32 %v200_v53, %v94_v38  ;;  %v219_v12 = vmax.f32 %v199_v61, 0.0  ;;  %v181_v14 = vadd.f32 %v180_v52, %v74_v55  ;;  %v237_v22 = vpack.c.bf16 %v218_v5, %v216_v13  ;;  %v266_v52 = vpop.permute.xlu0 %265 }
  0xe0   :  { %v182_v56 = vpop.f32.mrf.mxu0  ;;  %v202_v57 = vpop.f32.mrf.mxu1  ;;  %v211_v33 = vmax.f32 %v179_v24, 0.0  ;;  %v233_v37 = vpack.c.bf16 %v210_v30, %v208_v31  ;;  %v232_v38 = vpack.c.bf16 %v209_v34, %v207_v35 }
  0xe1   :  { %v203_v60 = vadd.f32 %v202_v57, %v99_v46  ;;  %v220_v6 = vmax.f32 %v201_v59, 0.0  ;;  %v183_v17 = vadd.f32 %v182_v56, %v79_v54  ;;  %v212_v25 = vmax.f32 %v181_v14, 0.0 }
  0xe2   :  { %v184_v62 = vpop.f32.mrf.mxu0  ;;  %v204_v63 = vpop.f32.mrf.mxu1 }
  0xe3   :  { %v205_v1 = vadd.f32 %v204_v63, %v99_v46  ;;  %v221_v4 = vmax.f32 %v203_v60, 0.0  ;;  %v185_v7 = vadd.f32 %v184_v62, %v79_v54  ;;  %v213_v29 = vmax.f32 %v183_v17, 0.0  ;;  %v270_v54 = vpop.permute.xlu1 %269  ;;  %v262_v57 = vpop.permute.xlu0 %261 }
  0xe5   :  { %v222_v8 = vmax.f32 %v205_v1, 0.0  ;;  %v238_v18 = vpack.c.bf16 %v221_v4, %v219_v12  ;;  %v214_v21 = vmax.f32 %v185_v7, 0.0  ;;  %v234_v36 = vpack.c.bf16 %v213_v29, %v211_v33 }
  0xe7   :  { %v239_v15 = vpack.c.bf16 %v222_v8, %v220_v6  ;;  %v235_v32 = vpack.c.bf16 %v214_v21, %v212_v25  ;;  %v258_v59 = vpop.permute.xlu1 %257  ;;  %v254_v1 = vpop.permute.xlu0 %253 }
  0xe9   :  { %312 = vmatprep.subr.bf16.mxu1 %v239_v15 }
  0xea   :  { %313 = vmatpush1.bf16.msra.mxu1 %v238_v18 }
  0xeb   :  { %314 = vmatprep.subr.bf16.mxu1 %v237_v22  ;;  %v250_v7 = vpop.permute.xlu1 %249  ;;  %v246_v19 = vpop.permute.xlu0 %245 }
  0xee   :  { %315 = vmatpush1.bf16.msra.mxu1 %v236_v26 }
  0xef   :  { %316 = vmatprep.subr.bf16.mxu1 %v235_v32  ;;  %v242_v26 = vpop.permute.xlu1 %241 }
  0xf2   :  { %317 = vmatpush1.bf16.msra.mxu1 %v234_v36 }
  0xf3   :  { %318 = vmatprep.subr.bf16.mxu1 %v233_v37 }
  0xf6   :  { %319 = vmatpush1.bf16.msra.mxu1 %v232_v38 }
  0xf9   :  { %5304 = vmatmul.mubr.msk.bf16.vlgmr.msra.gmra.mxu1 %vm121_vm0, %v6044_v39 }
  0xfa   :  { %346 = vmatprep.mubr.bf16.mxu1 %v9484_v3 }
 0x101   :  { %5305 = vmatmul.mubr.msk.bf16.gmra.mxu1 %vm121_vm0, %v6045_v40 }
 0x102   :  { %356 = vmatprep.mubr.bf16.mxu1 %v9484_v3 }
 0x109   :  { %5306 = vmatmul.mubr.msk.bf16.gmra.mxu1 %vm121_vm0, %v6046_v41 }
 0x10a   :  { %366 = vmatprep.mubr.bf16.mxu1 %v9484_v3 }
 0x111   :  { %5307 = vmatmul.mubr.msk.bf16.gmra.mxu1 %vm121_vm0, %v6047_v42 }
 0x1b9   :  { %v338_v43 = vpop.f32.mrf.mxu1 }
 0x1ba   :  { %v339_v36 = vadd.f32 %v338_v43, %v242_v26 }
 0x1bb   :  { %v340_v44 = vpop.f32.mrf.mxu1 }
 0x1bc   :  { %v341_v29 = vadd.f32 %v340_v44, %v242_v26  ;;  %v6892_v42 = vmax.f32 %v339_v36, 0.0  ;;  %v6048_v44 = vld [vmem:[%s9481_s3] sm:$0xff]  }
 0x1bd   :  { %v342_v45 = vpop.f32.mrf.mxu1 }
 0x1be   :  { %v343_v31 = vadd.f32 %v342_v45, %v246_v19  ;;  %v6884_v38 = vmax.f32 %v341_v29, 0.0  ;;  %9544 = vst [vmem:[#allocation17_spill] sm:$0xff] %v6892_v42  ;;  %v6049_v45 = vld [vmem:[%s9481_s3 + $0x8] sm:$0xff]  }
 0x1bf   :  { %v344_v46 = vpop.f32.mrf.mxu1 }
 0x1c0   :  { %v345_v23 = vadd.f32 %v344_v46, %v246_v19  ;;  %9542 = vst [vmem:[#allocation15_spill] sm:$0xff] %v6884_v38  ;;  %v6886_v39 = vmax.f32 %v343_v31, 0.0  ;;  %v6050_v46 = vld [vmem:[%s9481_s3 + $0x10] sm:$0xff]  }
 0x1c1   :  { %v348_v47 = vpop.f32.mrf.mxu1 }
 0x1c2   :  { %v349_v27 = vadd.f32 %v348_v47, %v250_v7  ;;  %v6878_v34 = vmax.f32 %v345_v23, 0.0  ;;  %9543 = vst [vmem:[#allocation16_spill] sm:$0xff] %v6886_v39  ;;  %v393_v43 = vpack.c.bf16 %v6886_v39, %v6892_v42  ;;  %v6051_v47 = vld [vmem:[%s9481_s3 + $0x18] sm:$0xff]   ;;  %v6695_v42 = vmov 2  }
 0x1c3   :  { %v350_v48 = vpop.f32.mrf.mxu1 }
 0x1c4   :  { %v351_v16 = vadd.f32 %v350_v48, %v250_v7  ;;  %9540 = vst [vmem:[#allocation13_spill] sm:$0xff] %v6878_v34  ;;  %v6882_v37 = vmax.f32 %v349_v27, 0.0  ;;  %v394_v41 = vpack.c.bf16 %v6878_v34, %v6884_v38  ;;  %v6052_v48 = vld [vmem:[%s9481_s3 + $0x20] sm:$0xff]  }
 0x1c5   :  { %v352_v49 = vpop.f32.mrf.mxu1 }
 0x1c6   :  { %v353_v20 = vadd.f32 %v352_v49, %v254_v1  ;;  %v6872_v30 = vmax.f32 %v351_v16, 0.0  ;;  %9541 = vst [vmem:[#allocation14_spill] sm:$0xff] %v6882_v37 }
 0x1c7   :  { %v354_v50 = vpop.f32.mrf.mxu1 }
 0x1c8   :  { %v355_v10 = vadd.f32 %v354_v50, %v254_v1  ;;  %9538 = vst [vmem:[#allocation11_spill] sm:$0xff] %v6872_v30  ;;  %v6874_v32 = vmax.f32 %v353_v20, 0.0 }
 0x1c9   :  { %v358_v51 = vpop.f32.mrf.mxu1 }
 0x1ca   :  { %v359_v14 = vadd.f32 %v358_v51, %v258_v59  ;;  %v6866_v24 = vmax.f32 %v355_v10, 0.0  ;;  %9539 = vst [vmem:[#allocation12_spill] sm:$0xff] %v6874_v32  ;;  %v395_v40 = vpack.c.bf16 %v6874_v32, %v6882_v37 }
 0x1cb   :  { %v360_v53 = vpop.f32.mrf.mxu1 }
 0x1cc   :  { %v361_v5 = vadd.f32 %v360_v53, %v258_v59  ;;  %9536 = vst [vmem:[#allocation9_spill] sm:$0xff] %v6866_v24  ;;  %v6870_v28 = vmax.f32 %v359_v14, 0.0  ;;  %v396_v35 = vpack.c.bf16 %v6866_v24, %v6872_v30 }
 0x1cd   :  { %v362_v55 = vpop.f32.mrf.mxu1 }
 0x1ce   :  { %v363_v8 = vadd.f32 %v362_v55, %v262_v57  ;;  %v6858_v17 = vmax.f32 %v361_v5, 0.0  ;;  %9537 = vst [vmem:[#allocation10_spill] sm:$0xff] %v6870_v28 }
 0x1cf   :  { %v364_v56 = vpop.f32.mrf.mxu1 }
 0x1d0   :  { %v365_v62 = vadd.f32 %v364_v56, %v262_v57  ;;  %9534 = vst [vmem:[#allocation7_spill] sm:$0xff] %v6858_v17  ;;  %v6862_v21 = vmax.f32 %v363_v8, 0.0 }
 0x1d1   :  { %v368_v58 = vpop.f32.mrf.mxu1 }
 0x1d2   :  { %v369_v2 = vadd.f32 %v368_v58, %v266_v52  ;;  %v6850_v11 = vmax.f32 %v365_v62, 0.0  ;;  %9535 = vst [vmem:[#allocation8_spill] sm:$0xff] %v6862_v21  ;;  %v397_v33 = vpack.c.bf16 %v6862_v21, %v6870_v28 }
 0x1d3   :  { %v370_v60 = vpop.f32.mrf.mxu1 }
 0x1d4   :  { %v371_v63 = vadd.f32 %v370_v60, %v266_v52  ;;  %9530 = vst [vmem:[#allocation3_spill] sm:$0xff] %v6850_v11  ;;  %v6856_v15 = vmax.f32 %v369_v2, 0.0  ;;  %v398_v25 = vpack.c.bf16 %v6850_v11, %v6858_v17 }
 0x1d5   :  { %v372_v61 = vpop.f32.mrf.mxu1 }
 0x1d6   :  { %v373_v0 = vadd.f32 %v372_v61, %v270_v54  ;;  %v6852_v12 = vmax.f32 %v371_v63, 0.0  ;;  %9533 = vst [vmem:[#allocation6_spill] sm:$0xff] %v6856_v15 }
 0x1d7   :  { %v374_v4 = vpop.f32.mrf.mxu1 }
 0x1d8   :  { %v375_v6 = vadd.f32 %v374_v4, %v270_v54  ;;  %v6848_v9 = vmax.f32 %v373_v0, 0.0  ;;  %9531 = vst [vmem:[#allocation4_spill] sm:$0xff] %v6852_v12 }
 0x1da   :  { %9529 = vst [vmem:[#allocation2_spill] sm:$0xff] %v6848_v9  ;;  %v6854_v13 = vmax.f32 %v375_v6, 0.0  ;;  %v399_v22 = vpack.c.bf16 %v6848_v9, %v6856_v15 }
 0x1dc   :  { %9532 = vst [vmem:[#allocation5_spill] sm:$0xff] %v6854_v13  ;;  %v400_v18 = vpack.c.bf16 %v6854_v13, %v6852_v12 }
 0x1de   :  { %459 = vmatprep.subr.bf16.mxu0 %v400_v18 }
 0x1df   :  { %460 = vmatpush1.bf16.msra.mxu0 %v399_v22 }
 0x1e0   :  { %461 = vmatprep.subr.bf16.mxu0 %v398_v25 }
 0x1e3   :  { %462 = vmatpush1.bf16.msra.mxu0 %v397_v33 }
 0x1e4   :  { %463 = vmatprep.subr.bf16.mxu0 %v396_v35 }
 0x1e7   :  { %464 = vmatpush1.bf16.msra.mxu0 %v395_v40 }
 0x1e8   :  { %465 = vmatprep.subr.bf16.mxu0 %v394_v41 }
 0x1eb   :  { %466 = vmatpush1.bf16.msra.mxu0 %v393_v43 }
 0x1ee   :  { %5313 = vmatmul.mubr.msk.bf16.vlgmr.msra.gmra.mxu0 %vm121_vm0, %v6048_v44 }
 0x1ef   :  { %493 = vmatprep.mubr.bf16.mxu0 %v9484_v3 }
 0x1f6   :  { %5314 = vmatmul.mubr.msk.bf16.gmra.mxu0 %vm121_vm0, %v6049_v45 }
 0x1f7   :  { %503 = vmatprep.mubr.bf16.mxu0 %v9484_v3 }
 0x1fe   :  { %5315 = vmatmul.mubr.msk.bf16.gmra.mxu0 %vm121_vm0, %v6050_v46 }
 0x1ff   :  { %513 = vmatprep.mubr.bf16.mxu0 %v9484_v3 }
 0x206   :  { %5316 = vmatmul.mubr.msk.bf16.gmra.mxu0 %vm121_vm0, %v6051_v47 }
 0x207   :  { %523 = vmatprep.mubr.bf16.mxu0 %v9484_v3 }
 0x20e   :  { %5317 = vmatmul.mubr.msk.bf16.gmra.mxu0 %vm121_vm0, %v6052_v48 }
 0x2ae   :  { %v485_v49 = vpop.f32.mrf.mxu0 }
 0x2b0   :  { %v487_v50 = vpop.f32.mrf.mxu0 }
 0x2b2   :  { %v489_v51 = vpop.f32.mrf.mxu0 }
 0x2b3   :  { %v582_v52 = vpack.c.bf16 %v489_v51, %v485_v49 }
 0x2b4   :  { %v491_v53 = vpop.f32.mrf.mxu0 }
 0x2b5   :  { %v990_v54 = vpack.c.bf16 %v491_v53, %v487_v50  ;;  %583 = vxpose.xlu1.c.b16.start.end [1/1] (short) %v582_v52, 128  ;;  %5666 = vmatprep.subr.bf16.mxu1 %v582_v52 }
 0x2b6   :  { %5667 = vmatpush3.bf16.msra.mxu1 %v582_v52  ;;  %v6937_v8 = vpop.f32.mrf.mxu0 }
 0x2b7   :  { %991 = vxpose.xlu0.c.b16.start.end [1/1] (short) %v990_v54, 128  ;;  %5708 = vmatprep.subr.bf16.mxu0 %v990_v54 }
 0x2b8   :  { %5709 = vmatpush3.bf16.msra.mxu0 %v990_v54  ;;  %v6939_v10 = vpop.f32.mrf.mxu0 }
 0x2b9   :  { %6025 = vset.pattern.permute.xlu1 %v6695_v42 }
 0x2ba   :  { %v6941_v14 = vpop.f32.mrf.mxu0 }
 0x2bc   :  { %v6943_v16 = vpop.f32.mrf.mxu0 }
 0x2be   :  { %v6945_v18 = vpop.f32.mrf.mxu0 }
 0x2c0   :  { %v6947_v19 = vpop.f32.mrf.mxu0  ;;  %6024 = vset.pattern.permute.xlu0 %v6695_v42 }
 0x2c1   :  { %9545 = vst [vmem:[#allocation18_spill] sm:$0xff] %v6947_v19 }
 0x2c2   :  { %v6949_v20 = vpop.f32.mrf.mxu0 }
 0x2c4   :  { %v6951_v22 = vpop.f32.mrf.mxu0 }
 0x2c5   :  { %9546 = vst [vmem:[#allocation19_spill] sm:$0xff] %v6951_v22 }
 0x2c6   :  { %v6953_v23 = vpop.f32.mrf.mxu0 }
 0x2c8   :  { %v6955_v25 = vpop.f32.mrf.mxu0 }
 0x2c9   :  { %9547 = vst [vmem:[#allocation20_spill] sm:$0xff] %v6955_v25 }
 0x2ca   :  { %v6957_v26 = vpop.f32.mrf.mxu0 }
 0x2cc   :  { %v6959_v27 = vpop.f32.mrf.mxu0 }
 0x2cd   :  { %9548 = vst [vmem:[#allocation21_spill] sm:$0xff] %v6959_v27 }
 0x2ce   :  { %v6961_v29 = vpop.f32.mrf.mxu0 }
 0x2d0   :  { %v6963_v31 = vpop.f32.mrf.mxu0 }
 0x2d1   :  { %9549 = vst [vmem:[#allocation22_spill] sm:$0xff] %v6963_v31 }
 0x2d2   :  { %v6965_v33 = vpop.f32.mrf.mxu0 }
 0x2d4   :  { %v6967_v35 = vpop.f32.mrf.mxu0 }
 0x2d5   :  { %9550 = vst [vmem:[#allocation23_spill] sm:$0xff] %v6967_v35 }
 0x317   :  { %v591_v55 = vpop.trf.xlu1 }
 0x318   :  { %5668 = vmatprep.mubr.msk.bf16.mxu1 %vm599_vm1, %v591_v55 }
 0x319   :  { %v999_v56 = vpop.trf.xlu0 }
 0x31a   :  { %5710 = vmatprep.mubr.msk.bf16.mxu0 %vm599_vm1, %v999_v56 }
 0x31b   :  { %v592_v57 = vpop.trf.xlu1 }
 0x31c   :  { %5669 = vmatmul.mubr.msk.bf16.vlgmr.msra.gmra.mxu1 %vm599_vm1, %v592_v57 }
 0x31d   :  { %v1000_v58 = vpop.trf.xlu0 }
 0x31e   :  { %5711 = vmatmul.mubr.msk.bf16.vlgmr.msra.gmra.mxu0 %vm599_vm1, %v1000_v58 }
 0x31f   :  { %v593_v59 = vpop.trf.xlu1 }
 0x320   :  { %5672 = vmatprep.mubr.msk.bf16.mxu1 %vm599_vm1, %v593_v59 }
 0x321   :  { %v1001_v60 = vpop.trf.xlu0 }
 0x322   :  { %5714 = vmatprep.mubr.msk.bf16.mxu0 %vm599_vm1, %v1001_v60 }
 0x323   :  { %v594_v61 = vpop.trf.xlu1 }
 0x324   :  { %5673 = vmatmul.mubr.msk.bf16.gmra.mxu1 %vm599_vm1, %v594_v61 }
 0x325   :  { %v1002_v62 = vpop.trf.xlu0 }
 0x326   :  { %5715 = vmatmul.mubr.msk.bf16.gmra.mxu0 %vm599_vm1, %v1002_v62 }
 0x327   :  { %v595_v63 = vpop.trf.xlu1 }
 0x328   :  { %5676 = vmatprep.mubr.msk.bf16.mxu1 %vm599_vm1, %v595_v63 }
 0x329   :  { %v1003_v0 = vpop.trf.xlu0 }
 0x32a   :  { %5718 = vmatprep.mubr.msk.bf16.mxu0 %vm599_vm1, %v1003_v0 }
 0x32b   :  { %v596_v1 = vpop.trf.xlu1 }
 0x32c   :  { %5677 = vmatmul.mubr.msk.bf16.gmra.mxu1 %vm599_vm1, %v596_v1 }
 0x32d   :  { %v1004_v2 = vpop.trf.xlu0 }
 0x32e   :  { %5719 = vmatmul.mubr.msk.bf16.gmra.mxu0 %vm599_vm1, %v1004_v2 }
 0x32f   :  { %v597_v4 = vpop.trf.xlu1 }
 0x330   :  { %5680 = vmatprep.mubr.msk.bf16.mxu1 %vm599_vm1, %v597_v4 }
 0x331   :  { %v1005_v5 = vpop.trf.xlu0 }
 0x332   :  { %5722 = vmatprep.mubr.msk.bf16.mxu0 %vm599_vm1, %v1005_v5 }
 0x333   :  { %v598_v6 = vpop.trf.xlu1 }
 0x334   :  { %5681 = vmatmul.mubr.msk.bf16.gmra.mxu1 %vm599_vm1, %v598_v6 }
 0x335   :  { %v1006_v7 = vpop.trf.xlu0 }
 0x336   :  { %5723 = vmatmul.mubr.msk.bf16.gmra.mxu0 %vm599_vm1, %v1006_v7 }
 0x337   :  { %1525 = vmatprep.mubr.bf16.mxu0 %v9484_v3 }
 0x3dc   :  { %v6969_v36 = vpop.f32.mrf.mxu1 }
 0x3dd   :  { %725 = vmax.xlane.f32.xlu0 %v6969_v36 }
 0x3de   :  { %v6972_v40 = vpop.f32.mrf.mxu1  ;;  %v6974_v41 = vpop.f32.mrf.mxu0 }
 0x3e0   :  { %v6976_v43 = vpop.f32.mrf.mxu1  ;;  %v6978_v44 = vpop.f32.mrf.mxu0 }
 0x3e1   :  { %727 = vmax.xlane.f32.xlu1 %v6976_v43  ;;  %721 = vmax.xlane.f32.xlu0 %v6972_v40 }
 0x3e2   :  { %v6982_v45 = vpop.f32.mrf.mxu1  ;;  %v6984_v46 = vpop.f32.mrf.mxu0 }
 0x3e4   :  { %v6986_v47 = vpop.f32.mrf.mxu1  ;;  %v6988_v48 = vpop.f32.mrf.mxu0 }
 0x3e5   :  { %723 = vmax.xlane.f32.xlu1 %v6982_v45  ;;  %733 = vmax.xlane.f32.xlu0 %v6986_v47 }
 0x3e6   :  { %v6992_v49 = vpop.f32.mrf.mxu1  ;;  %v6994_v50 = vpop.f32.mrf.mxu0 }
 0x3e8   :  { %v6996_v51 = vpop.f32.mrf.mxu1  ;;  %v7000_v52 = vpop.f32.mrf.mxu0 }
 0x3e9   :  { %735 = vmax.xlane.f32.xlu1 %v6996_v51  ;;  %729 = vmax.xlane.f32.xlu0 %v6992_v49 }
 0x3ea   :  { %v7002_v53 = vpop.f32.mrf.mxu1  ;;  %v7008_v55 = vpop.f32.mrf.mxu0 }
 0x3ec   :  { %v7004_v54 = vpop.f32.mrf.mxu1  ;;  %v7014_v57 = vpop.f32.mrf.mxu0 }
 0x3ed   :  { %731 = vmax.xlane.f32.xlu1 %v7002_v53  ;;  %1140 = vmax.xlane.f32.xlu0 %v6994_v50 }
 0x3ee   :  { %v7010_v56 = vpop.f32.mrf.mxu1  ;;  %v7018_v59 = vpop.f32.mrf.mxu0 }
 0x3f0   :  { %v7016_v58 = vpop.f32.mrf.mxu1  ;;  %v7024_v61 = vpop.f32.mrf.mxu0 }
 0x3f1   :  { %741 = vmax.xlane.f32.xlu0 %v7004_v54  ;;  %1142 = vmax.xlane.f32.xlu1 %v7008_v55 }
 0x3f2   :  { %v7022_v60 = vpop.f32.mrf.mxu1  ;;  %v7028_v62 = vpop.f32.mrf.mxu0 }
 0x3f4   :  { %v7032_v63 = vpop.f32.mrf.mxu1  ;;  %v7034_v0 = vpop.f32.mrf.mxu0 }
 0x3f5   :  { %737 = vmax.xlane.f32.xlu0 %v7010_v56  ;;  %743 = vmax.xlane.f32.xlu1 %v7016_v58 }
 0x3f6   :  { %v7038_v1 = vpop.f32.mrf.mxu1  ;;  %v7048_v4 = vpop.f32.mrf.mxu0 }
 0x3f8   :  { %v7046_v2 = vpop.f32.mrf.mxu1  ;;  %v7054_v6 = vpop.f32.mrf.mxu0 }
 0x3f9   :  { %739 = vmax.xlane.f32.xlu1 %v7022_v60  ;;  %1148 = vmax.xlane.f32.xlu0 %v7018_v59 }
 0x3fa   :  { %v7052_v5 = vpop.f32.mrf.mxu1  ;;  %v7058_v7 = vpop.f32.mrf.mxu0 }
 0x3fc   :  { %v7062_v3 = vpop.f32.mrf.mxu0 }
 0x3fd   :  { %1144 = vmax.xlane.f32.xlu0 %v7024_v61  ;;  %1150 = vmax.xlane.f32.xlu1 %v7028_v62 }
 0x401   :  { %749 = vmax.xlane.f32.xlu0 %v7032_v63  ;;  %1146 = vmax.xlane.f32.xlu1 %v7034_v0 }
 0x405   :  { %745 = vmax.xlane.f32.xlu0 %v7038_v1  ;;  %1138 = vmax.xlane.f32.xlu1 %v7014_v57 }
 0x409   :  { %1136 = vmax.xlane.f32.xlu0 %v7000_v52  ;;  %1134 = vmax.xlane.f32.xlu1 %v6984_v46 }
 0x40d   :  { %1132 = vmax.xlane.f32.xlu0 %v6974_v41  ;;  %1130 = vmax.xlane.f32.xlu1 %v6988_v48 }
 0x411   :  { %1128 = vmax.xlane.f32.xlu0 %v6978_v44  ;;  %751 = vmax.xlane.f32.xlu1 %v7046_v2 }
 0x415   :  { %747 = vmax.xlane.f32.xlu1 %v7052_v5  ;;  %1156 = vmax.xlane.f32.xlu0 %v7048_v4 }
 0x419   :  { %1152 = vmax.xlane.f32.xlu0 %v7054_v6  ;;  %1158 = vmax.xlane.f32.xlu1 %v7058_v7 }
 0x41d   :  { %1154 = vmax.xlane.f32.xlu1 %v7062_v3 }
 0x466   :  { %v726_v39 = vpop.xlane.xlu0 %725 }
 0x467   :  { %v755_v38 = vsub.f32 %v6969_v36, %v726_v39 }
 0x469   :  { %v773_v37 = vmul.f32 1.442695, %v755_v38 }
 0x46a   :  { %v728_v34 = vpop.xlane.xlu1 %727  ;;  %v722_v32 = vpop.xlane.xlu0 %721 }
 0x46b   :  { %6084 = vpow2.f32 %v773_v37  ;;  %v756_v30 = vsub.f32 %v6976_v43, %v728_v34  ;;  %v753_v28 = vsub.f32 %v6972_v40, %v722_v32 }
 0x46d   :  { %v775_v24 = vmul.f32 1.442695, %v756_v30  ;;  %v769_v21 = vmul.f32 1.442695, %v753_v28 }
 0x46e   :  { %v724_v11 = vpop.xlane.xlu1 %723  ;;  %v734_v17 = vpop.xlane.xlu0 %733 }
 0x46f   :  { %6086 = vpow2.f32 %v775_v24  ;;  %v754_v15 = vsub.f32 %v6982_v45, %v724_v11  ;;  %v759_v42 = vsub.f32 %v6986_v47, %v734_v17 }
 0x470   :  { %6088 = vpow2.f32 %v769_v21 }
 0x471   :  { %v771_v13 = vmul.f32 1.442695, %v754_v15  ;;  %v781_v39 = vmul.f32 1.442695, %v759_v42 }
 0x472   :  { %v736_v38 = vpop.xlane.xlu1 %735  ;;  %v730_v36 = vpop.xlane.xlu0 %729 }
 0x473   :  { %6090 = vpow2.f32 %v771_v13  ;;  %v760_v37 = vsub.f32 %v6996_v51, %v736_v38  ;;  %v757_v34 = vsub.f32 %v6992_v49, %v730_v36 }
 0x474   :  { %6092 = vpow2.f32 %v781_v39 }
 0x475   :  { %v783_v30 = vmul.f32 1.442695, %v760_v37  ;;  %v777_v28 = vmul.f32 1.442695, %v757_v34 }
 0x476   :  { %v732_v32 = vpop.xlane.xlu1 %731  ;;  %v1141_v40 = vpop.xlane.xlu0 %1140 }
 0x477   :  { %6094 = vpow2.f32 %v783_v30  ;;  %v758_v11 = vsub.f32 %v7002_v53, %v732_v32  ;;  %v1166_v17 = vsub.f32 %v6994_v50, %v1141_v40 }
 0x478   :  { %v7074_v21 = vpop.eup %6084  ;;  %6096 = vpow2.f32 %v777_v28 }
 0x479   :  { %v779_v15 = vmul.f32 1.442695, %v758_v11  ;;  %v1188_v24 = vmul.f32 1.442695, %v1166_v17  ;;  %805 = vadd.xlane.f32.xlu0 %v7074_v21 }
 0x47a   :  { %v742_v13 = vpop.xlane.xlu0 %741  ;;  %v1143_v43 = vpop.xlane.xlu1 %1142 }
 0x47b   :  { %6098 = vpow2.f32 %v779_v15  ;;  %v1167_v45 = vsub.f32 %v7008_v55, %v1143_v43  ;;  %v763_v31 = vsub.f32 %v7004_v54, %v742_v13 }
 0x47c   :  { %v7078_v47 = vpop.eup %6086  ;;  %6100 = vpow2.f32 %v1188_v24 }
 0x47d   :  { %v7080_v49 = vpop.eup %6088  ;;  %v1190_v51 = vmul.f32 1.442695, %v1167_v45  ;;  %807 = vadd.xlane.f32.xlu1 %v7078_v47  ;;  %v789_v22 = vmul.f32 1.442695, %v763_v31 }
 0x47e   :  { %801 = vadd.xlane.f32.xlu0 %v7080_v49  ;;  %v738_v50 = vpop.xlane.xlu0 %737  ;;  %v744_v53 = vpop.xlane.xlu1 %743 }
 0x47f   :  { %6102 = vpow2.f32 %v1190_v51  ;;  %v764_v45 = vsub.f32 %v7016_v58, %v744_v53 }
 0x480   :  { %v7084_v42 = vpop.eup %6090 }
 0x481   :  { %v7086_v39 = vpop.eup %6092  ;;  %803 = vadd.xlane.f32.xlu1 %v7084_v42  ;;  %v791_v27 = vmul.f32 1.442695, %v764_v45 }
 0x482   :  { %813 = vadd.xlane.f32.xlu0 %v7086_v39  ;;  %v740_v55 = vpop.xlane.xlu1 %739  ;;  %v1149_v38 = vpop.xlane.xlu0 %1148 }
 0x483   :  { %v762_v19 = vsub.f32 %v7022_v60, %v740_v55 }
 0x484   :  { %v7090_v36 = vpop.eup %6094 }
 0x485   :  { %v7092_v37 = vpop.eup %6096  ;;  %815 = vadd.xlane.f32.xlu1 %v7090_v36  ;;  %v787_v58 = vmul.f32 1.442695, %v762_v19 }
 0x486   :  { %809 = vadd.xlane.f32.xlu0 %v7092_v37  ;;  %v1145_v34 = vpop.xlane.xlu0 %1144  ;;  %v1151_v30 = vpop.xlane.xlu1 %1150 }
 0x487   :  { %v1171_v53 = vsub.f32 %v7028_v62, %v1151_v30 }
 0x488   :  { %v7096_v28 = vpop.eup %6098 }
 0x489   :  { %v7098_v32 = vpop.eup %6100  ;;  %811 = vadd.xlane.f32.xlu1 %v7096_v28 }
 0x48a   :  { %1220 = vadd.xlane.f32.xlu0 %v7098_v32  ;;  %v750_v40 = vpop.xlane.xlu0 %749  ;;  %v1147_v11 = vpop.xlane.xlu1 %1146 }
 0x48c   :  { %v7102_v17 = vpop.eup %6102 }
 0x48d   :  { %9551 = vst [vmem:[#allocation24_spill] sm:$0xff] %v7102_v17  ;;  %1222 = vadd.xlane.f32.xlu1 %v7102_v17  ;;  %v761_v17 = vsub.f32 %v7010_v56, %v738_v50 }
 0x48e   :  { %v746_v15 = vpop.xlane.xlu0 %745  ;;  %v1139_v24 = vpop.xlane.xlu1 %1138 }
 0x48f   :  { %v1165_v43 = vsub.f32 %v7014_v57, %v1139_v24  ;;  %v785_v54 = vmul.f32 1.442695, %v761_v17  ;;  %v765_v55 = vsub.f32 %v7038_v1, %v746_v15 }
 0x491   :  { %v1186_v51 = vmul.f32 1.442695, %v1165_v43 }
 0x492   :  { %v1137_v12 = vpop.xlane.xlu0 %1136  ;;  %v7107_v9 = vpop.xlane.xlu1 %1134 }
 0x493   :  { %v1164_v35 = vsub.f32 %v7000_v52, %v1137_v12  ;;  %6104 = vpow2.f32 %v1186_v51  ;;  %v1170_v12 = vsub.f32 %v7018_v59, %v1149_v38  ;;  %v1198_v52 = vmul.f32 1.442695, %v1171_v53 }
 0x494   :  { %v767_v59 = vsub.f32 %v7032_v63, %v750_v40  ;;  %v793_v63 = vmul.f32 1.442695, %v765_v55 }
 0x495   :  { %v1184_v25 = vmul.f32 1.442695, %v1164_v35  ;;  %v1169_v35 = vsub.f32 %v7034_v0, %v1147_v11  ;;  %v1196_v56 = vmul.f32 1.442695, %v1170_v12 }
 0x496   :  { %v7113_v57 = vpop.xlane.xlu1 %1130  ;;  %v7116_v24 = vpop.xlane.xlu0 %1132 }
 0x497   :  { %6106 = vpow2.f32 %v1184_v25  ;;  %v1168_v25 = vsub.f32 %v7024_v61, %v1145_v34 }
 0x498   :  { %6108 = vpow2.f32 %v791_v27  ;;  %v1194_v27 = vmul.f32 1.442695, %v1169_v35  ;;  %v7182_v35 = vld [vmem:[%s9480_s2 + $0x10] sm:$0xff] }
 0x499   :  { %6110 = vpow2.f32 %v789_v22  ;;  %v1192_v22 = vmul.f32 1.442695, %v1168_v25  ;;  %9555 = vst [vmem:[#allocation28_spill] sm:$0xff] %v7182_v35  ;;  %v7189_v25 = vld [vmem:[%s9480_s2] sm:$0xff] }
 0x49a   :  { %6112 = vpow2.f32 %v787_v58  ;;  %v752_v31 = vpop.xlane.xlu1 %751  ;;  %v7121_v19 = vpop.xlane.xlu0 %1128  ;;  %9556 = vst [vmem:[#allocation29_spill] sm:$0xff] %v7189_v25 }
 0x49b   :  { %6114 = vpow2.f32 %v785_v54  ;;  %v768_v60 = vsub.f32 %v7046_v2, %v752_v31  ;;  %v797_v2 = vmul.f32 1.442695, %v767_v59 }
 0x49c   :  { %6116 = vpow2.f32 %v1198_v52  ;;  %v7176_v52 = vld [vmem:[%s9480_s2 + $0x8] sm:$0xff] }
 0x49d   :  { %6118 = vpow2.f32 %v1196_v56  ;;  %v799_v13 = vmul.f32 1.442695, %v768_v60  ;;  %9554 = vst [vmem:[#allocation27_spill] sm:$0xff] %v7176_v52  ;;  %v1163_v60 = vsub.f32 %v6984_v46, %v7107_v9 }
 0x49e   :  { %6120 = vpow2.f32 %v1194_v27  ;;  %v1157_v61 = vpop.xlane.xlu0 %1156  ;;  %v748_v31 = vpop.xlane.xlu1 %747 }
 0x49f   :  { %6122 = vpow2.f32 %v1192_v22  ;;  %v1174_v30 = vsub.f32 %v7048_v4, %v1157_v61  ;;  %v766_v56 = vsub.f32 %v7052_v5, %v748_v31  ;;  %v1182_v22 = vmul.f32 1.442695, %v1163_v60  ;;  %v7203_v61 = vld [vmem:[%s9480_s2 + $0x18] sm:$0xff] }
 0x4a0   :  { %v7124_v62 = vpop.eup %6104  ;;  %6124 = vpow2.f32 %v799_v13  ;;  %9557 = vst [vmem:[#allocation30_spill] sm:$0xff] %v7203_v61 }
 0x4a1   :  { %1218 = vadd.xlane.f32.xlu1 %v7124_v62  ;;  %6126 = vpow2.f32 %v797_v2  ;;  %v1204_v1 = vmul.f32 1.442695, %v1174_v30  ;;  %v795_v27 = vmul.f32 1.442695, %v766_v56  ;;  %v1160_v56 = vsub.f32 %v6978_v44, %v7121_v19 }
 0x4a2   :  { %v1153_v11 = vpop.xlane.xlu0 %1152  ;;  %6128 = vpow2.f32 %v793_v63  ;;  %v1159_v5 = vpop.xlane.xlu1 %1158 }
 0x4a3   :  { %v1172_v15 = vsub.f32 %v7054_v6, %v1153_v11  ;;  %6130 = vpow2.f32 %v1204_v1  ;;  %v1162_v11 = vsub.f32 %v6974_v41, %v7116_v24  ;;  %v1161_v41 = vsub.f32 %v6988_v48, %v7113_v57 }
 0x4a4   :  { %v7128_v0 = vpop.eup %6106  ;;  %v1176_v24 = vmul.f32 1.442695, %v1160_v56  ;;  %v1175_v19 = vsub.f32 %v7058_v7, %v1159_v5 }
 0x4a5   :  { %v7130_v50 = vpop.eup %6108  ;;  %1216 = vadd.xlane.f32.xlu0 %v7128_v0  ;;  %v1200_v4 = vmul.f32 1.442695, %v1172_v15  ;;  %v1180_v31 = vmul.f32 1.442695, %v1162_v11  ;;  %v1178_v44 = vmul.f32 1.442695, %v1161_v41 }
 0x4a6   :  { %823 = vadd.xlane.f32.xlu1 %v7130_v50  ;;  %v7135_v38 = vpop.eup %6110  ;;  %v1155_v2 = vpop.xlane.xlu1 %1154 }
 0x4a7   :  { %v7137_v34 = vpop.eup %6112  ;;  %6132 = vpow2.f32 %v1200_v4  ;;  %v7211_v4 = vld [vmem:[%s9480_s2 + $0x28] sm:$0xff] }
 0x4a8   :  { %v7142_v40 = vpop.eup %6114  ;;  %6134 = vpow2.f32 %v795_v27  ;;  %9558 = vst [vmem:[#allocation31_spill] sm:$0xff] %v7211_v4 }
 0x4a9   :  { %821 = vadd.xlane.f32.xlu0 %v7135_v38  ;;  %v7144_v17 = vpop.eup %6116  ;;  %6136 = vpow2.f32 %v1182_v22 }
 0x4aa   :  { %819 = vadd.xlane.f32.xlu1 %v7137_v34  ;;  %v7149_v43 = vpop.eup %6118 }
 0x4ab   :  { %v7151_v45 = vpop.eup %6120 }
 0x4ac   :  { %9552 = vst [vmem:[#allocation25_spill] sm:$0xff] %v7151_v45  ;;  %v7155_v51 = vpop.eup %6122 }
 0x4ad   :  { %817 = vadd.xlane.f32.xlu0 %v7142_v40  ;;  %9553 = vst [vmem:[#allocation26_spill] sm:$0xff] %v7155_v51  ;;  %v7157_v58 = vpop.eup %6124 }
 0x4ae   :  { %1230 = vadd.xlane.f32.xlu1 %v7144_v17  ;;  %v7161_v6 = vpop.eup %6126 }
 0x4af   :  { %v7164_v53 = vpop.eup %6128 }
 0x4b0   :  { %v7167_v54 = vpop.eup %6130 }
 0x4b1   :  { %1228 = vadd.xlane.f32.xlu0 %v7149_v43 }
 0x4b2   :  { %1226 = vadd.xlane.f32.xlu1 %v7151_v45 }
 0x4b4   :  { %v7170_v12 = vpop.eup %6132 }
 0x4b5   :  { %1224 = vadd.xlane.f32.xlu0 %v7155_v51  ;;  %v7194_v59 = vpop.eup %6134 }
 0x4b6   :  { %831 = vadd.xlane.f32.xlu1 %v7157_v58  ;;  %v7197_v13 = vpop.eup %6136 }
 0x4b9   :  { %829 = vadd.xlane.f32.xlu0 %v7161_v6 }
 0x4bd   :  { %825 = vadd.xlane.f32.xlu0 %v7164_v53 }
 0x4c1   :  { %1236 = vadd.xlane.f32.xlu0 %v7167_v54 }
 0x4c5   :  { %1232 = vadd.xlane.f32.xlu0 %v7170_v12 }
 0x4c7   :  { %539 = vperm.xlu1 %6025, %v7176_v52  }
 0x4cb   :  { %543 = vperm.xlu1 %6025, %v7182_v35  }
 0x4db   :  { %535 = vperm.xlu0 %6024, %v7189_v25  }
 0x4ef   :  { %827 = vadd.xlane.f32.xlu1 %v7194_v59 }
 0x4fa   :  { %1214 = vadd.xlane.f32.xlu0 %v7197_v13 }
 0x500   :  { %547 = vperm.xlu1 %6025, %v7203_v61  }
 0x502   :  { %v806_v9 = vpop.xlane.xlu0 %805 }
 0x506   :  { %v808_v46 = vpop.xlane.xlu1 %807 }
 0x507   :  { %v802_v55 = vpop.xlane.xlu0 %801 }
 0x508   :  { %6138 = vrcp.f32 %v802_v55 }
 0x509   :  { %6140 = vrcp.f32 %v806_v9 }
 0x50a   :  { %v804_v63 = vpop.xlane.xlu1 %803 }
 0x50b   :  { %v814_v30 = vpop.xlane.xlu0 %813  ;;  %6142 = vrcp.f32 %v804_v63 }
 0x50c   :  { %6144 = vrcp.f32 %v808_v46 }
 0x50e   :  { %v816_v1 = vpop.xlane.xlu1 %815 }
 0x50f   :  { %v810_v15 = vpop.xlane.xlu0 %809 }
 0x510   :  { %6146 = vrcp.f32 %v810_v15  ;;  %555 = vperm.xlu0 %6024, %v7211_v4  }
 0x511   :  { %6148 = vrcp.f32 %v814_v30 }
 0x512   :  { %v812_v27 = vpop.xlane.xlu1 %811 }
 0x513   :  { %6150 = vrcp.f32 %v812_v27 }
 0x514   :  { %6152 = vrcp.f32 %v816_v1  ;;  %v1173_v1 = vsub.f32 %v7062_v3, %v1155_v2 }
 0x515   :  { %v6139_v60 = vpop.eup %6138  ;;  %6154 = vpow2.f32 %v1180_v31 }
 0x516   :  { %v6141_v22 = vpop.eup %6140  ;;  %v7219_v46 = vmul.f32 %v6139_v60, %v7080_v49  ;;  %6156 = vpow2.f32 %v1176_v24  ;;  %v1202_v27 = vmul.f32 1.442695, %v1173_v1  ;;  %v7256_v24 = vpop.xlane.xlu1 %1222 }
 0x517   :  { %v7226_v30 = vmul.f32 %v6141_v22, %v7074_v21  ;;  %6158 = vpow2.f32 %v1178_v44 }
 0x518   :  { %v6143_v9 = vpop.eup %6142 }
 0x519   :  { %v7222_v55 = vmul.f32 %v6143_v9, %v7084_v42  ;;  %v6145_v63 = vpop.eup %6144  ;;  %v1206_v42 = vmul.f32 1.442695, %v1175_v19 }
 0x51a   :  { %v7231_v11 = vmul.f32 %v6145_v63, %v7078_v47 }
 0x51b   :  { %v881_v48 = vadd.f32 %v7222_v55, %v7219_v46  ;;  %6160 = vpow2.f32 %v1206_v42 }
 0x51c   :  { %6162 = vpow2.f32 %v1202_v27 }
 0x51d   :  { %v6147_v57 = vpop.eup %6146  ;;  %v882_v49 = vadd.f32 %v881_v48, %v7226_v30 }
 0x51e   :  { %v6149_v15 = vpop.eup %6148  ;;  %v7236_v31 = vmul.f32 %v6147_v57, %v7092_v37 }
 0x51f   :  { %v883_v7 = vadd.f32 %v882_v49, %v7231_v11  ;;  %v7246_v41 = vmul.f32 %v6149_v15, %v7086_v39  ;;  %v7260_v39 = vpop.xlane.xlu0 %1220 }
 0x520   :  { %v6151_v21 = vpop.eup %6150 }
 0x521   :  { %v7240_v5 = vmul.f32 %v6151_v21, %v7096_v28  ;;  %v884_v56 = vadd.f32 %v883_v7, %v7236_v31  ;;  %v6153_v47 = vpop.eup %6152 }
 0x522   :  { %v7243_v60 = vpop.eup %6154  ;;  %v7251_v37 = vmul.f32 %v6153_v47, %v7090_v36 }
 0x523   :  { %v885_v3 = vadd.f32 %v884_v56, %v7240_v5  ;;  %v7254_v2 = vpop.eup %6156 }
 0x524   :  { %1212 = vadd.xlane.f32.xlu1 %v7243_v60  ;;  %v7262_v9 = vpop.eup %6158 }
 0x525   :  { %v886_v28 = vadd.f32 %v885_v3, %v7246_v41 }
 0x527   :  { %v887_v22 = vadd.f32 %v886_v28, %v7251_v37  ;;  %v7286_v28 = vld [vmem:[%s9480_s2 + $0x20] sm:$0xff] }
 0x528   :  { %1208 = vadd.xlane.f32.xlu1 %v7254_v2  ;;  %v7269_v44 = vpop.eup %6160  ;;  %9559 = vst [vmem:[#allocation32_spill] sm:$0xff] %v7286_v28 }
 0x529   :  { %v7272_v57 = vpop.eup %6162 }
 0x52a   :  { %v7264_v63 = vpop.xlane.xlu1 %1218 }
 0x52c   :  { %1210 = vadd.xlane.f32.xlu1 %v7262_v9 }
 0x52e   :  { %v7267_v36 = vpop.xlane.xlu0 %1216 }
 0x52f   :  { %v824_v19 = vpop.xlane.xlu1 %823 }
 0x530   :  { %1238 = vadd.xlane.f32.xlu1 %v7269_v44 }
 0x532   :  { %v822_v48 = vpop.xlane.xlu0 %821 }
 0x533   :  { %v820_v49 = vpop.xlane.xlu1 %819 }
 0x534   :  { %1234 = vadd.xlane.f32.xlu1 %v7272_v57  ;;  %6164 = vrcp.f32 %v820_v49 }
 0x536   :  { %v818_v42 = vpop.xlane.xlu0 %817 }
 0x537   :  { %6166 = vrcp.f32 %v818_v42  ;;  %v7275_v1 = vpop.xlane.xlu1 %1230 }
 0x538   :  { %6168 = vrcp.f32 %v822_v48 }
 0x539   :  { %6170 = vrcp.f32 %v824_v19 }
 0x53a   :  { %v7277_v15 = vpop.xlane.xlu0 %1228 }
 0x53b   :  { %v7279_v7 = vpop.xlane.xlu1 %1226 }
 0x53e   :  { %v7281_v21 = vpop.xlane.xlu0 %1224 }
 0x53f   :  { %v832_v56 = vpop.xlane.xlu1 %831 }
 0x540   :  { %6172 = vrcp.f32 %v832_v56 }
 0x541   :  { %v6165_v27 = vpop.eup %6164 }
 0x542   :  { %v830_v47 = vpop.xlane.xlu0 %829  ;;  %v874_v42 = vmul.f32 %v6165_v27, %v7137_v34  ;;  %v7304_v34 = vld [vmem:[%s9480_s2 + $0x38] sm:$0xff] }
 0x543   :  { %6174 = vrcp.f32 %v830_v47  ;;  %v7294_v47 = vld [vmem:[%s9480_s2 + $0x30] sm:$0xff]  ;;  %9561 = vst [vmem:[#allocation34_spill] sm:$0xff] %v7304_v34 }
 0x544   :  { %v6167_v3 = vpop.eup %6166  ;;  %9560 = vst [vmem:[#allocation33_spill] sm:$0xff] %v7294_v47 }
 0x545   :  { %551 = vperm.xlu1 %6025, %v7286_v28   ;;  %v873_v48 = vmul.f32 %v6167_v3, %v7142_v40  ;;  %v6169_v19 = vpop.eup %6168 }
 0x546   :  { %v826_v49 = vpop.xlane.xlu0 %825  ;;  %v6171_v56 = vpop.eup %6170  ;;  %v875_v61 = vmul.f32 %v6169_v19, %v7135_v38 }
 0x547   :  { %6176 = vrcp.f32 %v826_v49  ;;  %v888_v52 = vadd.f32 %v887_v22, %v873_v48  ;;  %v876_v4 = vmul.f32 %v6171_v56, %v7130_v50 }
 0x549   :  { %559 = vperm.xlu1 %6025, %v7294_v47   ;;  %v889_v25 = vadd.f32 %v888_v52, %v874_v42 }
 0x54a   :  { %v7299_v3 = vpop.xlane.xlu0 %1236 }
 0x54b   :  { %v890_v40 = vadd.f32 %v889_v25, %v875_v61  ;;  %v7309_v25 = vpop.permute.xlu1 %539 }
 0x54d   :  { %563 = vperm.xlu1 %6025, %v7304_v34   ;;  %v891_v22 = vadd.f32 %v890_v40, %v876_v4  ;;  %v6173_v27 = vpop.eup %6172  ;;  %v568_v40 = vadd.f32 %v7309_v25, %v6941_v14 }
 0x54e   :  { %v880_v38 = vmul.f32 %v6173_v27, %v7157_v58  ;;  %v1233_v52 = vpop.xlane.xlu0 %1232 }
 0x54f   :  { %v7318_v58 = vpop.permute.xlu1 %543 }
 0x550   :  { %v6175_v49 = vpop.eup %6174 }
 0x551   :  { %v879_v35 = vmul.f32 %v6175_v49, %v7161_v6 }
 0x553   :  { %v913_v19 = vpack.c.bf16 %v880_v38, %v879_v35 }
 0x554   :  { %v6177_v50 = vpop.eup %6176 }
 0x555   :  { %5684 = vmatprep.subr.bf16.mxu1 %v913_v19  ;;  %v877_v56 = vmul.f32 %v6177_v50, %v7164_v53 }
 0x556   :  { %v7312_v28 = vpop.permute.xlu0 %535  ;;  %5685 = vmatpush3.bf16.msra.mxu1 %v913_v19  ;;  %v911_v19 = vpack.c.bf16 %v876_v4, %v875_v61  ;;  %v570_v4 = vadd.f32 %v7318_v58, %v6945_v18 }
 0x557   :  { %v566_v34 = vadd.f32 %v7312_v28, %v6937_v8  ;;  %v892_v6 = vadd.f32 %v891_v22, %v877_v56  ;;  %v910_v8 = vpack.c.bf16 %v874_v42, %v873_v48 }
 0x559   :  { %v902_v49 = vpack.c.bf16 %v568_v40, %v566_v34  ;;  %v909_v34 = vpack.c.bf16 %v7251_v37, %v7246_v41 }
 0x55b   :  { %5700 = vmatprep.mubr.bf16.mxu1 %v902_v49  ;;  %v567_v49 = vadd.f32 %v7312_v28, %v6939_v10 }
 0x578   :  { %v828_v27 = vpop.xlane.xlu1 %827 }
 0x579   :  { %6178 = vrcp.f32 %v828_v27 }
 0x57a   :  { %6180 = vrcp.f32 %v7260_v39 }
 0x57b   :  { %6182 = vrcp.f32 %v7264_v63 }
 0x586   :  { %v6179_v47 = vpop.eup %6178 }
 0x587   :  { %v878_v45 = vmul.f32 %v6179_v47, %v7194_v59  ;;  %v908_v59 = vpack.c.bf16 %v7240_v5, %v7236_v31 }
 0x589   :  { %v912_v53 = vpack.c.bf16 %v878_v45, %v877_v56  ;;  %v893_v50 = vadd.f32 %v892_v6, %v878_v45  ;;  %v907_v45 = vpack.c.bf16 %v7231_v11, %v7226_v30  ;;  %v1215_v11 = vpop.xlane.xlu0 %1214 }
 0x58b   :  { %5686 = vmatprep.subr.bf16.mxu1 %v912_v53  ;;  %v894_v51 = vadd.f32 %v893_v50, %v879_v35  ;;  %v906_v35 = vpack.c.bf16 %v7222_v55, %v7219_v46  ;;  %v6181_v55 = vpop.eup %6180 }
 0x58c   :  { %5687 = vmatpush3.bf16.msra.mxu1 %v912_v53  ;;  %v6183_v37 = vpop.eup %6182 }
 0x58d   :  { %5688 = vmatprep.subr.bf16.mxu1 %v911_v19  ;;  %v7321_v14 = vadd.f32 %v894_v51, %v880_v38  ;;  %v7329_v51 = vpop.permute.xlu1 %547  ;;  %v7344_v41 = vpop.permute.xlu0 %555  ;;  %v1277_v10 = vmul.f32 %v6183_v37, %v7124_v62 }
 0x58e   :  { %v572_v61 = vadd.f32 %v7329_v51, %v6949_v20 }
 0x590   :  { %5689 = vmatpush3.bf16.msra.mxu1 %v911_v19  ;;  %v903_v31 = vpack.c.bf16 %v572_v61, %v570_v4 }
 0x591   :  { %5690 = vmatprep.subr.bf16.mxu1 %v910_v8 }
 0x594   :  { %5691 = vmatpush3.bf16.msra.mxu1 %v910_v8 }
 0x595   :  { %5692 = vmatprep.subr.bf16.mxu1 %v909_v34 }
 0x598   :  { %5693 = vmatpush3.bf16.msra.mxu1 %v909_v34 }
 0x599   :  { %5694 = vmatprep.subr.bf16.mxu1 %v908_v59 }
 0x59c   :  { %5695 = vmatpush3.bf16.msra.mxu1 %v908_v59 }
 0x59d   :  { %5696 = vmatprep.subr.bf16.mxu1 %v907_v45 }
 0x5a0   :  { %5697 = vmatpush3.bf16.msra.mxu1 %v907_v45 }
 0x5a1   :  { %5698 = vmatprep.subr.bf16.mxu1 %v906_v35 }
 0x5a4   :  { %5699 = vmatpush3.bf16.msra.mxu1 %v906_v35 }
 0x5a7   :  { %5701 = vmatmul.mubr.bf16.vlgmr.msra.gmra.mxu1 %v903_v31  ;;  %v9562_v31 = vld [vmem:[#allocation26_spill] sm:$0xff] }
 0x5ad   :  { %v1213_v5 = vpop.xlane.xlu1 %1212 }
 0x5b1   :  { %v1209_v30 = vpop.xlane.xlu1 %1208 }
 0x5b2   :  { %6184 = vrcp.f32 %v1209_v30 }
 0x5b3   :  { %6186 = vrcp.f32 %v1213_v5 }
 0x5b5   :  { %v1211_v46 = vpop.xlane.xlu1 %1210 }
 0x5b6   :  { %6188 = vrcp.f32 %v1211_v46 }
 0x5b7   :  { %6190 = vrcp.f32 %v7299_v3 }
 0x5b8   :  { %6192 = vrcp.f32 %v1215_v11  ;;  %v9564_v11 = vld [vmem:[#allocation25_spill] sm:$0xff] }
 0x5b9   :  { %6194 = vrcp.f32 %v7267_v36  ;;  %v1239_v18 = vpop.xlane.xlu1 %1238 }
 0x5ba   :  { %6196 = vrcp.f32 %v1239_v18 }
 0x5bb   :  { %6198 = vrcp.f32 %v7277_v15  ;;  %v576_v15 = vadd.f32 %v7344_v41, %v6957_v26 }
 0x5bc   :  { %6200 = vrcp.f32 %v1233_v52 }
 0x5bd   :  { %6202 = vrcp.f32 %v7275_v1  ;;  %v1235_v20 = vpop.xlane.xlu1 %1234 }
 0x5be   :  { %6204 = vrcp.f32 %v1235_v20 }
 0x5bf   :  { %6206 = vrcp.f32 %v7256_v24  ;;  %v6185_v39 = vpop.eup %6184 }
 0x5c0   :  { %6208 = vrcp.f32 %v7281_v21  ;;  %v6187_v36 = vpop.eup %6186  ;;  %v7355_v47 = vmul.f32 %v6185_v39, %v7254_v2 }
 0x5c1   :  { %v7347_v63 = vpop.permute.xlu1 %551  ;;  %6210 = vrcp.f32 %v7279_v7  ;;  %v1274_v7 = vmul.f32 %v6187_v36, %v7243_v60 }
 0x5c2   :  { %v574_v1 = vadd.f32 %v7347_v63, %v6953_v23 }
 0x5c3   :  { %v6189_v48 = vpop.eup %6188 }
 0x5c4   :  { %v6191_v42 = vpop.eup %6190  ;;  %v904_v24 = vpack.c.bf16 %v576_v15, %v574_v1  ;;  %v7358_v21 = vmul.f32 %v6189_v48, %v7262_v9 }
 0x5c5   :  { %v6193_v3 = vpop.eup %6192  ;;  %v7360_v22 = vpop.permute.xlu1 %559  ;;  %v1286_v56 = vmul.f32 %v6191_v42, %v7167_v54 }
 0x5c6   :  { %v6195_v38 = vpop.eup %6194  ;;  %5704 = vmatprep.mubr.bf16.mxu1 %v904_v24  ;;  %v1288_v26 = vadd.f32 %v7358_v21, %v7355_v47  ;;  %v1275_v40 = vmul.f32 %v6193_v3, %v7197_v13  ;;  %v578_v50 = vadd.f32 %v7360_v22, %v6961_v29  ;;  %v569_v13 = vadd.f32 %v7309_v25, %v6943_v16 }
 0x5c7   :  { %v6197_v23 = vpop.eup %6196  ;;  %v1276_v60 = vmul.f32 %v6195_v38, %v7128_v0  ;;  %v1278_v16 = vmul.f32 %v6181_v55, %v7098_v32  ;;  %v1313_v3 = vpack.c.bf16 %v7358_v21, %v7355_v47  ;;  %v9565_v38 = vld [vmem:[#allocation19_spill] sm:$0xff] }
 0x5c8   :  { %v6199_v52 = vpop.eup %6198  ;;  %v1287_v2 = vmul.f32 %v6197_v23, %v7269_v44  ;;  %v1289_v9 = vadd.f32 %v1288_v26, %v1274_v7  ;;  %v1314_v48 = vpack.c.bf16 %v1275_v40, %v1274_v7  ;;  %v573_v26 = vadd.f32 %v7329_v51, %v9565_v38  ;;  %v9566_v23 = vld [vmem:[#allocation20_spill] sm:$0xff]  ;;  %v9569_v47 = vld [vmem:[#allocation23_spill] sm:$0xff] }
 0x5c9   :  { %v6201_v6 = vpop.eup %6200  ;;  %v7370_v27 = vpop.permute.xlu1 %563  ;;  %v1282_v34 = vmul.f32 %v6199_v52, %v7149_v43  ;;  %v1315_v36 = vpack.c.bf16 %v1277_v10, %v1276_v60  ;;  %v575_v52 = vadd.f32 %v7347_v63, %v9566_v23  ;;  %v9571_v63 = vmov 0   ;;  %v9581_v23 = vld [vmem:[#allocation4_spill] sm:$0xff] }
 0x5ca   :  { %v6203_v53 = vpop.eup %6202  ;;  %v580_v54 = vadd.f32 %v7370_v27, %v6965_v33  ;;  %v1320_v19 = vpack.c.bf16 %v1287_v2, %v1286_v56  ;;  %v1290_v44 = vadd.f32 %v1289_v9, %v1275_v40  ;;  %v1284_v59 = vmul.f32 %v6201_v6, %v7170_v12  ;;  %v9563_v12 = vld [vmem:[#allocation24_spill] sm:$0xff]  ;;  %v9567_v9 = vld [vmem:[#allocation18_spill] sm:$0xff] }
 0x5cb   :  { %v6205_v8 = vpop.eup %6204  ;;  %v1309_v33 = vpack.c.bf16 %v569_v13, %v567_v49  ;;  %v1283_v4 = vmul.f32 %v6203_v53, %v7144_v17  ;;  %v571_v6 = vadd.f32 %v7318_v58, %v9567_v9  ;;  %v9568_v49 = vld [vmem:[#allocation21_spill] sm:$0xff]  ;;  %v581_v21 = vadd.f32 %v7370_v27, %v9569_v47  ;;  %v9570_v40 = vld [vmem:[#allocation22_spill] sm:$0xff] }
 0x5cc   :  { %v6207_v28 = vpop.eup %6206  ;;  %5726 = vmatprep.subr.bf16.mxu1 %v1320_v19  ;;  %v905_v0 = vpack.c.bf16 %v580_v54, %v578_v50  ;;  %v1285_v29 = vmul.f32 %v6205_v8, %v7272_v57  ;;  %v1291_v45 = vadd.f32 %v1290_v44, %v1276_v60  ;;  %v577_v7 = vadd.f32 %v7344_v41, %v9568_v49  ;;  %v9572_v58 = vld [vmem:[#allocation33_spill] sm:$0xff]  ;;  %v9573_v41 = vld [vmem:[#allocation34_spill] sm:$0xff]  ;;  %v9574_v50 = vld [vmem:[#allocation32_spill] sm:$0xff] }
 0x5cd   :  { %v6209_v35 = vpop.eup %6208  ;;  %5727 = vmatpush3.bf16.msra.mxu1 %v1320_v19  ;;  %v1318_v62 = vpack.c.bf16 %v1283_v4, %v1282_v34  ;;  %v1279_v30 = vmul.f32 %v6207_v28, %v9563_v12  ;;  %v579_v51 = vadd.f32 %v7360_v22, %v9570_v40  ;;  %v6696_v53 = vmov 3   ;;  %v9575_v54 = vld [vmem:[#allocation28_spill] sm:$0xff]  ;;  %v9576_v19 = vld [vmem:[#allocation31_spill] sm:$0xff]  ;;  %v9577_v27 = vld [vmem:[#allocation29_spill] sm:$0xff] }
 0x5ce   :  { %5705 = vmatmul.mubr.bf16.gmra.mxu1 %v905_v0  ;;  %v1319_v61 = vpack.c.bf16 %v1285_v29, %v1284_v59  ;;  %v1292_v43 = vadd.f32 %v1291_v45, %v1277_v10  ;;  %v6211_v25 = vpop.eup %6210  ;;  %v1280_v5 = vmul.f32 %v6209_v35, %v9562_v31  ;;  %6026 = vset.pattern.permute.xlu1 %v6696_v53  ;;  %v9578_v22 = vld [vmem:[#allocation30_spill] sm:$0xff]  ;;  %v9579_v44 = vld [vmem:[#allocation27_spill] sm:$0xff]  ;;  %v896_v8 = vrot.slane %v7321_v14, 4  ;;  %v9582_v9 = vld [vmem:[#allocation5_spill] sm:$0xff] }
 0x5cf   :  { %5742 = vmatprep.mubr.bf16.mxu1 %v1309_v33  ;;  %v1281_v46 = vmul.f32 %v6211_v25, %v9564_v11  ;;  %v1316_v17 = vpack.c.bf16 %v1279_v30, %v1278_v16  ;;  %v1312_v60 = vpack.c.bf16 %v581_v21, %v579_v51  ;;  %6027 = vset.pattern.permute.xlu0 %v6696_v53  ;;  %v9584_v21 = vld [vmem:[#allocation7_spill] sm:$0xff] }
 0x5d0   :  { %5728 = vmatprep.subr.bf16.mxu1 %v1319_v61  ;;  %v1293_v57 = vadd.f32 %v1292_v43, %v1278_v16  ;;  %1454 = vperm.xlu1 %6026, %v9572_v58   ;;  %v9585_v51 = vld [vmem:[#allocation3_spill] sm:$0xff] }
 0x5d1   :  { %5729 = vmatpush3.bf16.msra.mxu1 %v1319_v61  ;;  %v1317_v20 = vpack.c.bf16 %v1281_v46, %v1280_v5  ;;  %1458 = vperm.xlu0 %6027, %v9573_v41  }
 0x5d2   :  { %5730 = vmatprep.subr.bf16.mxu1 %v1318_v62  ;;  %v1294_v18 = vadd.f32 %v1293_v57, %v1279_v30 }
 0x5d4   :  { %v1295_v37 = vadd.f32 %v1294_v18, %v1280_v5  ;;  %1446 = vperm.xlu1 %6026, %v9574_v50   ;;  %v9586_v50 = vld [vmem:[#allocation8_spill] sm:$0xff] }
 0x5d5   :  { %5731 = vmatpush3.bf16.msra.mxu1 %v1318_v62  ;;  %1438 = vperm.xlu0 %6027, %v9575_v54  }
 0x5d6   :  { %5732 = vmatprep.subr.bf16.mxu1 %v1317_v20  ;;  %v1296_v32 = vadd.f32 %v1295_v37, %v1281_v46 }
 0x5d8   :  { %v1297_v55 = vadd.f32 %v1296_v32, %v1282_v34  ;;  %1450 = vperm.xlu1 %6026, %v9576_v19   ;;  %v897_v34 = vadd.f32 %v896_v8, %v7321_v14  ;;  %v9587_v19 = vld [vmem:[#allocation9_spill] sm:$0xff] }
 0x5d9   :  { %5733 = vmatpush3.bf16.msra.mxu1 %v1317_v20  ;;  %1430 = vperm.xlu0 %6027, %v9577_v27  }
 0x5da   :  { %5734 = vmatprep.subr.bf16.mxu1 %v1316_v17  ;;  %v1298_v39 = vadd.f32 %v1297_v55, %v1283_v4  ;;  %v898_v0 = vrot.slane %v897_v34, 2 }
 0x5dc   :  { %v1299_v15 = vadd.f32 %v1298_v39, %v1284_v59  ;;  %1442 = vperm.xlu1 %6026, %v9578_v22   ;;  %v899_v45 = vadd.f32 %v898_v0, %v897_v34 }
 0x5dd   :  { %5735 = vmatpush3.bf16.msra.mxu1 %v1316_v17 }
 0x5de   :  { %5736 = vmatprep.subr.bf16.mxu1 %v1315_v36  ;;  %v1300_v1 = vadd.f32 %v1299_v15, %v1285_v29  ;;  %v900_v61 = vrot.slane %v899_v45, 1 }
 0x5e0   :  { %v1301_v42 = vadd.f32 %v1300_v1, %v1286_v56  ;;  %v1310_v56 = vpack.c.bf16 %v573_v26, %v571_v6  ;;  %1434 = vperm.xlu1 %6026, %v9579_v44   ;;  %v901_v25 = vadd.f32 %v900_v61, %v899_v45  ;;  %v9590_v45 = vld [vmem:[#allocation12_spill] sm:$0xff] }
 0x5e1   :  { %5737 = vmatpush3.bf16.msra.mxu1 %v1315_v36 }
 0x5e2   :  { %5738 = vmatprep.subr.bf16.mxu1 %v1314_v48  ;;  %v1302_v24 = vadd.f32 %v1301_v42, %v1287_v2  ;;  %v1311_v2 = vpack.c.bf16 %v577_v7, %v575_v52  ;;  %v979_v5 = vadd.f32 1e-09, %v901_v25  ;;  %v9580_v42 = vld [vmem:[#allocation2_spill] sm:$0xff] }
 0x5e3   :  { %v9583_v7 = vld [vmem:[#allocation6_spill] sm:$0xff] }
 0x5e4   :  { %v1303_v13 = vrot.slane %v1302_v24, 4  ;;  %6212 = vrcp.f32 %v979_v5 }
 0x5e5   :  { %5739 = vmatpush3.bf16.msra.mxu1 %v1314_v48 }
 0x5e6   :  { %5740 = vmatprep.subr.bf16.mxu1 %v1313_v3  ;;  %v1304_v28 = vadd.f32 %v1303_v13, %v1302_v24  ;;  %v9588_v13 = vld [vmem:[#allocation10_spill] sm:$0xff] }
 0x5e8   :  { %v1305_v29 = vrot.slane %v1304_v28, 2 }
 0x5e9   :  { %5741 = vmatpush3.bf16.msra.mxu1 %v1313_v3 }
 0x5ea   :  { %v1306_v33 = vadd.f32 %v1305_v29, %v1304_v28  ;;  %v9589_v28 = vld [vmem:[#allocation11_spill] sm:$0xff] }
 0x5ec   :  { %5743 = vmatmul.mubr.bf16.vlgmr.msra.gmra.mxu1 %v1310_v56  ;;  %v1307_v16 = vrot.slane %v1306_v33, 1 }
 0x5ed   :  { %5746 = vmatprep.mubr.bf16.mxu1 %v1311_v2 }
 0x5ee   :  { %v1308_v62 = vadd.f32 %v1307_v16, %v1306_v33  ;;  %v9591_v16 = vld [vmem:[#allocation13_spill] sm:$0xff] }
 0x5f0   :  { %v1386_v12 = vadd.f32 1e-09, %v1308_v62  ;;  %v9592_v62 = vld [vmem:[#allocation14_spill] sm:$0xff] }
 0x5f1   :  { %v6213_v37 = vpop.eup %6212 }
 0x5f2   :  { %6214 = vrcp.f32 %v1386_v12 }
 0x5f4   :  { %5747 = vmatmul.mubr.bf16.gmra.mxu1 %v1312_v60 }
 0x5f5   :  { %1705 = vmatprep.mubr.bf16.mxu1 %v9571_v63 }
 0x5ff   :  { %v6215_v32 = vpop.eup %6214 }
 0x667   :  { %v5702_v10 = vpop.f32.mrf.mxu1 }
 0x668   :  { %v984_v8 = vmul.f32 %v6213_v37, %v5702_v10  ;;  %v9593_v10 = vld [vmem:[#allocation15_spill] sm:$0xff] }
 0x669   :  { %v7413_v59 = vpop.f32.mrf.mxu1 }
 0x66a   :  { %v982_v5 = vmul.f32 %v6213_v37, %v7413_v59  ;;  %v6054_v59 = vld [vmem:[%s9482_s4 + $0x8] sm:$0xff]  }
 0x66b   :  { %v5703_v35 = vpop.f32.mrf.mxu1 }
 0x66c   :  { %v985_v58 = vmul.f32 %v6213_v37, %v5703_v35 }
 0x66d   :  { %v951_v4 = vpop.f32.mrf.mxu1 }
 0x66e   :  { %v1411_v33 = vsub.f32 %v9590_v45, %v985_v58  ;;  %v983_v61 = vmul.f32 %v6213_v37, %v951_v4 }
 0x68e   :  { %v5706_v43 = vpop.f32.mrf.mxu1 }
 0x68f   :  { %v988_v36 = vmul.f32 %v6213_v37, %v5706_v43 }
 0x690   :  { %v964_v31 = vpop.f32.mrf.mxu1 }
 0x691   :  { %v1417_v56 = vsub.f32 %v9583_v7, %v988_v36  ;;  %v986_v2 = vmul.f32 %v6213_v37, %v964_v31  ;;  %v1409_v31 = vsub.f32 %v9592_v62, %v984_v8 }
 0x692   :  { %v5707_v30 = vpop.f32.mrf.mxu1 }
 0x693   :  { %v989_v17 = vmul.f32 %v6213_v37, %v5707_v30  ;;  %v1413_v34 = vsub.f32 %v9588_v13, %v986_v2  ;;  %v1423_v30 = vpack.c.bf16 %v1411_v33, %v1409_v31 }
 0x694   :  { %v967_v14 = vpop.f32.mrf.mxu1 }
 0x695   :  { %v1419_v24 = vsub.f32 %v9580_v42, %v989_v17  ;;  %v987_v3 = vmul.f32 %v6213_v37, %v967_v14  ;;  %v9594_v14 = vld [vmem:[#allocation16_spill] sm:$0xff]  ;;  %v7451_v17 = vpop.permute.xlu1 %1454 }
 0x696   :  { %v6055_v37 = vld [vmem:[%s9482_s4 + $0x10] sm:$0xff]  }
 0x697   :  { %v1427_v41 = vpack.c.bf16 %v1419_v24, %v1417_v56  ;;  %v1415_v54 = vsub.f32 %v9586_v50, %v987_v3 }
 0x699   :  { %v1425_v35 = vpack.c.bf16 %v1415_v54, %v1413_v34 }
 0x6ac   :  { %v5744_v57 = vpop.f32.mrf.mxu1 }
 0x6ad   :  { %v1391_v47 = vmul.f32 %v6215_v32, %v5744_v57  ;;  %v1407_v57 = vsub.f32 %v9594_v14, %v983_v61 }
 0x6ae   :  { %v1355_v11 = vpop.f32.mrf.mxu1 }
 0x6af   :  { %v1410_v0 = vsub.f32 %v9589_v28, %v1391_v47  ;;  %v1389_v29 = vmul.f32 %v6215_v32, %v1355_v11 }
 0x6b0   :  { %v5745_v46 = vpop.f32.mrf.mxu1 }
 0x6b1   :  { %v1392_v26 = vmul.f32 %v6215_v32, %v5745_v46  ;;  %v1406_v12 = vsub.f32 %v9593_v10, %v1389_v29  ;;  %v9595_v46 = vld [vmem:[#allocation17_spill] sm:$0xff] }
 0x6b2   :  { %v1358_v18 = vpop.f32.mrf.mxu1 }
 0x6b3   :  { %v1412_v27 = vsub.f32 %v9587_v19, %v1392_v26  ;;  %v1390_v22 = vmul.f32 %v6215_v32, %v1358_v18  ;;  %v1405_v18 = vsub.f32 %v9595_v46, %v982_v5 }
 0x6b4   :  { %v5748_v20 = vpop.f32.mrf.mxu1 }
 0x6b5   :  { %v1395_v39 = vmul.f32 %v6215_v32, %v5748_v20  ;;  %v1408_v43 = vsub.f32 %v9591_v16, %v1390_v22  ;;  %v1424_v25 = vpack.c.bf16 %v1412_v27, %v1410_v0  ;;  %v1421_v4 = vpack.c.bf16 %v1407_v57, %v1405_v18  ;;  %v6053_v20 = vld [vmem:[%s9482_s4] sm:$0xff]  }
 0x6b6   :  { %v1371_v55 = vpop.f32.mrf.mxu1 }
 0x6b7   :  { %v1393_v1 = vmul.f32 %v6215_v32, %v1371_v55  ;;  %v1418_v52 = vsub.f32 %v9581_v23, %v1395_v39  ;;  %v1422_v11 = vpack.c.bf16 %v1408_v43, %v1406_v12  ;;  %v1447_v55 = vpop.permute.xlu1 %1446  ;;  %v7453_v39 = vpop.permute.xlu0 %1458 }
 0x6b8   :  { %v5749_v15 = vpop.f32.mrf.mxu1 }
 0x6b9   :  { %v1396_v48 = vmul.f32 %v6215_v32, %v5749_v15  ;;  %v1414_v40 = vsub.f32 %v9584_v21, %v1393_v1 }
 0x6ba   :  { %v1374_v38 = vpop.f32.mrf.mxu1 }
 0x6bb   :  { %v1420_v6 = vsub.f32 %v9582_v9, %v1396_v48  ;;  %v1394_v49 = vmul.f32 %v6215_v32, %v1374_v38  ;;  %v6056_v32 = vld [vmem:[%s9482_s4 + $0x18] sm:$0xff]   ;;  %v1451_v36 = vpop.permute.xlu1 %1450  ;;  %v1439_v15 = vpop.permute.xlu0 %1438 }
 0x6bd   :  { %v1416_v60 = vsub.f32 %v9585_v51, %v1394_v49  ;;  %v1428_v53 = vpack.c.bf16 %v1420_v6, %v1418_v52 }
 0x6bf   :  { %1501 = vmatprep.subr.bf16.mxu0 %v1428_v53  ;;  %v1426_v44 = vpack.c.bf16 %v1416_v60, %v1414_v40  ;;  %v1443_v1 = vpop.permute.xlu1 %1442  ;;  %v1431_v48 = vpop.permute.xlu0 %1430 }
 0x6c0   :  { %1502 = vmatpush1.bf16.msra.mxu0 %v1427_v41 }
 0x6c1   :  { %1503 = vmatprep.subr.bf16.mxu0 %v1426_v44 }
 0x6c3   :  { %v1435_v26 = vpop.permute.xlu1 %1434 }
 0x6c4   :  { %1504 = vmatpush1.bf16.msra.mxu0 %v1425_v35 }
 0x6c5   :  { %1505 = vmatprep.subr.bf16.mxu0 %v1424_v25 }
 0x6c8   :  { %1506 = vmatpush1.bf16.msra.mxu0 %v1423_v30 }
 0x6c9   :  { %1507 = vmatprep.subr.bf16.mxu0 %v1422_v11 }
 0x6cc   :  { %1508 = vmatpush1.bf16.msra.mxu0 %v1421_v4 }
 0x6cf   :  { %5338 = vmatmul.mubr.msk.bf16.vlgmr.msra.gmra.mxu0 %vm121_vm0, %v6053_v20 }
 0x6d0   :  { %1535 = vmatprep.mubr.bf16.mxu0 %v9571_v63 }
 0x6d7   :  { %5339 = vmatmul.mubr.msk.bf16.gmra.mxu0 %vm121_vm0, %v6054_v59 }
 0x6d8   :  { %1545 = vmatprep.mubr.bf16.mxu0 %v9571_v63 }
 0x6df   :  { %5340 = vmatmul.mubr.msk.bf16.gmra.mxu0 %vm121_vm0, %v6055_v37 }
 0x6e0   :  { %1555 = vmatprep.mubr.bf16.mxu0 %v9571_v63 }
 0x6e7   :  { %5341 = vmatmul.mubr.msk.bf16.gmra.mxu0 %vm121_vm0, %v6056_v32 }
 0x78f   :  { %v1527_v24 = vpop.f32.mrf.mxu0 }
 0x790   :  { %v1528_v3 = vadd.f32 %v1527_v24, %v1431_v48 }
 0x791   :  { %v1529_v38 = vpop.f32.mrf.mxu0 }
 0x792   :  { %v1566_v52 = vmax.f32 %v1528_v3, 0.0  ;;  %v1530_v6 = vadd.f32 %v1529_v38, %v1431_v48 }
 0x793   :  { %v1531_v49 = vpop.f32.mrf.mxu0 }
 0x794   :  { %v7456_v56 = vadd.f32 %v1566_v52, %v9595_v46  ;;  %v1567_v2 = vmax.f32 %v1530_v6, 0.0  ;;  %v1532_v47 = vadd.f32 %v1531_v49, %v1435_v26 }
 0x795   :  { %v1533_v40 = vpop.f32.mrf.mxu0 }
 0x796   :  { %1598 = vst [vmem:[%s9483_s5] sm:$0xff] %v7456_v56  ;;  %v7463_v60 = vadd.f32 %v1567_v2, %v9593_v10  ;;  %v1568_v53 = vmax.f32 %v1532_v47, 0.0  ;;  %v1534_v58 = vadd.f32 %v1533_v40, %v1435_v26 }
 0x797   :  { %v1537_v41 = vpop.f32.mrf.mxu0 }
 0x798   :  { %1599 = vst [vmem:[%s9483_s5 + $0x8] sm:$0xff] %v7463_v60  ;;  %v7470_v54 = vadd.f32 %v1568_v53, %v9594_v14  ;;  %v1569_v27 = vmax.f32 %v1534_v58, 0.0  ;;  %v1538_v22 = vadd.f32 %v1537_v41, %v1439_v15  ;;  %v6057_v53 = vld [vmem:[%s9481_s3 + $0x28] sm:$0xff]  }
 0x799   :  { %v1539_v44 = vpop.f32.mrf.mxu0 }
 0x79a   :  { %1600 = vst [vmem:[%s9483_s5 + $0x10] sm:$0xff] %v7470_v54  ;;  %v7477_v8 = vadd.f32 %v1569_v27, %v9591_v16  ;;  %v1570_v34 = vmax.f32 %v1538_v22, 0.0  ;;  %v1540_v0 = vadd.f32 %v1539_v44, %v1439_v15 }
 0x79b   :  { %v1541_v29 = vpop.f32.mrf.mxu0 }
 0x79c   :  { %1601 = vst [vmem:[%s9483_s5 + $0x18] sm:$0xff] %v7477_v8  ;;  %v7484_v33 = vadd.f32 %v1570_v34, %v9592_v62  ;;  %v1571_v61 = vmax.f32 %v1540_v0, 0.0  ;;  %v1542_v35 = vadd.f32 %v1541_v29, %v1443_v1  ;;  %v1615_v40 = vpack.c.bf16 %v7477_v8, %v7463_v60  ;;  %v6620_v8 = vld [vmem:[%s9480_s2] sm:$0xff] }
 0x79d   :  { %v1543_v43 = vpop.f32.mrf.mxu0 }
 0x79e   :  { %1602 = vst [vmem:[%s9483_s5 + $0x20] sm:$0xff] %v7484_v33  ;;  %v1587_v16 = vadd.f32 %v1571_v61, %v9589_v28  ;;  %v1572_v25 = vmax.f32 %v1542_v35, 0.0  ;;  %v1544_v31 = vadd.f32 %v1543_v43, %v1443_v1 }
 0x79f   :  { %v1547_v5 = vpop.f32.mrf.mxu0 }
 0x7a0   :  { %1603 = vst [vmem:[%s9483_s5 + $0x28] sm:$0xff] %v1587_v16  ;;  %v1588_v62 = vadd.f32 %v1572_v25, %v9590_v45  ;;  %v1573_v10 = vmax.f32 %v1544_v31, 0.0  ;;  %v1548_v12 = vadd.f32 %v1547_v5, %v1447_v55 }
 0x7a1   :  { %v1549_v30 = vpop.f32.mrf.mxu0 }
 0x7a2   :  { %1604 = vst [vmem:[%s9483_s5 + $0x30] sm:$0xff] %v1588_v62  ;;  %v1589_v14 = vadd.f32 %v1573_v10, %v9587_v19  ;;  %v1574_v57 = vmax.f32 %v1548_v12, 0.0  ;;  %v1550_v28 = vadd.f32 %v1549_v30, %v1447_v55 }
 0x7a3   :  { %v1551_v11 = vpop.f32.mrf.mxu0 }
 0x7a4   :  { %1605 = vst [vmem:[%s9483_s5 + $0x38] sm:$0xff] %v1589_v14  ;;  %v1590_v46 = vadd.f32 %v1574_v57, %v9588_v13  ;;  %v1575_v18 = vmax.f32 %v1550_v28, 0.0  ;;  %v1552_v45 = vadd.f32 %v1551_v11, %v1451_v36  ;;  %v1617_v47 = vpack.c.bf16 %v1589_v14, %v1587_v16 }
 0x7a5   :  { %v1553_v4 = vpop.f32.mrf.mxu0 }
 0x7a6   :  { %1606 = vst [vmem:[%s9483_s5 + $0x40] sm:$0xff] %v1590_v46  ;;  %v1591_v20 = vadd.f32 %v1575_v18, %v9584_v21  ;;  %v1576_v59 = vmax.f32 %v1552_v45, 0.0  ;;  %v1554_v19 = vadd.f32 %v1553_v4, %v1451_v36 }
 0x7a7   :  { %v1557_v37 = vpop.f32.mrf.mxu0 }
 0x7a8   :  { %1607 = vst [vmem:[%s9483_s5 + $0x48] sm:$0xff] %v1591_v20  ;;  %v1592_v32 = vadd.f32 %v1576_v59, %v9586_v50  ;;  %v1577_v55 = vmax.f32 %v1554_v19, 0.0  ;;  %v1558_v13 = vadd.f32 %v1557_v37, %v7451_v17 }
 0x7a9   :  { %v1559_v15 = vpop.f32.mrf.mxu0 }
 0x7aa   :  { %1608 = vst [vmem:[%s9483_s5 + $0x50] sm:$0xff] %v1592_v32  ;;  %v1593_v1 = vadd.f32 %v1577_v55, %v9585_v51  ;;  %v1578_v21 = vmax.f32 %v1558_v13, 0.0  ;;  %v1560_v36 = vadd.f32 %v1559_v15, %v7451_v17  ;;  %v1618_v2 = vpack.c.bf16 %v1592_v32, %v1590_v46 }
 0x7ab   :  { %v1561_v48 = vpop.f32.mrf.mxu0 }
 0x7ac   :  { %1609 = vst [vmem:[%s9483_s5 + $0x58] sm:$0xff] %v1593_v1  ;;  %v1594_v50 = vadd.f32 %v1578_v21, %v9583_v7  ;;  %v1579_v24 = vmax.f32 %v1560_v36, 0.0  ;;  %v1562_v3 = vadd.f32 %v1561_v48, %v7453_v39  ;;  %v6059_v48 = vld [vmem:[%s9481_s3 + $0x38] sm:$0xff]  }
 0x7ad   :  { %v1563_v38 = vpop.f32.mrf.mxu0 }
 0x7ae   :  { %1610 = vst [vmem:[%s9483_s5 + $0x60] sm:$0xff] %v1594_v50  ;;  %v1595_v51 = vadd.f32 %v1579_v24, %v9581_v23  ;;  %v1580_v26 = vmax.f32 %v1562_v3, 0.0  ;;  %v1564_v17 = vadd.f32 %v1563_v38, %v7453_v39  ;;  %v1619_v39 = vpack.c.bf16 %v1593_v1, %v1591_v20 }
 0x7b0   :  { %1611 = vst [vmem:[%s9483_s5 + $0x68] sm:$0xff] %v1595_v51  ;;  %v1596_v52 = vadd.f32 %v1580_v26, %v9580_v42  ;;  %v1581_v7 = vmax.f32 %v1564_v17, 0.0  ;;  %v1616_v42 = vpack.c.bf16 %v1588_v62, %v7484_v33 }
 0x7b2   :  { %1612 = vst [vmem:[%s9483_s5 + $0x70] sm:$0xff] %v1596_v52  ;;  %v1597_v6 = vadd.f32 %v1581_v7, %v9582_v9  ;;  %v1620_v49 = vpack.c.bf16 %v1596_v52, %v1594_v50  ;;  %v1614_v9 = vpack.c.bf16 %v7470_v54, %v7456_v56  ;;  %v6058_v56 = vld [vmem:[%s9481_s3 + $0x30] sm:$0xff]   ;;  %v6697_v54 = vmov 4  }
 0x7b4   :  { %1613 = vst [vmem:[%s9483_s5 + $0x78] sm:$0xff] %v1597_v6  ;;  %v1621_v23 = vpack.c.bf16 %v1597_v6, %v1595_v51 }
 0x7b6   :  { %1681 = vmatprep.subr.bf16.mxu1 %v1621_v23 }
 0x7b7   :  { %1682 = vmatpush1.bf16.msra.mxu1 %v1620_v49 }
 0x7b8   :  { %1683 = vmatprep.subr.bf16.mxu1 %v1619_v39 }
 0x7bb   :  { %1684 = vmatpush1.bf16.msra.mxu1 %v1618_v2 }
 0x7bc   :  { %1685 = vmatprep.subr.bf16.mxu1 %v1617_v47  ;;  %v6060_v47 = vld [vmem:[%s9481_s3 + $0x40] sm:$0xff]  }
 0x7bf   :  { %1686 = vmatpush1.bf16.msra.mxu1 %v1616_v42  ;;  %v6061_v42 = vld [vmem:[%s9481_s3 + $0x48] sm:$0xff]  }
 0x7c0   :  { %1687 = vmatprep.subr.bf16.mxu1 %v1615_v40 }
 0x7c3   :  { %1688 = vmatpush1.bf16.msra.mxu1 %v1614_v9 }
 0x7c6   :  { %5357 = vmatmul.mubr.msk.bf16.vlgmr.msra.gmra.mxu1 %vm121_vm0, %v6057_v53 }
 0x7c7   :  { %1715 = vmatprep.mubr.bf16.mxu1 %v9571_v63 }
 0x7ce   :  { %5358 = vmatmul.mubr.msk.bf16.gmra.mxu1 %vm121_vm0, %v6058_v56 }
 0x7cf   :  { %1725 = vmatprep.mubr.bf16.mxu1 %v9571_v63 }
 0x7d6   :  { %5359 = vmatmul.mubr.msk.bf16.gmra.mxu1 %vm121_vm0, %v6059_v48 }
 0x7d7   :  { %1735 = vmatprep.mubr.bf16.mxu1 %v9571_v63 }
 0x7de   :  { %5360 = vmatmul.mubr.msk.bf16.gmra.mxu1 %vm121_vm0, %v6060_v47 }
 0x7df   :  { %1745 = vmatprep.mubr.bf16.mxu1 %v9571_v63 }
 0x7e6   :  { %5361 = vmatmul.mubr.msk.bf16.gmra.mxu1 %vm121_vm0, %v6061_v42 }
 0x886   :  { %v1707_v58 = vpop.f32.mrf.mxu1 }
 0x888   :  { %v1709_v41 = vpop.f32.mrf.mxu1 }
 0x88a   :  { %v1711_v27 = vpop.f32.mrf.mxu1 }
 0x88b   :  { %v1804_v22 = vpack.c.bf16 %v1711_v27, %v1707_v58 }
 0x88c   :  { %v1713_v44 = vpop.f32.mrf.mxu1 }
 0x88d   :  { %v2211_v60 = vpack.c.bf16 %v1713_v44, %v1709_v41  ;;  %1805 = vxpose.xlu0.c.b16.start.end [1/1] (short) %v1804_v22, 128  ;;  %5750 = vmatprep.subr.bf16.mxu0 %v1804_v22 }
 0x88e   :  { %5751 = vmatpush3.bf16.msra.mxu0 %v1804_v22 }
 0x88f   :  { %2212 = vxpose.xlu1.c.b16.start.end [1/1] (short) %v2211_v60, 128  ;;  %5792 = vmatprep.subr.bf16.mxu0 %v2211_v60 }
 0x893   :  { %6028 = vset.pattern.permute.xlu1 %v6697_v54 }
 0x896   :  { %6029 = vset.pattern.permute.xlu0 %v6697_v54 }
 0x8af   :  { %1757 = vperm.xlu1 %6028, %v6620_v8  }
 0x8ef   :  { %v1813_v34 = vpop.trf.xlu0 }
 0x8f0   :  { %5752 = vmatprep.mubr.msk.bf16.mxu0 %vm599_vm1, %v1813_v34 }
 0x8f1   :  { %v2220_v61 = vpop.trf.xlu1 }
 0x8f3   :  { %v1814_v0 = vpop.trf.xlu0 }
 0x8f4   :  { %5753 = vmatmul.mubr.msk.bf16.vlgmr.msra.gmra.mxu0 %vm599_vm1, %v1814_v0 }
 0x8f5   :  { %5793 = vmatpush3.bf16.msra.mxu0 %v2211_v60  ;;  %v2221_v16 = vpop.trf.xlu1 }
 0x8f7   :  { %v1815_v29 = vpop.trf.xlu0 }
 0x8f8   :  { %5756 = vmatprep.mubr.msk.bf16.mxu0 %vm599_vm1, %v1815_v29 }
 0x8f9   :  { %v2222_v31 = vpop.trf.xlu1 }
 0x8fb   :  { %v1816_v33 = vpop.trf.xlu0 }
 0x8fc   :  { %5757 = vmatmul.mubr.msk.bf16.gmra.mxu0 %vm599_vm1, %v1816_v33 }
 0x8fd   :  { %v2223_v62 = vpop.trf.xlu1 }
 0x8ff   :  { %v1817_v35 = vpop.trf.xlu0 }
 0x900   :  { %5760 = vmatprep.mubr.msk.bf16.mxu0 %vm599_vm1, %v1817_v35 }
 0x901   :  { %v2224_v10 = vpop.trf.xlu1 }
 0x903   :  { %v1818_v43 = vpop.trf.xlu0 }
 0x904   :  { %5761 = vmatmul.mubr.msk.bf16.gmra.mxu0 %vm599_vm1, %v1818_v43 }
 0x905   :  { %v2225_v12 = vpop.trf.xlu1 }
 0x907   :  { %v1819_v25 = vpop.trf.xlu0 }
 0x908   :  { %5764 = vmatprep.mubr.msk.bf16.mxu0 %vm599_vm1, %v1819_v25 }
 0x909   :  { %v2226_v30 = vpop.trf.xlu1 }
 0x90b   :  { %v1820_v5 = vpop.trf.xlu0 }
 0x90c   :  { %5765 = vmatmul.mubr.msk.bf16.gmra.mxu0 %vm599_vm1, %v1820_v5 }
 0x90d   :  { %5794 = vmatprep.mubr.msk.bf16.mxu0 %vm599_vm1, %v2220_v61  ;;  %v2227_v14 = vpop.trf.xlu1 }
 0x914   :  { %5795 = vmatmul.mubr.msk.bf16.vlgmr.msra.gmra.mxu0 %vm599_vm1, %v2221_v16 }
 0x915   :  { %5798 = vmatprep.mubr.msk.bf16.mxu0 %vm599_vm1, %v2222_v31 }
 0x91c   :  { %5799 = vmatmul.mubr.msk.bf16.gmra.mxu0 %vm599_vm1, %v2223_v62 }
 0x91d   :  { %5802 = vmatprep.mubr.msk.bf16.mxu0 %vm599_vm1, %v2224_v10 }
 0x924   :  { %5803 = vmatmul.mubr.msk.bf16.gmra.mxu0 %vm599_vm1, %v2225_v12 }
 0x925   :  { %5806 = vmatprep.mubr.msk.bf16.mxu0 %vm599_vm1, %v2226_v30 }
 0x92a   :  { %v7683_v40 = vpop.permute.xlu1 %1757 }
 0x92c   :  { %5807 = vmatmul.mubr.msk.bf16.gmra.mxu0 %vm599_vm1, %v2227_v14 }
 0x92d   :  { %2747 = vmatprep.mubr.bf16.mxu0 %v9571_v63 }
 0x9b4   :  { %v7573_v57 = vpop.f32.mrf.mxu0 }
 0x9b5   :  { %1946 = vmax.xlane.f32.xlu1 %v7573_v57 }
 0x9b6   :  { %v7576_v28 = vpop.f32.mrf.mxu0 }
 0x9b8   :  { %v7578_v11 = vpop.f32.mrf.mxu0 }
 0x9b9   :  { %1948 = vmax.xlane.f32.xlu0 %v7578_v11  ;;  %1942 = vmax.xlane.f32.xlu1 %v7576_v28 }
 0x9ba   :  { %v7582_v46 = vpop.f32.mrf.mxu0 }
 0x9bc   :  { %v7584_v18 = vpop.f32.mrf.mxu0 }
 0x9bd   :  { %1944 = vmax.xlane.f32.xlu0 %v7582_v46  ;;  %1954 = vmax.xlane.f32.xlu1 %v7584_v18 }
 0x9be   :  { %v7588_v45 = vpop.f32.mrf.mxu0 }
 0x9c0   :  { %v7590_v4 = vpop.f32.mrf.mxu0 }
 0x9c1   :  { %1956 = vmax.xlane.f32.xlu0 %v7590_v4  ;;  %1950 = vmax.xlane.f32.xlu1 %v7588_v45 }
 0x9c2   :  { %v7594_v20 = vpop.f32.mrf.mxu0 }
 0x9c4   :  { %v7596_v59 = vpop.f32.mrf.mxu0 }
 0x9c5   :  { %1952 = vmax.xlane.f32.xlu0 %v7594_v20  ;;  %1962 = vmax.xlane.f32.xlu1 %v7596_v59 }
 0x9c6   :  { %v7600_v19 = vpop.f32.mrf.mxu0 }
 0x9c8   :  { %v7602_v37 = vpop.f32.mrf.mxu0 }
 0x9c9   :  { %1964 = vmax.xlane.f32.xlu0 %v7602_v37  ;;  %1958 = vmax.xlane.f32.xlu1 %v7600_v19 }
 0x9ca   :  { %v7606_v32 = vpop.f32.mrf.mxu0 }
 0x9cc   :  { %v7608_v55 = vpop.f32.mrf.mxu0 }
 0x9cd   :  { %1960 = vmax.xlane.f32.xlu0 %v7606_v32 }
 0x9ce   :  { %v7611_v13 = vpop.f32.mrf.mxu0 }
 0x9d0   :  { %v7613_v15 = vpop.f32.mrf.mxu0 }
 0x9d1   :  { %1970 = vmax.xlane.f32.xlu0 %v7608_v55  ;;  %1972 = vmax.xlane.f32.xlu1 %v7613_v15 }
 0x9d2   :  { %v7617_v1 = vpop.f32.mrf.mxu0 }
 0x9d4   :  { %v7619_v21 = vpop.f32.mrf.mxu0 }
 0x9d5   :  { %1966 = vmax.xlane.f32.xlu0 %v7611_v13  ;;  %2353 = vmax.xlane.f32.xlu1 %v7619_v21 }
 0x9d6   :  { %v7623_v36 = vpop.f32.mrf.mxu0 }
 0x9d8   :  { %v7628_v50 = vpop.f32.mrf.mxu0 }
 0x9d9   :  { %1968 = vmax.xlane.f32.xlu0 %v7617_v1  ;;  %2349 = vmax.xlane.f32.xlu1 %v7623_v36 }
 0x9da   :  { %v7632_v24 = vpop.f32.mrf.mxu0 }
 0x9dc   :  { %v7636_v3 = vpop.f32.mrf.mxu0 }
 0x9dd   :  { %2355 = vmax.xlane.f32.xlu0 %v7628_v50  ;;  %2361 = vmax.xlane.f32.xlu1 %v7636_v3 }
 0x9de   :  { %v7640_v38 = vpop.f32.mrf.mxu0 }
 0x9e0   :  { %v7642_v51 = vpop.f32.mrf.mxu0 }
 0x9e1   :  { %2351 = vmax.xlane.f32.xlu0 %v7632_v24  ;;  %2357 = vmax.xlane.f32.xlu1 %v7640_v38 }
 0x9e2   :  { %v7646_v26 = vpop.f32.mrf.mxu0 }
 0x9e4   :  { %v7648_v17 = vpop.f32.mrf.mxu0 }
 0x9e5   :  { %2363 = vmax.xlane.f32.xlu0 %v7642_v51  ;;  %2369 = vmax.xlane.f32.xlu1 %v7648_v17 }
 0x9e6   :  { %v7652_v52 = vpop.f32.mrf.mxu0 }
 0x9e8   :  { %v7654_v7 = vpop.f32.mrf.mxu0 }
 0x9e9   :  { %2359 = vmax.xlane.f32.xlu0 %v7646_v26  ;;  %2365 = vmax.xlane.f32.xlu1 %v7652_v52 }
 0x9ea   :  { %v7658_v6 = vpop.f32.mrf.mxu0 }
 0x9ec   :  { %v7660_v23 = vpop.f32.mrf.mxu0 }
 0x9ed   :  { %2371 = vmax.xlane.f32.xlu0 %v7654_v7  ;;  %2377 = vmax.xlane.f32.xlu1 %v7660_v23 }
 0x9ee   :  { %v7664_v49 = vpop.f32.mrf.mxu0 }
 0x9f0   :  { %v7668_v39 = vpop.f32.mrf.mxu0 }
 0x9f1   :  { %2367 = vmax.xlane.f32.xlu0 %v7658_v6  ;;  %2373 = vmax.xlane.f32.xlu1 %v7664_v49 }
 0x9f2   :  { %v7671_v2 = vpop.f32.mrf.mxu0 }
 0x9f5   :  { %2379 = vmax.xlane.f32.xlu0 %v7668_v39 }
 0x9f9   :  { %2375 = vmax.xlane.f32.xlu0 %v7671_v2 }
 0xa3e   :  { %v1947_v9 = vpop.xlane.xlu1 %1946 }
 0xa3f   :  { %v1976_v53 = vsub.f32 %v7573_v57, %v1947_v9 }
 0xa41   :  { %v1994_v58 = vmul.f32 1.442695, %v1976_v53 }
 0xa42   :  { %v1949_v41 = vpop.xlane.xlu0 %1948  ;;  %v1943_v27 = vpop.xlane.xlu1 %1942 }
 0xa43   :  { %6216 = vpow2.f32 %v1994_v58  ;;  %v1977_v22 = vsub.f32 %v7578_v11, %v1949_v41  ;;  %v1974_v44 = vsub.f32 %v7576_v28, %v1943_v27 }
 0xa45   :  { %v1996_v60 = vmul.f32 1.442695, %v1977_v22  ;;  %v1990_v56 = vmul.f32 1.442695, %v1974_v44 }
 0xa46   :  { %v1945_v54 = vpop.xlane.xlu0 %1944  ;;  %v1955_v8 = vpop.xlane.xlu1 %1954 }
 0xa47   :  { %6218 = vpow2.f32 %v1996_v60  ;;  %v1975_v34 = vsub.f32 %v7582_v46, %v1945_v54  ;;  %v1980_v0 = vsub.f32 %v7584_v18, %v1955_v8 }
 0xa48   :  { %6220 = vpow2.f32 %v1990_v56 }
 0xa49   :  { %v1992_v29 = vmul.f32 1.442695, %v1975_v34  ;;  %v2002_v33 = vmul.f32 1.442695, %v1980_v0 }
 0xa4a   :  { %v1957_v61 = vpop.xlane.xlu0 %1956  ;;  %v1951_v35 = vpop.xlane.xlu1 %1950 }
 0xa4b   :  { %6222 = vpow2.f32 %v1992_v29  ;;  %v1981_v43 = vsub.f32 %v7590_v4, %v1957_v61  ;;  %v1978_v16 = vsub.f32 %v7588_v45, %v1951_v35 }
 0xa4c   :  { %6224 = vpow2.f32 %v2002_v33 }
 0xa4d   :  { %v2004_v25 = vmul.f32 1.442695, %v1981_v43  ;;  %v1998_v31 = vmul.f32 1.442695, %v1978_v16 }
 0xa4e   :  { %v1953_v5 = vpop.xlane.xlu0 %1952  ;;  %v1963_v62 = vpop.xlane.xlu1 %1962 }
 0xa4f   :  { %6226 = vpow2.f32 %v2004_v25  ;;  %v1979_v10 = vsub.f32 %v7594_v20, %v1953_v5  ;;  %v1984_v12 = vsub.f32 %v7596_v59, %v1963_v62 }
 0xa50   :  { %v7694_v30 = vpop.eup %6216  ;;  %6228 = vpow2.f32 %v1998_v31 }
 0xa51   :  { %v2000_v14 = vmul.f32 1.442695, %v1979_v10  ;;  %v2010_v57 = vmul.f32 1.442695, %v1984_v12  ;;  %2026 = vadd.xlane.f32.xlu1 %v7694_v30 }
 0xa52   :  { %v1965_v28 = vpop.xlane.xlu0 %1964  ;;  %v1959_v11 = vpop.xlane.xlu1 %1958 }
 0xa53   :  { %6230 = vpow2.f32 %v2000_v14  ;;  %v1985_v46 = vsub.f32 %v7602_v37, %v1965_v28  ;;  %v1982_v18 = vsub.f32 %v7600_v19, %v1959_v11 }
 0xa54   :  { %v7699_v45 = vpop.eup %6218  ;;  %6232 = vpow2.f32 %v2010_v57 }
 0xa55   :  { %v7701_v4 = vpop.eup %6220  ;;  %v2012_v20 = vmul.f32 1.442695, %v1985_v46  ;;  %v2006_v59 = vmul.f32 1.442695, %v1982_v18  ;;  %2028 = vadd.xlane.f32.xlu0 %v7699_v45 }
 0xa56   :  { %2022 = vadd.xlane.f32.xlu1 %v7701_v4  ;;  %v1961_v48 = vpop.xlane.xlu0 %1960 }
 0xa57   :  { %6234 = vpow2.f32 %v2012_v20  ;;  %v1983_v47 = vsub.f32 %v7606_v32, %v1961_v48 }
 0xa58   :  { %v7706_v42 = vpop.eup %6222  ;;  %6236 = vpow2.f32 %v2006_v59 }
 0xa59   :  { %v7708_v37 = vpop.eup %6224  ;;  %v2008_v19 = vmul.f32 1.442695, %v1983_v47  ;;  %2024 = vadd.xlane.f32.xlu0 %v7706_v42 }
 0xa5a   :  { %2034 = vadd.xlane.f32.xlu1 %v7708_v37  ;;  %v1971_v9 = vpop.xlane.xlu0 %1970  ;;  %v1973_v53 = vpop.xlane.xlu1 %1972 }
 0xa5b   :  { %6238 = vpow2.f32 %v2008_v19  ;;  %v1988_v58 = vsub.f32 %v7608_v55, %v1971_v9  ;;  %v1989_v41 = vsub.f32 %v7613_v15, %v1973_v53 }
 0xa5c   :  { %v7714_v27 = vpop.eup %6226 }
 0xa5d   :  { %v7716_v32 = vpop.eup %6228  ;;  %v2018_v22 = vmul.f32 1.442695, %v1988_v58  ;;  %v2020_v44 = vmul.f32 1.442695, %v1989_v41  ;;  %2036 = vadd.xlane.f32.xlu0 %v7714_v27 }
 0xa5e   :  { %2030 = vadd.xlane.f32.xlu1 %v7716_v32  ;;  %v1967_v60 = vpop.xlane.xlu0 %1966  ;;  %v7720_v56 = vpop.xlane.xlu1 %2353 }
 0xa5f   :  { %6240 = vpow2.f32 %v2018_v22  ;;  %v1986_v54 = vsub.f32 %v7611_v13, %v1967_v60 }
 0xa60   :  { %v7723_v8 = vpop.eup %6230  ;;  %6242 = vpow2.f32 %v2020_v44 }
 0xa61   :  { %v7725_v55 = vpop.eup %6232  ;;  %v2014_v15 = vmul.f32 1.442695, %v1986_v54  ;;  %2032 = vadd.xlane.f32.xlu0 %v7723_v8 }
 0xa62   :  { %2042 = vadd.xlane.f32.xlu1 %v7725_v55  ;;  %v1969_v34 = vpop.xlane.xlu0 %1968  ;;  %v7729_v0 = vpop.xlane.xlu1 %2349 }
 0xa63   :  { %6244 = vpow2.f32 %v2014_v15  ;;  %v1987_v29 = vsub.f32 %v7617_v1, %v1969_v34 }
 0xa64   :  { %v7732_v33 = vpop.eup %6234 }
 0xa65   :  { %v7734_v61 = vpop.eup %6236  ;;  %v2016_v13 = vmul.f32 1.442695, %v1987_v29  ;;  %2044 = vadd.xlane.f32.xlu0 %v7732_v33 }
 0xa66   :  { %2038 = vadd.xlane.f32.xlu1 %v7734_v61  ;;  %v7738_v35 = vpop.xlane.xlu0 %2355  ;;  %v2362_v43 = vpop.xlane.xlu1 %2361 }
 0xa67   :  { %6246 = vpow2.f32 %v2016_v13  ;;  %v2387_v16 = vsub.f32 %v7636_v3, %v2362_v43 }
 0xa68   :  { %v7741_v25 = vpop.eup %6238 }
 0xa69   :  { %v2409_v31 = vmul.f32 1.442695, %v2387_v16  ;;  %2040 = vadd.xlane.f32.xlu0 %v7741_v25 }
 0xa6a   :  { %v7744_v1 = vpop.xlane.xlu0 %2351  ;;  %v2358_v5 = vpop.xlane.xlu1 %2357 }
 0xa6b   :  { %v2385_v62 = vsub.f32 %v7640_v38, %v2358_v5  ;;  %6248 = vpow2.f32 %v2409_v31 }
 0xa6c   :  { %v7747_v10 = vpop.eup %6240 }
 0xa6d   :  { %v7749_v12 = vpop.eup %6242  ;;  %v2405_v14 = vmul.f32 1.442695, %v2385_v62  ;;  %2050 = vadd.xlane.f32.xlu1 %v7747_v10 }
 0xa6e   :  { %2052 = vadd.xlane.f32.xlu0 %v7749_v12  ;;  %v2364_v3 = vpop.xlane.xlu0 %2363  ;;  %v2370_v57 = vpop.xlane.xlu1 %2369 }
 0xa6f   :  { %v2388_v28 = vsub.f32 %v7642_v51, %v2364_v3  ;;  %v2391_v11 = vsub.f32 %v7648_v17, %v2370_v57  ;;  %6250 = vpow2.f32 %v2405_v14 }
 0xa70   :  { %v7755_v46 = vpop.eup %6244 }
 0xa71   :  { %v2411_v38 = vmul.f32 1.442695, %v2388_v28  ;;  %v2417_v18 = vmul.f32 1.442695, %v2391_v11  ;;  %2046 = vadd.xlane.f32.xlu1 %v7755_v46 }
 0xa72   :  { %v2360_v20 = vpop.xlane.xlu0 %2359  ;;  %v2366_v59 = vpop.xlane.xlu1 %2365 }
 0xa73   :  { %6252 = vpow2.f32 %v2411_v38  ;;  %v2386_v48 = vsub.f32 %v7646_v26, %v2360_v20  ;;  %v2389_v47 = vsub.f32 %v7652_v52, %v2366_v59  ;;  %v7808_v38 = vld [vmem:[%s9480_s2 + $0x10] sm:$0xff]  ;;  %v7820_v20 = vld [vmem:[%s9480_s2 + $0x8] sm:$0xff]  ;;  %v2383_v59 = vsub.f32 %v7619_v21, %v7720_v56 }
 0xa74   :  { %v7760_v19 = vpop.eup %6246  ;;  %6254 = vpow2.f32 %v2417_v18  ;;  %v7814_v18 = vld [vmem:[%s9480_s2 + $0x18] sm:$0xff] }
 0xa75   :  { %v2407_v51 = vmul.f32 1.442695, %v2386_v48  ;;  %v2413_v9 = vmul.f32 1.442695, %v2389_v47  ;;  %2048 = vadd.xlane.f32.xlu0 %v7760_v19  ;;  %v2384_v48 = vsub.f32 %v7628_v50, %v7738_v35  ;;  %v2401_v47 = vmul.f32 1.442695, %v2383_v59 }
 0xa76   :  { %v2372_v17 = vpop.xlane.xlu0 %2371  ;;  %v2378_v53 = vpop.xlane.xlu1 %2377  ;;  %v7846_v35 = vld [vmem:[%s9480_s2 + $0x20] sm:$0xff] }
 0xa77   :  { %6256 = vpow2.f32 %v2407_v51  ;;  %v2392_v58 = vsub.f32 %v7654_v7, %v2372_v17  ;;  %v2395_v41 = vsub.f32 %v7660_v23, %v2378_v53  ;;  %v2381_v51 = vsub.f32 %v7623_v36, %v7729_v0 }
 0xa78   :  { %6258 = vpow2.f32 %v2413_v9  ;;  %v7765_v22 = vpop.eup %6248  ;;  %v2403_v9 = vmul.f32 1.442695, %v2384_v48  ;;  %v2382_v53 = vsub.f32 %v7632_v24, %v7744_v1  ;;  %v7852_v1 = vld [vmem:[%s9480_s2 + $0x28] sm:$0xff] }
 0xa79   :  { %v2419_v26 = vmul.f32 1.442695, %v2392_v58  ;;  %v2425_v44 = vmul.f32 1.442695, %v2395_v41  ;;  %2441 = vadd.xlane.f32.xlu1 %v7765_v22  ;;  %v2397_v17 = vmul.f32 1.442695, %v2381_v51 }
 0xa7a   :  { %v2368_v52 = vpop.xlane.xlu0 %2367  ;;  %v2374_v60 = vpop.xlane.xlu1 %2373  ;;  %v2399_v58 = vmul.f32 1.442695, %v2382_v53 }
 0xa7b   :  { %6260 = vpow2.f32 %v2419_v26  ;;  %v2390_v54 = vsub.f32 %v7658_v6, %v2368_v52  ;;  %v2393_v15 = vsub.f32 %v7664_v49, %v2374_v60  ;;  %v7858_v52 = vld [vmem:[%s9480_s2 + $0x30] sm:$0xff] }
 0xa7c   :  { %6262 = vpow2.f32 %v2425_v44  ;;  %v7770_v34 = vpop.eup %6250 }
 0xa7d   :  { %v2415_v7 = vmul.f32 1.442695, %v2390_v54  ;;  %v2421_v29 = vmul.f32 1.442695, %v2393_v15  ;;  %2437 = vadd.xlane.f32.xlu1 %v7770_v34  ;;  %v7864_v15 = vld [vmem:[%s9480_s2 + $0x38] sm:$0xff] }
 0xa7e   :  { %v2380_v23 = vpop.xlane.xlu0 %2379 }
 0xa7f   :  { %6264 = vpow2.f32 %v2415_v7  ;;  %v2396_v13 = vsub.f32 %v7668_v39, %v2380_v23 }
 0xa80   :  { %v7774_v43 = vpop.eup %6252  ;;  %6266 = vpow2.f32 %v2421_v29 }
 0xa81   :  { %v7776_v16 = vpop.eup %6254  ;;  %v2427_v31 = vmul.f32 1.442695, %v2396_v13  ;;  %2443 = vadd.xlane.f32.xlu0 %v7774_v43 }
 0xa82   :  { %2449 = vadd.xlane.f32.xlu1 %v7776_v16  ;;  %v2376_v6 = vpop.xlane.xlu0 %2375 }
 0xa83   :  { %6268 = vpow2.f32 %v2427_v31  ;;  %v2394_v49 = vsub.f32 %v7671_v2, %v2376_v6 }
 0xa84   :  { %v7781_v5 = vpop.eup %6256 }
 0xa85   :  { %v7783_v62 = vpop.eup %6258  ;;  %v2423_v14 = vmul.f32 1.442695, %v2394_v49  ;;  %2439 = vadd.xlane.f32.xlu0 %v7781_v5 }
 0xa86   :  { %2445 = vadd.xlane.f32.xlu1 %v7783_v62 }
 0xa87   :  { %6270 = vpow2.f32 %v2423_v14 }
 0xa88   :  { %v7787_v39 = vpop.eup %6260  ;;  %6272 = vpow2.f32 %v2401_v47 }
 0xa89   :  { %v7789_v3 = vpop.eup %6262  ;;  %2451 = vadd.xlane.f32.xlu0 %v7787_v39  ;;  %6274 = vpow2.f32 %v2403_v9 }
 0xa8a   :  { %2457 = vadd.xlane.f32.xlu1 %v7789_v3  ;;  %6276 = vpow2.f32 %v2397_v17 }
 0xa8b   :  { %6278 = vpow2.f32 %v2399_v58 }
 0xa8c   :  { %v7793_v57 = vpop.eup %6264 }
 0xa8d   :  { %v7795_v2 = vpop.eup %6266  ;;  %2447 = vadd.xlane.f32.xlu0 %v7793_v57 }
 0xa8e   :  { %2453 = vadd.xlane.f32.xlu1 %v7795_v2 }
 0xa90   :  { %v7799_v28 = vpop.eup %6268 }
 0xa91   :  { %2459 = vadd.xlane.f32.xlu0 %v7799_v28 }
 0xa94   :  { %v7802_v11 = vpop.eup %6270 }
 0xa95   :  { %2455 = vadd.xlane.f32.xlu0 %v7802_v11  ;;  %v7831_v41 = vpop.eup %6272 }
 0xa96   :  { %v7834_v21 = vpop.eup %6274 }
 0xa97   :  { %v7836_v50 = vpop.eup %6276 }
 0xa98   :  { %v7840_v36 = vpop.eup %6278 }
 0xa9f   :  { %1765 = vperm.xlu1 %6028, %v7808_v38  }
 0xaa3   :  { %1769 = vperm.xlu1 %6028, %v7814_v18  }
 0xaab   :  { %1761 = vperm.xlu0 %6029, %v7820_v20  }
 0xac7   :  { %2433 = vadd.xlane.f32.xlu1 %v7831_v41 }
 0xaca   :  { %2435 = vadd.xlane.f32.xlu0 %v7834_v21 }
 0xacb   :  { %2429 = vadd.xlane.f32.xlu1 %v7836_v50 }
 0xacf   :  { %2431 = vadd.xlane.f32.xlu1 %v7840_v36 }
 0xada   :  { %v2027_v24 = vpop.xlane.xlu1 %2026 }
 0xade   :  { %v2029_v56 = vpop.xlane.xlu0 %2028 }
 0xadf   :  { %v2023_v0 = vpop.xlane.xlu1 %2022 }
 0xae0   :  { %1773 = vperm.xlu1 %6028, %v7846_v35   ;;  %1777 = vperm.xlu0 %6029, %v7852_v1   ;;  %6280 = vrcp.f32 %v2023_v0 }
 0xae1   :  { %6282 = vrcp.f32 %v2027_v24 }
 0xae2   :  { %v2025_v26 = vpop.xlane.xlu0 %2024 }
 0xae3   :  { %v2035_v44 = vpop.xlane.xlu1 %2034  ;;  %6284 = vrcp.f32 %v2025_v26 }
 0xae4   :  { %1781 = vperm.xlu1 %6028, %v7858_v52   ;;  %6286 = vrcp.f32 %v2029_v56 }
 0xae6   :  { %v2037_v60 = vpop.xlane.xlu0 %2036 }
 0xae7   :  { %v2031_v54 = vpop.xlane.xlu1 %2030 }
 0xae8   :  { %6288 = vrcp.f32 %v2031_v54  ;;  %1785 = vperm.xlu1 %6028, %v7864_v15  }
 0xae9   :  { %6290 = vrcp.f32 %v2035_v44 }
 0xaea   :  { %v2033_v7 = vpop.xlane.xlu0 %2032 }
 0xaeb   :  { %v2043_v29 = vpop.xlane.xlu1 %2042  ;;  %6292 = vrcp.f32 %v2033_v7 }
 0xaec   :  { %6294 = vrcp.f32 %v2037_v60 }
 0xaed   :  { %v6281_v23 = vpop.eup %6280 }
 0xaee   :  { %v2045_v13 = vpop.xlane.xlu0 %2044  ;;  %v6283_v31 = vpop.eup %6282  ;;  %v7868_v14 = vmul.f32 %v6281_v23, %v7701_v4 }
 0xaef   :  { %v2039_v6 = vpop.xlane.xlu1 %2038  ;;  %v7874_v51 = vmul.f32 %v6283_v31, %v7694_v30 }
 0xaf0   :  { %v6285_v49 = vpop.eup %6284  ;;  %6296 = vrcp.f32 %v2039_v6 }
 0xaf1   :  { %v7871_v59 = vmul.f32 %v6285_v49, %v7706_v42  ;;  %v6287_v48 = vpop.eup %6286  ;;  %6298 = vrcp.f32 %v2043_v29 }
 0xaf2   :  { %v2041_v47 = vpop.xlane.xlu0 %2040  ;;  %v7879_v53 = vmul.f32 %v6287_v48, %v7699_v45 }
 0xaf3   :  { %6300 = vrcp.f32 %v2041_v47  ;;  %v2102_v9 = vadd.f32 %v7871_v59, %v7868_v14 }
 0xaf4   :  { %6302 = vrcp.f32 %v2045_v13 }
 0xaf5   :  { %v6289_v17 = vpop.eup %6288  ;;  %v2103_v4 = vadd.f32 %v2102_v9, %v7874_v51 }
 0xaf6   :  { %v2051_v58 = vpop.xlane.xlu1 %2050  ;;  %v6291_v42 = vpop.eup %6290  ;;  %v7883_v56 = vmul.f32 %v6289_v17, %v7716_v32 }
 0xaf7   :  { %6304 = vrcp.f32 %v2051_v58  ;;  %v2053_v24 = vpop.xlane.xlu0 %2052  ;;  %v2104_v30 = vadd.f32 %v2103_v4, %v7879_v53  ;;  %v2092_v54 = vmul.f32 %v6291_v42, %v7708_v37 }
 0xaf8   :  { %v6293_v0 = vpop.eup %6292  ;;  %6306 = vrcp.f32 %v2053_v24 }
 0xaf9   :  { %v7887_v26 = vmul.f32 %v6293_v0, %v7723_v8  ;;  %v2105_v44 = vadd.f32 %v2104_v30, %v7883_v56  ;;  %v6295_v45 = vpop.eup %6294 }
 0xafa   :  { %v2047_v60 = vpop.xlane.xlu1 %2046  ;;  %v2093_v32 = vmul.f32 %v6295_v45, %v7714_v27 }
 0xafb   :  { %6308 = vrcp.f32 %v2047_v60  ;;  %v2106_v7 = vadd.f32 %v2105_v44, %v7887_v26 }
 0xafd   :  { %v6297_v29 = vpop.eup %6296  ;;  %v2107_v23 = vadd.f32 %v2106_v7, %v2092_v54 }
 0xafe   :  { %v2049_v13 = vpop.xlane.xlu0 %2048  ;;  %v6299_v31 = vpop.eup %6298  ;;  %v2094_v6 = vmul.f32 %v6297_v29, %v7734_v61 }
 0xaff   :  { %6310 = vrcp.f32 %v2049_v13  ;;  %v2108_v8 = vadd.f32 %v2107_v23, %v2093_v32  ;;  %v2096_v37 = vmul.f32 %v6299_v31, %v7725_v55 }
 0xb00   :  { %v6301_v49 = vpop.eup %6300 }
 0xb01   :  { %v2095_v48 = vmul.f32 %v6301_v49, %v7741_v25  ;;  %v2109_v47 = vadd.f32 %v2108_v8, %v2094_v6  ;;  %v6303_v9 = vpop.eup %6302 }
 0xb02   :  { %v7895_v17 = vpop.xlane.xlu1 %2441  ;;  %v2097_v24 = vmul.f32 %v6303_v9, %v7732_v33  ;;  %v1717_v33 = vpop.f32.mrf.mxu1 }
 0xb03   :  { %v2110_v4 = vadd.f32 %v2109_v47, %v2095_v48 }
 0xb04   :  { %v6305_v58 = vpop.eup %6304  ;;  %v2132_v49 = vpack.c.bf16 %v2097_v24, %v2096_v37 }
 0xb05   :  { %v6307_v42 = vpop.eup %6306  ;;  %v2100_v27 = vmul.f32 %v6305_v58, %v7747_v10  ;;  %v2111_v30 = vadd.f32 %v2110_v4, %v2096_v37  ;;  %v7905_v4 = vpop.f32.mrf.mxu1 }
 0xb06   :  { %v2101_v61 = vmul.f32 %v6307_v42, %v7749_v12  ;;  %v7901_v0 = vpop.xlane.xlu1 %2437 }
 0xb07   :  { %v2112_v44 = vadd.f32 %v2111_v30, %v2097_v24  ;;  %v1721_v42 = vpop.f32.mrf.mxu1  ;;  %v2131_v30 = vpack.c.bf16 %v2095_v48, %v2094_v6  ;;  %v2129_v24 = vpack.c.bf16 %v7887_v26, %v7883_v56  ;;  %v2127_v56 = vpack.c.bf16 %v7871_v59, %v7868_v14 }
 0xb08   :  { %v6309_v25 = vpop.eup %6308  ;;  %v2134_v45 = vpack.c.bf16 %v2101_v61, %v2100_v27 }
 0xb09   :  { %v2098_v60 = vmul.f32 %v6309_v25, %v7755_v46  ;;  %v7909_v25 = vpop.f32.mrf.mxu1 }
 0xb0a   :  { %5768 = vmatprep.subr.bf16.mxu1 %v2134_v45  ;;  %v2444_v7 = vpop.xlane.xlu0 %2443 }
 0xb0b   :  { %v2450_v55 = vpop.xlane.xlu1 %2449  ;;  %5769 = vmatpush3.bf16.msra.mxu1 %v2134_v45  ;;  %v2113_v29 = vadd.f32 %v2112_v44, %v2098_v60  ;;  %v2130_v45 = vpack.c.bf16 %v2093_v32, %v2092_v54  ;;  %v2128_v54 = vpack.c.bf16 %v7879_v53, %v7874_v51 }
 0xb0c   :  { %v6311_v23 = vpop.eup %6310 }
 0xb0d   :  { %v2099_v10 = vmul.f32 %v6311_v23, %v7760_v19 }
 0xb0e   :  { %v2440_v13 = vpop.xlane.xlu0 %2439 }
 0xb0f   :  { %v2446_v31 = vpop.xlane.xlu1 %2445  ;;  %v2133_v8 = vpack.c.bf16 %v2099_v10, %v2098_v60  ;;  %v2114_v12 = vadd.f32 %v2113_v29, %v2099_v10  ;;  %v1788_v29 = vadd.f32 %v7683_v40, %v1717_v33 }
 0xb11   :  { %5770 = vmatprep.subr.bf16.mxu1 %v2133_v8  ;;  %v2115_v47 = vadd.f32 %v2114_v12, %v2100_v27  ;;  %v1727_v27 = vpop.f32.mrf.mxu1 }
 0xb12   :  { %5771 = vmatpush3.bf16.msra.mxu1 %v2133_v8  ;;  %v2452_v9 = vpop.xlane.xlu0 %2451 }
 0xb13   :  { %v2458_v46 = vpop.xlane.xlu1 %2457  ;;  %5772 = vmatprep.subr.bf16.mxu1 %v2132_v49  ;;  %v7907_v58 = vadd.f32 %v2115_v47, %v2101_v61  ;;  %v7917_v32 = vpop.f32.mrf.mxu1 }
 0xb14   :  { %6312 = vrcp.f32 %v2458_v46 }
 0xb15   :  { %v1731_v60 = vpop.f32.mrf.mxu1 }
 0xb16   :  { %5773 = vmatpush3.bf16.msra.mxu1 %v2132_v49  ;;  %v2448_v19 = vpop.xlane.xlu0 %2447 }
 0xb17   :  { %5774 = vmatprep.subr.bf16.mxu1 %v2131_v30  ;;  %v2454_v44 = vpop.xlane.xlu1 %2453 }
 0xb1a   :  { %5775 = vmatpush3.bf16.msra.mxu1 %v2131_v30  ;;  %v2460_v37 = vpop.xlane.xlu0 %2459 }
 0xb1b   :  { %6314 = vrcp.f32 %v2460_v37  ;;  %5776 = vmatprep.subr.bf16.mxu1 %v2130_v45  ;;  %v7913_v6 = vpop.permute.xlu1 %1765 }
 0xb1c   :  { %6316 = vrcp.f32 %v2452_v9  ;;  %v1792_v10 = vadd.f32 %v7913_v6, %v1727_v27 }
 0xb1d   :  { %6318 = vrcp.f32 %v2454_v44 }
 0xb1e   :  { %6320 = vrcp.f32 %v2450_v55  ;;  %5777 = vmatpush3.bf16.msra.mxu1 %v2130_v45  ;;  %v2456_v48 = vpop.xlane.xlu0 %2455 }
 0xb1f   :  { %6322 = vrcp.f32 %v2456_v48  ;;  %5778 = vmatprep.subr.bf16.mxu1 %v2129_v24  ;;  %v7919_v61 = vpop.permute.xlu1 %1769 }
 0xb20   :  { %6324 = vrcp.f32 %v2448_v19  ;;  %v1794_v51 = vadd.f32 %v7919_v61, %v1731_v60 }
 0xb21   :  { %6326 = vrcp.f32 %v2446_v31  ;;  %v6313_v26 = vpop.eup %6312 }
 0xb22   :  { %5779 = vmatpush3.bf16.msra.mxu1 %v2129_v24  ;;  %6328 = vrcp.f32 %v2444_v7  ;;  %v7931_v59 = vmul.f32 %v6313_v26, %v7789_v3  ;;  %v2124_v8 = vpack.c.bf16 %v1794_v51, %v1792_v10 }
 0xb23   :  { %5780 = vmatprep.subr.bf16.mxu1 %v2128_v54  ;;  %6330 = vrcp.f32 %v7895_v17 }
 0xb24   :  { %6332 = vrcp.f32 %v2440_v13 }
 0xb25   :  { %6334 = vrcp.f32 %v7901_v0 }
 0xb26   :  { %5781 = vmatpush3.bf16.msra.mxu1 %v2128_v54  ;;  %v7923_v55 = vpop.permute.xlu0 %1761 }
 0xb27   :  { %v1790_v53 = vadd.f32 %v7923_v55, %v1721_v42  ;;  %5782 = vmatprep.subr.bf16.mxu1 %v2127_v56 }
 0xb28   :  { %v6315_v23 = vpop.eup %6314 }
 0xb29   :  { %v6317_v7 = vpop.eup %6316  ;;  %v2123_v14 = vpack.c.bf16 %v1790_v53, %v1788_v29  ;;  %v7934_v31 = vmul.f32 %v6315_v23, %v7799_v28 }
 0xb2a   :  { %v6319_v33 = vpop.eup %6318  ;;  %5783 = vmatpush3.bf16.msra.mxu1 %v2127_v56  ;;  %v7946_v28 = vmul.f32 %v6317_v7, %v7787_v39 }
 0xb2b   :  { %v6321_v17 = vpop.eup %6320  ;;  %5784 = vmatprep.mubr.bf16.mxu1 %v2123_v14  ;;  %v2541_v13 = vpack.c.bf16 %v7934_v31, %v7931_v59  ;;  %v7940_v49 = vmul.f32 %v6319_v33, %v7795_v2 }
 0xb2c   :  { %v6323_v12 = vpop.eup %6322  ;;  %v7951_v9 = vmul.f32 %v6321_v17, %v7776_v16 }
 0xb2d   :  { %5785 = vmatmul.mubr.bf16.vlgmr.msra.gmra.mxu1 %v2124_v8  ;;  %5810 = vmatprep.subr.bf16.mxu1 %v2541_v13  ;;  %v7943_v3 = vmul.f32 %v6323_v12, %v7802_v11  ;;  %v6325_v47 = vpop.eup %6324 }
 0xb2e   :  { %5811 = vmatpush3.bf16.msra.mxu1 %v2541_v13  ;;  %v6327_v46 = vpop.eup %6326  ;;  %v2539_v2 = vpack.c.bf16 %v7946_v28, %v7951_v9  ;;  %v7956_v42 = vmul.f32 %v6325_v47, %v7793_v57 }
 0xb2f   :  { %v2540_v0 = vpack.c.bf16 %v7943_v3, %v7940_v49  ;;  %v6329_v11 = vpop.eup %6328  ;;  %v7959_v39 = vmul.f32 %v6327_v46, %v7783_v62 }
 0xb30   :  { %v6331_v30 = vpop.eup %6330  ;;  %v7964_v44 = vmul.f32 %v6329_v11, %v7774_v43 }
 0xb31   :  { %5812 = vmatprep.subr.bf16.mxu1 %v2540_v0  ;;  %v6333_v19 = vpop.eup %6332  ;;  %v2538_v16 = vpack.c.bf16 %v7956_v42, %v7959_v39  ;;  %v7967_v45 = vmul.f32 %v6331_v30, %v7765_v22  ;;  %v1733_v22 = vpop.f32.mrf.mxu1 }
 0xb32   :  { %5813 = vmatpush3.bf16.msra.mxu1 %v2540_v0  ;;  %v6335_v57 = vpop.eup %6334  ;;  %v7972_v62 = vmul.f32 %v6333_v19, %v7781_v5  ;;  %v1791_v0 = vadd.f32 %v7923_v55, %v7909_v25  ;;  %v1795_v55 = vadd.f32 %v7919_v61, %v1733_v22 }
 0xb33   :  { %5814 = vmatprep.subr.bf16.mxu1 %v2539_v2  ;;  %v2537_v37 = vpack.c.bf16 %v7964_v44, %v7967_v45  ;;  %v7975_v27 = vmul.f32 %v6335_v57, %v7770_v34  ;;  %v1737_v24 = vpop.f32.mrf.mxu1  ;;  %v1789_v57 = vadd.f32 %v7683_v40, %v7905_v4  ;;  %v1793_v40 = vadd.f32 %v7913_v6, %v7917_v32 }
 0xb35   :  { %v2536_v43 = vpack.c.bf16 %v7972_v62, %v7975_v27  ;;  %v1739_v54 = vpop.f32.mrf.mxu1 }
 0xb36   :  { %5815 = vmatpush3.bf16.msra.mxu1 %v2539_v2 }
 0xb37   :  { %5816 = vmatprep.subr.bf16.mxu1 %v2538_v16  ;;  %v1741_v5 = vpop.f32.mrf.mxu1 }
 0xb39   :  { %v1743_v29 = vpop.f32.mrf.mxu1 }
 0xb3a   :  { %5817 = vmatpush3.bf16.msra.mxu1 %v2538_v16 }
 0xb3b   :  { %5818 = vmatprep.subr.bf16.mxu1 %v2537_v37  ;;  %v1747_v51 = vpop.f32.mrf.mxu1 }
 0xb3d   :  { %v1749_v33 = vpop.f32.mrf.mxu1 }
 0xb3e   :  { %5819 = vmatpush3.bf16.msra.mxu1 %v2537_v37 }
 0xb3f   :  { %5820 = vmatprep.subr.bf16.mxu1 %v2536_v43  ;;  %v1751_v46 = vpop.f32.mrf.mxu1 }
 0xb42   :  { %5821 = vmatpush3.bf16.msra.mxu1 %v2536_v43  ;;  %v2530_v43 = vpack.c.bf16 %v1791_v0, %v1789_v57 }
 0xb50   :  { %v2434_v48 = vpop.xlane.xlu1 %2433 }
 0xb51   :  { %6336 = vrcp.f32 %v2434_v48 }
 0xb53   :  { %v2436_v56 = vpop.xlane.xlu0 %2435 }
 0xb54   :  { %v2430_v26 = vpop.xlane.xlu1 %2429  ;;  %6338 = vrcp.f32 %v2436_v56 }
 0xb55   :  { %6340 = vrcp.f32 %v2430_v26 }
 0xb58   :  { %v2432_v60 = vpop.xlane.xlu1 %2431 }
 0xb59   :  { %6342 = vrcp.f32 %v2432_v60 }
 0xb5b   :  { %v1778_v34 = vpop.permute.xlu0 %1777 }
 0xb5c   :  { %v1774_v53 = vpop.permute.xlu1 %1773  ;;  %v1798_v23 = vadd.f32 %v1778_v34, %v1741_v5  ;;  %v1799_v26 = vadd.f32 %v1778_v34, %v1743_v29  ;;  %v2531_v5 = vpack.c.bf16 %v1795_v55, %v1793_v40  ;;  %v6698_v29 = vmov 5   ;;  %v8029_v40 = vld [vmem:[%s9483_s5 + $0x68] sm:$0xff] }
 0xb5d   :  { %v1796_v7 = vadd.f32 %v1774_v53, %v1737_v24  ;;  %v1797_v56 = vadd.f32 %v1774_v53, %v1739_v54  ;;  %6030 = vset.pattern.permute.xlu1 %v6698_v29  ;;  %6031 = vset.pattern.permute.xlu0 %v6698_v29  ;;  %v8053_v29 = vld [vmem:[%s9483_s5 + $0x58] sm:$0xff] }
 0xb5e   :  { %v6337_v10 = vpop.eup %6336  ;;  %2676 = vperm.xlu1 %6030, %v7858_v52   ;;  %2680 = vperm.xlu0 %6031, %v7864_v15  }
 0xb5f   :  { %v2125_v14 = vpack.c.bf16 %v1798_v23, %v1796_v7  ;;  %v2495_v13 = vmul.f32 %v6337_v10, %v7831_v41 }
 0xb60   :  { %v1782_v17 = vpop.permute.xlu1 %1781 }
 0xb61   :  { %v6339_v8 = vpop.eup %6338  ;;  %5788 = vmatprep.mubr.bf16.mxu1 %v2125_v14  ;;  %v1800_v30 = vadd.f32 %v1782_v17, %v1747_v51  ;;  %v1801_v51 = vadd.f32 %v1782_v17, %v1749_v33 }
 0xb62   :  { %v2496_v12 = vmul.f32 %v6339_v8, %v7834_v21  ;;  %v6341_v47 = vpop.eup %6340  ;;  %2668 = vperm.xlu1 %6030, %v7846_v35   ;;  %2660 = vperm.xlu0 %6031, %v7808_v38  }
 0xb63   :  { %v2493_v41 = vmul.f32 %v6341_v47, %v7836_v50  ;;  %v2532_v50 = vpack.c.bf16 %v1799_v26, %v1797_v56 }
 0xb64   :  { %v1786_v2 = vpop.permute.xlu1 %1785  ;;  %v2535_v11 = vpack.c.bf16 %v2496_v12, %v2495_v13 }
 0xb65   :  { %v1802_v19 = vadd.f32 %v1786_v2, %v1751_v46 }
 0xb66   :  { %v6343_v16 = vpop.eup %6342  ;;  %5822 = vmatprep.subr.bf16.mxu1 %v2535_v11  ;;  %2672 = vperm.xlu1 %6030, %v7852_v1  }
 0xb67   :  { %5823 = vmatpush3.bf16.msra.mxu1 %v2535_v11  ;;  %v2126_v37 = vpack.c.bf16 %v1802_v19, %v1800_v30  ;;  %v2494_v21 = vmul.f32 %v6343_v16, %v7840_v36  ;;  %v1753_v36 = vpop.f32.mrf.mxu1 }
 0xb68   :  { %v1803_v60 = vadd.f32 %v1786_v2, %v1753_v36 }
 0xb69   :  { %5789 = vmatmul.mubr.bf16.gmra.mxu1 %v2126_v37  ;;  %v2509_v24 = vadd.f32 %v2494_v21, %v2493_v41  ;;  %v2534_v25 = vpack.c.bf16 %v2494_v21, %v2493_v41 }
 0xb6a   :  { %5826 = vmatprep.mubr.bf16.mxu1 %v2530_v43  ;;  %v2533_v23 = vpack.c.bf16 %v1803_v60, %v1801_v51  ;;  %2664 = vperm.xlu1 %6030, %v7814_v18   ;;  %v8041_v60 = vld [vmem:[%s9483_s5 + $0x60] sm:$0xff] }
 0xb6b   :  { %v2510_v48 = vadd.f32 %v2509_v24, %v2495_v13  ;;  %5824 = vmatprep.subr.bf16.mxu1 %v2534_v25 }
 0xb6c   :  { %5825 = vmatpush3.bf16.msra.mxu1 %v2534_v25  ;;  %v8023_v25 = vld [vmem:[%s9483_s5 + $0x70] sm:$0xff] }
 0xb6d   :  { %v2511_v4 = vadd.f32 %v2510_v48, %v2496_v12 }
 0xb6e   :  { %2656 = vperm.xlu1 %6030, %v7820_v20  }
 0xb6f   :  { %v2512_v61 = vadd.f32 %v2511_v4, %v7975_v27 }
 0xb71   :  { %5827 = vmatmul.mubr.bf16.vlgmr.msra.gmra.mxu1 %v2531_v5  ;;  %v2513_v22 = vadd.f32 %v2512_v61, %v7972_v62  ;;  %v8035_v5 = vld [vmem:[%s9483_s5 + $0x78] sm:$0xff] }
 0xb72   :  { %5830 = vmatprep.mubr.bf16.mxu1 %v2532_v50 }
 0xb73   :  { %v2514_v54 = vadd.f32 %v2513_v22, %v7967_v45  ;;  %v8005_v45 = vld [vmem:[%s9480_s2] sm:$0xff]  ;;  %v8047_v22 = vld [vmem:[%s9483_s5 + $0x48] sm:$0xff] }
 0xb74   :  { %2652 = vperm.xlu0 %6031, %v8005_v45  }
 0xb75   :  { %v2515_v6 = vadd.f32 %v2514_v54, %v7964_v44 }
 0xb77   :  { %v2516_v32 = vadd.f32 %v2515_v6, %v7959_v39  ;;  %v2117_v39 = vrot.slane %v7907_v58, 4 }
 0xb79   :  { %5831 = vmatmul.mubr.bf16.gmra.mxu1 %v2533_v23  ;;  %v2517_v27 = vadd.f32 %v2516_v32, %v7956_v42  ;;  %v2118_v62 = vadd.f32 %v2117_v39, %v7907_v58 }
 0xb7a   :  { %2927 = vmatprep.mubr.bf16.mxu1 %v9571_v63 }
 0xb7b   :  { %v2518_v52 = vadd.f32 %v2517_v27, %v7951_v9  ;;  %v2119_v34 = vrot.slane %v2118_v62, 2 }
 0xb7d   :  { %v2519_v15 = vadd.f32 %v2518_v52, %v7946_v28  ;;  %v2120_v28 = vadd.f32 %v2119_v34, %v2118_v62  ;;  %v8071_v62 = vld [vmem:[%s9483_s5 + $0x40] sm:$0xff]  ;;  %v8077_v34 = vld [vmem:[%s9483_s5 + $0x28] sm:$0xff] }
 0xb7f   :  { %v2520_v38 = vadd.f32 %v2519_v15, %v7940_v49  ;;  %v2121_v49 = vrot.slane %v2120_v28, 1  ;;  %v8059_v15 = vld [vmem:[%s9483_s5 + $0x50] sm:$0xff] }
 0xb81   :  { %v2521_v35 = vadd.f32 %v2520_v38, %v7943_v3  ;;  %v2122_v14 = vadd.f32 %v2121_v49, %v2120_v28 }
 0xb83   :  { %v2522_v1 = vadd.f32 %v2521_v35, %v7931_v59  ;;  %v8065_v35 = vld [vmem:[%s9483_s5 + $0x38] sm:$0xff] }
 0xb85   :  { %v2523_v42 = vadd.f32 %v2522_v1, %v7934_v31  ;;  %v2200_v31 = vadd.f32 1e-09, %v2122_v14 }
 0xb87   :  { %v2524_v44 = vrot.slane %v2523_v42, 4  ;;  %6344 = vrcp.f32 %v2200_v31  ;;  %v6641_v31 = vld [vmem:[%s9483_s5 + $0x20] sm:$0xff] }
 0xb89   :  { %v2525_v9 = vadd.f32 %v2524_v44, %v2523_v42 }
 0xb8b   :  { %v2526_v18 = vrot.slane %v2525_v9, 2 }
 0xb8d   :  { %v2527_v7 = vadd.f32 %v2526_v18, %v2525_v9 }
 0xb8f   :  { %v2528_v10 = vrot.slane %v2527_v7, 1 }
 0xb91   :  { %v2529_v59 = vadd.f32 %v2528_v10, %v2527_v7 }
 0xb93   :  { %v2607_v8 = vadd.f32 1e-09, %v2529_v59 }
 0xb94   :  { %v6345_v30 = vpop.eup %6344 }
 0xb95   :  { %6346 = vrcp.f32 %v2607_v8 }
 0xba2   :  { %v6347_v19 = vpop.eup %6346 }
 0xbed   :  { %v5786_v53 = vpop.f32.mrf.mxu1 }
 0xbee   :  { %v2205_v44 = vmul.f32 %v6345_v30, %v5786_v53  ;;  %v8083_v53 = vld [vmem:[%s9483_s5 + $0x30] sm:$0xff] }
 0xbef   :  { %v8018_v20 = vpop.f32.mrf.mxu1 }
 0xbf0   :  { %v2203_v8 = vmul.f32 %v6345_v30, %v8018_v20 }
 0xbf1   :  { %v5787_v3 = vpop.f32.mrf.mxu1 }
 0xbf2   :  { %v2206_v27 = vmul.f32 %v6345_v30, %v5787_v3  ;;  %v6640_v3 = vld [vmem:[%s9483_s5 + $0x18] sm:$0xff] }
 0xbf3   :  { %v2172_v33 = vpop.f32.mrf.mxu1 }
 0xbf4   :  { %v2633_v7 = vsub.f32 %v8083_v53, %v2206_v27  ;;  %v2204_v49 = vmul.f32 %v6345_v30, %v2172_v33 }
 0xc29   :  { %v5790_v17 = vpop.f32.mrf.mxu1 }
 0xc2a   :  { %v2209_v41 = vmul.f32 %v6345_v30, %v5790_v17  ;;  %v2631_v17 = vsub.f32 %v6641_v31, %v2205_v44 }
 0xc2b   :  { %v2185_v13 = vpop.f32.mrf.mxu1 }
 0xc2c   :  { %v2639_v51 = vsub.f32 %v8041_v60, %v2209_v41  ;;  %v2207_v23 = vmul.f32 %v6345_v30, %v2185_v13  ;;  %v6642_v13 = vld [vmem:[%s9483_s5 + $0x8] sm:$0xff]  ;;  %v8123_v41 = vpop.permute.xlu0 %2680 }
 0xc2d   :  { %v5791_v58 = vpop.f32.mrf.mxu1 }
 0xc2e   :  { %v2210_v16 = vmul.f32 %v6345_v30, %v5791_v58  ;;  %v2635_v9 = vsub.f32 %v8071_v62, %v2207_v23  ;;  %v2645_v58 = vpack.c.bf16 %v2633_v7, %v2631_v17 }
 0xc2f   :  { %v2188_v12 = vpop.f32.mrf.mxu1 }
 0xc30   :  { %v2641_v55 = vsub.f32 %v8023_v25, %v2210_v16  ;;  %v2208_v48 = vmul.f32 %v6345_v30, %v2188_v12  ;;  %v6643_v12 = vld [vmem:[%s9483_s5 + $0x10] sm:$0xff]  ;;  %v6063_v30 = vld [vmem:[%s9482_s4 + $0x28] sm:$0xff]   ;;  %v6065_v16 = vld [vmem:[%s9482_s4 + $0x38] sm:$0xff]  }
 0xc31   :  { %v5828_v47 = vpop.f32.mrf.mxu1 }
 0xc32   :  { %v2612_v61 = vmul.f32 %v6347_v19, %v5828_v47  ;;  %v2649_v52 = vpack.c.bf16 %v2641_v55, %v2639_v51  ;;  %v2637_v38 = vsub.f32 %v8059_v15, %v2208_v48  ;;  %v2629_v47 = vsub.f32 %v6643_v12, %v2204_v49 }
 0xc33   :  { %v2576_v0 = vpop.f32.mrf.mxu1 }
 0xc34   :  { %v2632_v18 = vsub.f32 %v8077_v34, %v2612_v61  ;;  %v2610_v28 = vmul.f32 %v6347_v19, %v2576_v0  ;;  %v2647_v10 = vpack.c.bf16 %v2637_v38, %v2635_v9 }
 0xc35   :  { %v5829_v46 = vpop.f32.mrf.mxu1 }
 0xc36   :  { %v2613_v26 = vmul.f32 %v6347_v19, %v5829_v46  ;;  %v2628_v33 = vsub.f32 %v6642_v13, %v2610_v28  ;;  %v6644_v46 = vld [vmem:[%s9483_s5] sm:$0xff] }
 0xc37   :  { %v2579_v2 = vpop.f32.mrf.mxu1 }
 0xc38   :  { %v2634_v1 = vsub.f32 %v8065_v35, %v2613_v26  ;;  %v2611_v42 = vmul.f32 %v6347_v19, %v2579_v2  ;;  %v2627_v2 = vsub.f32 %v6644_v46, %v2203_v8 }
 0xc39   :  { %v5832_v11 = vpop.f32.mrf.mxu1 }
 0xc3a   :  { %v2616_v37 = vmul.f32 %v6347_v19, %v5832_v11  ;;  %v2630_v14 = vsub.f32 %v6640_v3, %v2611_v42  ;;  %v2646_v59 = vpack.c.bf16 %v2634_v1, %v2632_v18  ;;  %v2643_v20 = vpack.c.bf16 %v2629_v47, %v2627_v2  ;;  %v6062_v11 = vld [vmem:[%s9482_s4 + $0x20] sm:$0xff]  }
 0xc3b   :  { %v2592_v57 = vpop.f32.mrf.mxu1 }
 0xc3c   :  { %v2614_v43 = vmul.f32 %v6347_v19, %v2592_v57  ;;  %v2640_v4 = vsub.f32 %v8029_v40, %v2616_v37  ;;  %v2644_v0 = vpack.c.bf16 %v2630_v14, %v2628_v33  ;;  %v8121_v57 = vpop.permute.xlu1 %2676 }
 0xc3d   :  { %v5833_v21 = vpop.f32.mrf.mxu1 }
 0xc3e   :  { %v2617_v24 = vmul.f32 %v6347_v19, %v5833_v21  ;;  %v2636_v54 = vsub.f32 %v8047_v22, %v2614_v43  ;;  %v2661_v43 = vpop.permute.xlu0 %2660 }
 0xc3f   :  { %v2595_v56 = vpop.f32.mrf.mxu1 }
 0xc40   :  { %v2642_v50 = vsub.f32 %v8035_v5, %v2617_v24  ;;  %v2615_v36 = vmul.f32 %v6347_v19, %v2595_v56  ;;  %v6064_v19 = vld [vmem:[%s9482_s4 + $0x30] sm:$0xff]   ;;  %v2669_v37 = vpop.permute.xlu1 %2668 }
 0xc42   :  { %v2638_v6 = vsub.f32 %v8053_v29, %v2615_v36  ;;  %v2650_v32 = vpack.c.bf16 %v2642_v50, %v2640_v4  ;;  %v2653_v55 = vpop.permute.xlu0 %2652 }
 0xc44   :  { %2723 = vmatprep.subr.bf16.mxu0 %v2650_v32  ;;  %v2648_v39 = vpack.c.bf16 %v2638_v6, %v2636_v54  ;;  %v2673_v21 = vpop.permute.xlu1 %2672 }
 0xc45   :  { %2724 = vmatpush1.bf16.msra.mxu0 %v2649_v52 }
 0xc46   :  { %2725 = vmatprep.subr.bf16.mxu0 %v2648_v39 }
 0xc48   :  { %v2665_v24 = vpop.permute.xlu1 %2664 }
 0xc49   :  { %2726 = vmatpush1.bf16.msra.mxu0 %v2647_v10 }
 0xc4a   :  { %2727 = vmatprep.subr.bf16.mxu0 %v2646_v59 }
 0xc4c   :  { %v2657_v4 = vpop.permute.xlu1 %2656 }
 0xc4d   :  { %2728 = vmatpush1.bf16.msra.mxu0 %v2645_v58 }
 0xc4e   :  { %2729 = vmatprep.subr.bf16.mxu0 %v2644_v0 }
 0xc51   :  { %2730 = vmatpush1.bf16.msra.mxu0 %v2643_v20 }
 0xc54   :  { %5390 = vmatmul.mubr.msk.bf16.vlgmr.msra.gmra.mxu0 %vm121_vm0, %v6062_v11 }
 0xc55   :  { %2757 = vmatprep.mubr.bf16.mxu0 %v9571_v63 }
 0xc5c   :  { %5391 = vmatmul.mubr.msk.bf16.gmra.mxu0 %vm121_vm0, %v6063_v30 }
 0xc5d   :  { %2767 = vmatprep.mubr.bf16.mxu0 %v9571_v63 }
 0xc64   :  { %5392 = vmatmul.mubr.msk.bf16.gmra.mxu0 %vm121_vm0, %v6064_v19 }
 0xc65   :  { %2777 = vmatprep.mubr.bf16.mxu0 %v9571_v63 }
 0xc6c   :  { %5393 = vmatmul.mubr.msk.bf16.gmra.mxu0 %vm121_vm0, %v6065_v16 }
 0xd14   :  { %v2749_v48 = vpop.f32.mrf.mxu0 }
 0xd15   :  { %v2750_v56 = vadd.f32 %v2749_v48, %v2653_v55 }
 0xd16   :  { %v2751_v26 = vpop.f32.mrf.mxu0 }
 0xd17   :  { %v2788_v50 = vmax.f32 %v2750_v56, 0.0  ;;  %v2752_v36 = vadd.f32 %v2751_v26, %v2653_v55 }
 0xd18   :  { %v2753_v51 = vpop.f32.mrf.mxu0 }
 0xd19   :  { %v8125_v23 = vadd.f32 %v6644_v46, %v2788_v50  ;;  %v2789_v61 = vmax.f32 %v2752_v36, 0.0  ;;  %v2754_v54 = vadd.f32 %v2753_v51, %v2657_v4 }
 0xd1a   :  { %v2755_v6 = vpop.f32.mrf.mxu0 }
 0xd1b   :  { %2820 = vst [vmem:[%s9483_s5 + $0x80] sm:$0xff] %v8125_v23  ;;  %v8131_v32 = vadd.f32 %v6642_v13, %v2789_v61  ;;  %v2790_v27 = vmax.f32 %v2754_v54, 0.0  ;;  %v2756_v52 = vadd.f32 %v2755_v6, %v2657_v4 }
 0xd1c   :  { %v2759_v38 = vpop.f32.mrf.mxu0 }
 0xd1d   :  { %2821 = vst [vmem:[%s9483_s5 + $0x88] sm:$0xff] %v8131_v32  ;;  %v8137_v1 = vadd.f32 %v6643_v12, %v2790_v27  ;;  %v2791_v42 = vmax.f32 %v2756_v52, 0.0  ;;  %v2760_v39 = vadd.f32 %v2759_v38, %v2661_v43  ;;  %v6066_v52 = vld [vmem:[%s9481_s3 + $0x50] sm:$0xff]  }
 0xd1e   :  { %v2761_v44 = vpop.f32.mrf.mxu0 }
 0xd1f   :  { %2822 = vst [vmem:[%s9483_s5 + $0x90] sm:$0xff] %v8137_v1  ;;  %v8143_v9 = vadd.f32 %v6640_v3, %v2791_v42  ;;  %v2792_v18 = vmax.f32 %v2760_v39, 0.0  ;;  %v2762_v28 = vadd.f32 %v2761_v44, %v2661_v43  ;;  %v2836_v27 = vpack.c.bf16 %v8137_v1, %v8125_v23 }
 0xd20   :  { %v2763_v7 = vpop.f32.mrf.mxu0 }
 0xd21   :  { %2823 = vst [vmem:[%s9483_s5 + $0x98] sm:$0xff] %v8143_v9  ;;  %v8149_v49 = vadd.f32 %v6641_v31, %v2792_v18  ;;  %v2793_v10 = vmax.f32 %v2762_v28, 0.0  ;;  %v2764_v14 = vadd.f32 %v2763_v7, %v2665_v24  ;;  %v2837_v6 = vpack.c.bf16 %v8143_v9, %v8131_v32 }
 0xd22   :  { %v2765_v59 = vpop.f32.mrf.mxu0 }
 0xd23   :  { %2824 = vst [vmem:[%s9483_s5 + $0xa0] sm:$0xff] %v8149_v49  ;;  %v2809_v3 = vadd.f32 %v8077_v34, %v2793_v10  ;;  %v2794_v17 = vmax.f32 %v2764_v14, 0.0  ;;  %v2766_v8 = vadd.f32 %v2765_v59, %v2665_v24 }
 0xd24   :  { %v2769_v13 = vpop.f32.mrf.mxu0 }
 0xd25   :  { %2825 = vst [vmem:[%s9483_s5 + $0xa8] sm:$0xff] %v2809_v3  ;;  %v8160_v31 = vadd.f32 %v8083_v53, %v2794_v17  ;;  %v2795_v33 = vmax.f32 %v2766_v8, 0.0  ;;  %v2770_v58 = vadd.f32 %v2769_v13, %v2669_v37 }
 0xd26   :  { %v2771_v12 = vpop.f32.mrf.mxu0 }
 0xd27   :  { %2826 = vst [vmem:[%s9483_s5 + $0xb0] sm:$0xff] %v8160_v31  ;;  %v2811_v34 = vadd.f32 %v8065_v35, %v2795_v33  ;;  %v2796_v47 = vmax.f32 %v2770_v58, 0.0  ;;  %v2772_v0 = vadd.f32 %v2771_v12, %v2669_v37 }
 0xd28   :  { %v2773_v46 = vpop.f32.mrf.mxu0 }
 0xd29   :  { %2827 = vst [vmem:[%s9483_s5 + $0xb8] sm:$0xff] %v2811_v34  ;;  %v8171_v53 = vadd.f32 %v8071_v62, %v2796_v47  ;;  %v2797_v2 = vmax.f32 %v2772_v0, 0.0  ;;  %v2774_v20 = vadd.f32 %v2773_v46, %v2673_v21  ;;  %v2839_v54 = vpack.c.bf16 %v2811_v34, %v2809_v3 }
 0xd2a   :  { %v2775_v11 = vpop.f32.mrf.mxu0 }
 0xd2b   :  { %2828 = vst [vmem:[%s9483_s5 + $0xc0] sm:$0xff] %v8171_v53  ;;  %v2813_v35 = vadd.f32 %v8047_v22, %v2797_v2  ;;  %v2798_v30 = vmax.f32 %v2774_v20, 0.0  ;;  %v2776_v19 = vadd.f32 %v2775_v11, %v2673_v21 }
 0xd2c   :  { %v2779_v16 = vpop.f32.mrf.mxu0 }
 0xd2d   :  { %2829 = vst [vmem:[%s9483_s5 + $0xc8] sm:$0xff] %v2813_v35  ;;  %v8182_v62 = vadd.f32 %v8059_v15, %v2798_v30  ;;  %v2799_v37 = vmax.f32 %v2776_v19, 0.0  ;;  %v2780_v43 = vadd.f32 %v2779_v16, %v8121_v57  ;;  %v6067_v30 = vld [vmem:[%s9481_s3 + $0x58] sm:$0xff]   ;;  %v6068_v16 = vld [vmem:[%s9481_s3 + $0x60] sm:$0xff]  }
 0xd2e   :  { %v2781_v24 = vpop.f32.mrf.mxu0 }
 0xd2f   :  { %2830 = vst [vmem:[%s9483_s5 + $0xd0] sm:$0xff] %v8182_v62  ;;  %v2815_v22 = vadd.f32 %v8053_v29, %v2799_v37  ;;  %v2800_v21 = vmax.f32 %v2780_v43, 0.0  ;;  %v2782_v55 = vadd.f32 %v2781_v24, %v8121_v57  ;;  %v6069_v37 = vld [vmem:[%s9481_s3 + $0x68] sm:$0xff]   ;;  %v6070_v43 = vld [vmem:[%s9481_s3 + $0x70] sm:$0xff]   ;;  %v6699_v24 = vmov 6  }
 0xd30   :  { %v2783_v48 = vpop.f32.mrf.mxu0  ;;  %6032 = vset.pattern.permute.xlu1 %v6699_v24 }
 0xd31   :  { %2831 = vst [vmem:[%s9483_s5 + $0xd8] sm:$0xff] %v2815_v22  ;;  %v8195_v15 = vadd.f32 %v8041_v60, %v2800_v21  ;;  %v2801_v56 = vmax.f32 %v2782_v55, 0.0  ;;  %v2784_v26 = vadd.f32 %v2783_v48, %v8123_v41  ;;  %v2841_v61 = vpack.c.bf16 %v2815_v22, %v2813_v35 }
 0xd32   :  { %v2785_v4 = vpop.f32.mrf.mxu0 }
 0xd33   :  { %2832 = vst [vmem:[%s9483_s5 + $0xe0] sm:$0xff] %v8195_v15  ;;  %v2817_v29 = vadd.f32 %v8029_v40, %v2801_v56  ;;  %v2802_v57 = vmax.f32 %v2784_v26, 0.0  ;;  %v2786_v50 = vadd.f32 %v2785_v4, %v8123_v41 }
 0xd35   :  { %2833 = vst [vmem:[%s9483_s5 + $0xe8] sm:$0xff] %v2817_v29  ;;  %v8208_v60 = vadd.f32 %v8023_v25, %v2802_v57  ;;  %v2803_v36 = vmax.f32 %v2786_v50, 0.0  ;;  %v2840_v25 = vpack.c.bf16 %v8182_v62, %v8171_v53 }
 0xd37   :  { %2834 = vst [vmem:[%s9483_s5 + $0xf0] sm:$0xff] %v8208_v60  ;;  %v2819_v51 = vadd.f32 %v8035_v5, %v2803_v36  ;;  %v2842_v41 = vpack.c.bf16 %v8208_v60, %v8195_v15  ;;  %v2838_v5 = vpack.c.bf16 %v8160_v31, %v8149_v49 }
 0xd39   :  { %2835 = vst [vmem:[%s9483_s5 + $0xf8] sm:$0xff] %v2819_v51  ;;  %v2843_v40 = vpack.c.bf16 %v2819_v51, %v2817_v29 }
 0xd3b   :  { %2903 = vmatprep.subr.bf16.mxu1 %v2843_v40 }
 0xd3c   :  { %2904 = vmatpush1.bf16.msra.mxu1 %v2842_v41 }
 0xd3d   :  { %2905 = vmatprep.subr.bf16.mxu1 %v2841_v61 }
 0xd40   :  { %2906 = vmatpush1.bf16.msra.mxu1 %v2840_v25 }
 0xd41   :  { %2907 = vmatprep.subr.bf16.mxu1 %v2839_v54 }
 0xd44   :  { %2908 = vmatpush1.bf16.msra.mxu1 %v2838_v5 }
 0xd45   :  { %2909 = vmatprep.subr.bf16.mxu1 %v2837_v6 }
 0xd48   :  { %2910 = vmatpush1.bf16.msra.mxu1 %v2836_v27 }
 0xd4b   :  { %5409 = vmatmul.mubr.msk.bf16.vlgmr.msra.gmra.mxu1 %vm121_vm0, %v6066_v52 }
 0xd4c   :  { %2937 = vmatprep.mubr.bf16.mxu1 %v9571_v63 }
 0xd53   :  { %5410 = vmatmul.mubr.msk.bf16.gmra.mxu1 %vm121_vm0, %v6067_v30 }
 0xd54   :  { %2947 = vmatprep.mubr.bf16.mxu1 %v9571_v63 }
 0xd5b   :  { %5411 = vmatmul.mubr.msk.bf16.gmra.mxu1 %vm121_vm0, %v6068_v16 }
 0xd5c   :  { %2957 = vmatprep.mubr.bf16.mxu1 %v9571_v63 }
 0xd63   :  { %5412 = vmatmul.mubr.msk.bf16.gmra.mxu1 %vm121_vm0, %v6069_v37 }
 0xd64   :  { %2967 = vmatprep.mubr.bf16.mxu1 %v9571_v63 }
 0xd6b   :  { %5413 = vmatmul.mubr.msk.bf16.gmra.mxu1 %vm121_vm0, %v6070_v43 }
 0xe0b   :  { %v2929_v38 = vpop.f32.mrf.mxu1 }
 0xe0d   :  { %v8233_v42 = vpop.f32.mrf.mxu1 }
 0xe0f   :  { %v2933_v39 = vpop.f32.mrf.mxu1 }
 0xe10   :  { %v3026_v44 = vpack.c.bf16 %v2933_v39, %v2929_v38 }
 0xe12   :  { %3027 = vxpose.xlu0.c.b16.start.end [1/1] (short) %v3026_v44, 128  ;;  %5834 = vmatprep.subr.bf16.mxu0 %v3026_v44 }
 0xe13   :  { %5835 = vmatpush3.bf16.msra.mxu0 %v3026_v44 }
 0xe1b   :  { %6033 = vset.pattern.permute.xlu0 %v6699_v24 }
 0xe74   :  { %v3035_v32 = vpop.trf.xlu0 }
 0xe75   :  { %5836 = vmatprep.mubr.msk.bf16.mxu0 %vm599_vm1, %v3035_v32 }
 0xe78   :  { %v3036_v9 = vpop.trf.xlu0 }
 0xe79   :  { %5837 = vmatmul.mubr.msk.bf16.vlgmr.msra.gmra.mxu0 %vm599_vm1, %v3036_v9 }
 0xe7c   :  { %v3037_v18 = vpop.trf.xlu0 }
 0xe7d   :  { %5840 = vmatprep.mubr.msk.bf16.mxu0 %vm599_vm1, %v3037_v18 }
 0xe80   :  { %v3038_v28 = vpop.trf.xlu0 }
 0xe81   :  { %5841 = vmatmul.mubr.msk.bf16.gmra.mxu0 %vm599_vm1, %v3038_v28 }
 0xe84   :  { %v3039_v7 = vpop.trf.xlu0 }
 0xe85   :  { %5844 = vmatprep.mubr.msk.bf16.mxu0 %vm599_vm1, %v3039_v7 }
 0xe88   :  { %v3040_v10 = vpop.trf.xlu0 }
 0xe89   :  { %5845 = vmatmul.mubr.msk.bf16.gmra.mxu0 %vm599_vm1, %v3040_v10 }
 0xe8c   :  { %v3041_v14 = vpop.trf.xlu0 }
 0xe8d   :  { %5848 = vmatprep.mubr.msk.bf16.mxu0 %vm599_vm1, %v3041_v14 }
 0xe90   :  { %v3042_v59 = vpop.trf.xlu0 }
 0xe91   :  { %5849 = vmatmul.mubr.msk.bf16.gmra.mxu0 %vm599_vm1, %v3042_v59 }
 0xf39   :  { %v8243_v3 = vpop.f32.mrf.mxu0 }
 0xf3b   :  { %v8245_v17 = vpop.f32.mrf.mxu0 }
 0xf3d   :  { %v8247_v8 = vpop.f32.mrf.mxu0 }
 0xf3f   :  { %v8249_v13 = vpop.f32.mrf.mxu0 }
 0xf41   :  { %v8251_v33 = vpop.f32.mrf.mxu0 }
 0xf43   :  { %v8253_v58 = vpop.f32.mrf.mxu0 }
 0xf45   :  { %v8255_v12 = vpop.f32.mrf.mxu0 }
 0xf47   :  { %v8257_v34 = vpop.f32.mrf.mxu0 }
 0xf49   :  { %v5846_v47 = vpop.f32.mrf.mxu0 }
 0xf4b   :  { %v3133_v0 = vpop.f32.mrf.mxu0 }
 0xf4d   :  { %v5847_v46 = vpop.f32.mrf.mxu0 }
 0xf4f   :  { %v8259_v2 = vpop.f32.mrf.mxu0 }
 0xf51   :  { %v5850_v20 = vpop.f32.mrf.mxu0 }
 0xf52   :  { %3192 = vmax.xlane.f32.xlu1 %v5850_v20 }
 0xf53   :  { %v3149_v11 = vpop.f32.mrf.mxu0 }
 0xf55   :  { %v5851_v35 = vpop.f32.mrf.mxu0 }
 0xf56   :  { %3188 = vmax.xlane.f32.xlu1 %v3149_v11  ;;  %3194 = vmax.xlane.f32.xlu0 %v5851_v35 }
 0xf57   :  { %v3152_v19 = vpop.f32.mrf.mxu0 }
 0xf5a   :  { %3184 = vmax.xlane.f32.xlu1 %v5846_v47  ;;  %3174 = vmax.xlane.f32.xlu0 %v8257_v34 }
 0xf5e   :  { %3186 = vmax.xlane.f32.xlu1 %v5847_v46  ;;  %3170 = vmax.xlane.f32.xlu0 %v8247_v8 }
 0xf62   :  { %3180 = vmax.xlane.f32.xlu1 %v3133_v0  ;;  %3166 = vmax.xlane.f32.xlu0 %v8249_v13 }
 0xf66   :  { %3190 = vmax.xlane.f32.xlu1 %v3152_v19 }
 0xf6a   :  { %3182 = vmax.xlane.f32.xlu1 %v8259_v2 }
 0xf6e   :  { %3176 = vmax.xlane.f32.xlu1 %v8251_v33 }
 0xf72   :  { %3178 = vmax.xlane.f32.xlu1 %v8255_v12 }
 0xf76   :  { %3172 = vmax.xlane.f32.xlu1 %v8253_v58 }
 0xf7a   :  { %3168 = vmax.xlane.f32.xlu1 %v8243_v3 }
 0xf7e   :  { %3164 = vmax.xlane.f32.xlu1 %v8245_v17 }
 0xfdb   :  { %v3193_v22 = vpop.xlane.xlu1 %3192 }
 0xfdc   :  { %v3210_v36 = vsub.f32 %v5850_v20, %v3193_v22 }
 0xfde   :  { %v3240_v25 = vmul.f32 1.442695, %v3210_v36 }
 0xfdf   :  { %v3189_v21 = vpop.xlane.xlu1 %3188  ;;  %v3195_v48 = vpop.xlane.xlu0 %3194 }
 0xfe0   :  { %v3211_v4 = vsub.f32 %v5851_v35, %v3195_v48  ;;  %v3208_v54 = vsub.f32 %v3149_v11, %v3189_v21 }
 0xfe2   :  { %v3242_v51 = vmul.f32 1.442695, %v3211_v4  ;;  %v3236_v52 = vmul.f32 1.442695, %v3208_v54  ;;  %v8386_v54 = vld [vmem:[%s9480_s2 + $0x38] sm:$0xff] }
 0xfe3   :  { %v3185_v55 = vpop.xlane.xlu1 %3184  ;;  %v3175_v39 = vpop.xlane.xlu0 %3174 }
 0xfe4   :  { %v3206_v56 = vsub.f32 %v5846_v47, %v3185_v55  ;;  %v3201_v59 = vsub.f32 %v8257_v34, %v3175_v39 }
 0xfe6   :  { %v3232_v26 = vmul.f32 1.442695, %v3206_v56 }
 0xfe7   :  { %v3187_v29 = vpop.xlane.xlu1 %3186  ;;  %v3171_v10 = vpop.xlane.xlu0 %3170 }
 0xfe8   :  { %6348 = vpow2.f32 %v3232_v26  ;;  %v3207_v57 = vsub.f32 %v5847_v46, %v3187_v29  ;;  %v3199_v11 = vsub.f32 %v8247_v8, %v3171_v10 }
 0xfea   :  { %v3234_v50 = vmul.f32 1.442695, %v3207_v57  ;;  %v3218_v37 = vmul.f32 1.442695, %v3199_v11 }
 0xfeb   :  { %v3181_v40 = vpop.xlane.xlu1 %3180  ;;  %v3167_v34 = vpop.xlane.xlu0 %3166 }
 0xfec   :  { %6350 = vpow2.f32 %v3234_v50  ;;  %v3204_v41 = vsub.f32 %v3133_v0, %v3181_v40  ;;  %v3197_v43 = vsub.f32 %v8249_v13, %v3167_v34  ;;  %v8356_v40 = vld [vmem:[%s9480_s2 + $0x8] sm:$0xff] }
 0xfed   :  { %6352 = vpow2.f32 %v3242_v51  ;;  %v8350_v51 = vld [vmem:[%s9480_s2 + $0x10] sm:$0xff] }
 0xfee   :  { %v3228_v61 = vmul.f32 1.442695, %v3204_v41  ;;  %v3214_v55 = vmul.f32 1.442695, %v3197_v43  ;;  %v8362_v41 = vld [vmem:[%s9480_s2 + $0x18] sm:$0xff] }
 0xfef   :  { %v3191_v5 = vpop.xlane.xlu1 %3190 }
 0xff0   :  { %6354 = vpow2.f32 %v3228_v61  ;;  %v3209_v6 = vsub.f32 %v3152_v19, %v3191_v5  ;;  %v8374_v61 = vld [vmem:[%s9480_s2 + $0x28] sm:$0xff]  ;;  %v2935_v5 = vpop.f32.mrf.mxu1 }
 0xff1   :  { %6356 = vpow2.f32 %v3240_v25  ;;  %v8380_v25 = vld [vmem:[%s9480_s2 + $0x30] sm:$0xff] }
 0xff2   :  { %v3238_v27 = vmul.f32 1.442695, %v3209_v6  ;;  %v8390_v6 = vpack.c.bf16 %v2935_v5, %v8233_v42 }
 0xff3   :  { %v3183_v38 = vpop.xlane.xlu1 %3182 }
 0xff4   :  { %6358 = vpow2.f32 %v3238_v27  ;;  %v3205_v44 = vsub.f32 %v8259_v2, %v3183_v38 }
 0xff5   :  { %v8290_v32 = vpop.eup %6348  ;;  %6360 = vpow2.f32 %v3236_v52 }
 0xff6   :  { %v3230_v9 = vmul.f32 1.442695, %v3205_v44  ;;  %3264 = vadd.xlane.f32.xlu1 %v8290_v32  ;;  %v8393_v44 = vpop.f32.mrf.mxu1 }
 0xff7   :  { %v3177_v18 = vpop.xlane.xlu1 %3176 }
 0xff8   :  { %6362 = vpow2.f32 %v3230_v9  ;;  %v3202_v28 = vsub.f32 %v8251_v33, %v3177_v18  ;;  %v3222_v33 = vmul.f32 1.442695, %v3201_v59 }
 0xff9   :  { %v8294_v7 = vpop.eup %6350 }
 0xffa   :  { %v3224_v14 = vmul.f32 1.442695, %v3202_v28  ;;  %3266 = vadd.xlane.f32.xlu0 %v8294_v7  ;;  %v8298_v0 = vpop.eup %6352  ;;  %v8395_v28 = vpop.f32.mrf.mxu1 }
 0xffb   :  { %v3179_v47 = vpop.xlane.xlu1 %3178 }
 0xffc   :  { %6364 = vpow2.f32 %v3224_v14  ;;  %v3203_v46 = vsub.f32 %v8255_v12, %v3179_v47  ;;  %v8397_v14 = vpop.f32.mrf.mxu1 }
 0xffd   :  { %v8301_v2 = vpop.eup %6354 }
 0xffe   :  { %v3226_v20 = vmul.f32 1.442695, %v3203_v46  ;;  %3274 = vadd.xlane.f32.xlu0 %v8298_v0  ;;  %3260 = vadd.xlane.f32.xlu1 %v8301_v2  ;;  %v8306_v30 = vpop.eup %6356  ;;  %v8399_v59 = vpop.f32.mrf.mxu1 }
 0xfff   :  { %v3173_v35 = vpop.xlane.xlu1 %3172 }
0x1000   :  { %6366 = vpow2.f32 %v3226_v20  ;;  %v3200_v19 = vsub.f32 %v8253_v58, %v3173_v35 }
0x1001   :  { %v8309_v16 = vpop.eup %6358  ;;  %6368 = vpow2.f32 %v3222_v33  ;;  %v8401_v33 = vpop.f32.mrf.mxu1 }
0x1002   :  { %v3220_v12 = vmul.f32 1.442695, %v3200_v19  ;;  %3272 = vadd.xlane.f32.xlu1 %v8306_v30  ;;  %3270 = vadd.xlane.f32.xlu0 %v8309_v16  ;;  %v8314_v8 = vpop.eup %6360 }
0x1003   :  { %v3169_v24 = vpop.xlane.xlu1 %3168 }
0x1004   :  { %6370 = vpow2.f32 %v3220_v12  ;;  %v3198_v22 = vsub.f32 %v8243_v3, %v3169_v24  ;;  %v8409_v24 = vpop.f32.mrf.mxu1 }
0x1005   :  { %v8317_v21 = vpop.eup %6362  ;;  %6372 = vpow2.f32 %v3218_v37 }
0x1006   :  { %v3216_v58 = vmul.f32 1.442695, %v3198_v22  ;;  %3268 = vadd.xlane.f32.xlu1 %v8314_v8  ;;  %3262 = vadd.xlane.f32.xlu0 %v8317_v21 }
0x1007   :  { %v3165_v48 = vpop.xlane.xlu1 %3164 }
0x1008   :  { %6374 = vpow2.f32 %v3216_v58  ;;  %v3196_v56 = vsub.f32 %v8245_v17, %v3165_v48 }
0x1009   :  { %v8322_v13 = vpop.eup %6364  ;;  %6376 = vpow2.f32 %v3214_v55 }
0x100a   :  { %v3212_v26 = vmul.f32 1.442695, %v3196_v56  ;;  %3256 = vadd.xlane.f32.xlu1 %v8322_v13 }
0x100c   :  { %6378 = vpow2.f32 %v3212_v26 }
0x100d   :  { %v8325_v3 = vpop.eup %6366 }
0x100e   :  { %3258 = vadd.xlane.f32.xlu0 %v8325_v3  ;;  %v8328_v4 = vpop.eup %6368 }
0x1011   :  { %v8330_v29 = vpop.eup %6370 }
0x1012   :  { %3254 = vadd.xlane.f32.xlu0 %v8328_v4  ;;  %3252 = vadd.xlane.f32.xlu1 %v8330_v29  ;;  %v8334_v17 = vpop.eup %6372 }
0x1015   :  { %v8336_v57 = vpop.eup %6374 }
0x1016   :  { %3250 = vadd.xlane.f32.xlu0 %v8334_v17  ;;  %3248 = vadd.xlane.f32.xlu1 %v8336_v57  ;;  %v8340_v50 = vpop.eup %6376 }
0x1019   :  { %v8342_v36 = vpop.eup %6378 }
0x101a   :  { %3246 = vadd.xlane.f32.xlu0 %v8340_v50  ;;  %3244 = vadd.xlane.f32.xlu1 %v8342_v36 }
0x102b   :  { %2979 = vperm.xlu1 %6032, %v8005_v45   ;;  %v8368_v45 = vld [vmem:[%s9480_s2 + $0x20] sm:$0xff] }
0x102f   :  { %2987 = vperm.xlu1 %6032, %v8350_v51  }
0x1030   :  { %2983 = vperm.xlu0 %6033, %v8356_v40  }
0x1033   :  { %2991 = vperm.xlu1 %6032, %v8362_v41  }
0x1037   :  { %2995 = vperm.xlu1 %6032, %v8368_v45  }
0x103b   :  { %2999 = vperm.xlu1 %6032, %v8374_v61  }
0x103f   :  { %3003 = vperm.xlu1 %6032, %v8380_v25  }
0x1043   :  { %3007 = vperm.xlu1 %6032, %v8386_v54  }
0x1066   :  { %3434 = vxpose.xlu1.c.b16.start.end [1/1] (short) %v8390_v6, 128 }
0x107f   :  { %v3265_v27 = vpop.xlane.xlu1 %3264 }
0x1083   :  { %v3267_v52 = vpop.xlane.xlu0 %3266 }
0x1087   :  { %v3275_v38 = vpop.xlane.xlu0 %3274  ;;  %v3261_v39 = vpop.xlane.xlu1 %3260 }
0x1088   :  { %6380 = vrcp.f32 %v3275_v38 }
0x108b   :  { %v3271_v9 = vpop.xlane.xlu0 %3270  ;;  %v3273_v18 = vpop.xlane.xlu1 %3272 }
0x108c   :  { %6382 = vrcp.f32 %v3273_v18 }
0x108d   :  { %6384 = vrcp.f32 %v3267_v52 }
0x108e   :  { %6386 = vrcp.f32 %v3271_v9 }
0x108f   :  { %v3269_v10 = vpop.xlane.xlu1 %3268  ;;  %6388 = vrcp.f32 %v3265_v27  ;;  %v3263_v42 = vpop.xlane.xlu0 %3262 }
0x1090   :  { %6390 = vrcp.f32 %v3269_v10  ;;  %v8422_v27 = vpop.f32.mrf.mxu1 }
0x1091   :  { %6392 = vrcp.f32 %v3263_v42 }
0x1092   :  { %6394 = vrcp.f32 %v3261_v39  ;;  %v8434_v18 = vpop.f32.mrf.mxu1 }
0x1093   :  { %v3257_v47 = vpop.xlane.xlu1 %3256 }
0x1095   :  { %v6381_v20 = vpop.eup %6380 }
0x1096   :  { %v8407_v37 = vmul.f32 %v6381_v20, %v8298_v0 }
0x1097   :  { %v3259_v46 = vpop.xlane.xlu0 %3258 }
0x1098   :  { %6396 = vrcp.f32 %v3259_v46 }
0x1099   :  { %6398 = vrcp.f32 %v3257_v47  ;;  %v6383_v11 = vpop.eup %6382 }
0x109a   :  { %v6385_v35 = vpop.eup %6384  ;;  %v8404_v12 = vmul.f32 %v6383_v11, %v8306_v30 }
0x109b   :  { %v3255_v34 = vpop.xlane.xlu0 %3254  ;;  %v3253_v19 = vpop.xlane.xlu1 %3252  ;;  %v8420_v0 = vmul.f32 %v6385_v35, %v8294_v7 }
0x109c   :  { %v6387_v43 = vpop.eup %6386  ;;  %6400 = vrcp.f32 %v3255_v34  ;;  %v3356_v58 = vpack.c.bf16 %v8407_v37, %v8404_v12 }
0x109d   :  { %v6389_v22 = vpop.eup %6388  ;;  %6402 = vrcp.f32 %v3253_v19  ;;  %v8417_v30 = vmul.f32 %v6387_v43, %v8309_v16 }
0x109e   :  { %v6391_v55 = vpop.eup %6390  ;;  %5852 = vmatprep.subr.bf16.mxu1 %v3356_v58  ;;  %v8427_v38 = vmul.f32 %v6389_v22, %v8290_v32 }
0x109f   :  { %v3251_v48 = vpop.xlane.xlu0 %3250  ;;  %v3249_v56 = vpop.xlane.xlu1 %3248  ;;  %v8414_v26 = vmul.f32 %v6391_v55, %v8314_v8  ;;  %5853 = vmatpush3.bf16.msra.mxu1 %v3356_v58 }
0x10a0   :  { %v6393_v5 = vpop.eup %6392  ;;  %6404 = vrcp.f32 %v3251_v48  ;;  %v3354_v7 = vpack.c.bf16 %v8420_v0, %v8427_v38 }
0x10a1   :  { %6406 = vrcp.f32 %v3249_v56  ;;  %v3355_v52 = vpack.c.bf16 %v8417_v30, %v8414_v26  ;;  %v6395_v8 = vpop.eup %6394  ;;  %v8432_v9 = vmul.f32 %v6393_v5, %v8317_v21  ;;  %v2959_v21 = vpop.f32.mrf.mxu1 }
0x10a2   :  { %v8437_v32 = vmul.f32 %v6395_v8, %v8301_v2 }
0x10a3   :  { %5854 = vmatprep.subr.bf16.mxu1 %v3355_v52  ;;  %v3247_v39 = vpop.xlane.xlu0 %3246  ;;  %v3245_v16 = vpop.xlane.xlu1 %3244 }
0x10a4   :  { %6408 = vrcp.f32 %v3247_v39  ;;  %5855 = vmatpush3.bf16.msra.mxu1 %v3355_v52  ;;  %v3353_v46 = vpack.c.bf16 %v8432_v9, %v8437_v32 }
0x10a5   :  { %v6397_v10 = vpop.eup %6396  ;;  %6410 = vrcp.f32 %v3245_v16  ;;  %5856 = vmatprep.subr.bf16.mxu1 %v3354_v7 }
0x10a6   :  { %v6399_v42 = vpop.eup %6398  ;;  %v8442_v20 = vmul.f32 %v6397_v10, %v8325_v3 }
0x10a7   :  { %v2980_v47 = vpop.permute.xlu1 %2979  ;;  %v3314_v35 = vmul.f32 %v6399_v42, %v8322_v13  ;;  %v8454_v13 = vpop.f32.mrf.mxu1 }
0x10a8   :  { %5857 = vmatpush3.bf16.msra.mxu1 %v3354_v7  ;;  %v3010_v55 = vadd.f32 %v2980_v47, %v8393_v44  ;;  %v3011_v3 = vadd.f32 %v2980_v47, %v8395_v28 }
0x10a9   :  { %v6401_v11 = vpop.eup %6400  ;;  %5858 = vmatprep.subr.bf16.mxu1 %v3353_v46  ;;  %v3352_v2 = vpack.c.bf16 %v8442_v20, %v3314_v35  ;;  %v2963_v28 = vpop.f32.mrf.mxu1 }
0x10aa   :  { %v6403_v34 = vpop.eup %6402  ;;  %v3313_v58 = vmul.f32 %v6401_v11, %v8328_v4 }
0x10ab   :  { %v2984_v19 = vpop.permute.xlu0 %2983  ;;  %v8445_v43 = vpop.permute.xlu1 %2987  ;;  %v3312_v22 = vmul.f32 %v6403_v34, %v8330_v29 }
0x10ac   :  { %v3012_v48 = vadd.f32 %v2984_v19, %v8397_v14  ;;  %v3013_v56 = vadd.f32 %v2984_v19, %v8399_v59  ;;  %5859 = vmatpush3.bf16.msra.mxu1 %v3353_v46  ;;  %v8464_v46 = vpop.f32.mrf.mxu1 }
0x10ad   :  { %v6405_v5 = vpop.eup %6404  ;;  %5860 = vmatprep.subr.bf16.mxu1 %v3352_v2  ;;  %v3351_v29 = vpack.c.bf16 %v3313_v58, %v3312_v22 }
0x10ae   :  { %v6407_v52 = vpop.eup %6406  ;;  %v3345_v8 = vpack.c.bf16 %v3012_v48, %v3010_v55  ;;  %v3752_v39 = vpack.c.bf16 %v3013_v56, %v3011_v3  ;;  %v3311_v44 = vmul.f32 %v6405_v5, %v8334_v17  ;;  %v2969_v19 = vpop.f32.mrf.mxu1 }
0x10af   :  { %v8456_v16 = vpop.permute.xlu1 %2991  ;;  %v3310_v4 = vmul.f32 %v6407_v52, %v8336_v57 }
0x10b0   :  { %5861 = vmatpush3.bf16.msra.mxu1 %v3352_v2  ;;  %5868 = vmatprep.mubr.bf16.mxu1 %v3345_v8  ;;  %v3016_v2 = vadd.f32 %v8456_v16, %v8422_v27  ;;  %v8476_v5 = vpop.f32.mrf.mxu1 }
0x10b1   :  { %v6409_v14 = vpop.eup %6408  ;;  %5862 = vmatprep.subr.bf16.mxu1 %v3351_v29  ;;  %5910 = vmatprep.mubr.bf16.mxu0 %v3752_v39  ;;  %v3350_v42 = vpack.c.bf16 %v3311_v44, %v3310_v4 }
0x10b2   :  { %v6411_v59 = vpop.eup %6410  ;;  %v3309_v7 = vmul.f32 %v6409_v14, %v8340_v50 }
0x10b3   :  { %v8461_v10 = vpop.permute.xlu1 %2995  ;;  %v3308_v47 = vmul.f32 %v6411_v59, %v8342_v36  ;;  %v3014_v36 = vadd.f32 %v8445_v43, %v8401_v33 }
0x10b4   :  { %5863 = vmatpush3.bf16.msra.mxu1 %v3351_v29  ;;  %v3018_v56 = vadd.f32 %v8461_v10, %v2959_v21 }
0x10b5   :  { %5864 = vmatprep.subr.bf16.mxu1 %v3350_v42  ;;  %v3324_v57 = vadd.f32 %v3309_v7, %v3308_v47  ;;  %v3349_v34 = vpack.c.bf16 %v3309_v7, %v3308_v47  ;;  %v3346_v52 = vpack.c.bf16 %v3016_v2, %v3014_v36 }
0x10b7   :  { %v8466_v17 = vpop.permute.xlu1 %2999  ;;  %v3325_v11 = vadd.f32 %v3324_v57, %v3310_v4  ;;  %v2973_v4 = vpop.f32.mrf.mxu1 }
0x10b8   :  { %5865 = vmatpush3.bf16.msra.mxu1 %v3350_v42  ;;  %v3020_v55 = vadd.f32 %v8466_v17, %v2963_v28 }
0x10b9   :  { %v3326_v50 = vadd.f32 %v3325_v11, %v3311_v44  ;;  %5866 = vmatprep.subr.bf16.mxu1 %v3349_v34 }
0x10ba   :  { %v3347_v27 = vpack.c.bf16 %v3020_v55, %v3018_v56 }
0x10bb   :  { %v3327_v3 = vadd.f32 %v3326_v50, %v3312_v22  ;;  %v8473_v48 = vpop.permute.xlu1 %3003  ;;  %v8502_v50 = vpop.f32.mrf.mxu1 }
0x10bc   :  { %5867 = vmatpush3.bf16.msra.mxu1 %v3349_v34  ;;  %v3022_v44 = vadd.f32 %v8473_v48, %v2969_v19 }
0x10bd   :  { %v3328_v8 = vadd.f32 %v3327_v3, %v3313_v58  ;;  %5876 = vmatprep.subr.bf16.mxu1 %v8390_v6 }
0x10bf   :  { %v3329_v39 = vadd.f32 %v3328_v8, %v3314_v35  ;;  %5869 = vmatmul.mubr.bf16.vlgmr.msra.gmra.mxu1 %v3346_v52  ;;  %v8479_v29 = vpop.permute.xlu1 %3007 }
0x10c0   :  { %5872 = vmatprep.mubr.bf16.mxu1 %v3347_v27  ;;  %5877 = vmatpush3.bf16.msra.mxu1 %v8390_v6  ;;  %v3024_v21 = vadd.f32 %v8479_v29, %v2973_v4 }
0x10c1   :  { %v3330_v33 = vadd.f32 %v3329_v39, %v8442_v20 }
0x10c2   :  { %v3348_v28 = vpack.c.bf16 %v3024_v21, %v3022_v44 }
0x10c3   :  { %v3331_v22 = vadd.f32 %v3330_v33, %v8437_v32 }
0x10c5   :  { %v3332_v58 = vadd.f32 %v3331_v22, %v8432_v9 }
0x10c7   :  { %v3333_v35 = vadd.f32 %v3332_v58, %v8427_v38  ;;  %5873 = vmatmul.mubr.bf16.gmra.mxu1 %v3348_v28 }
0x10c8   :  { %v3442_v14 = vpop.trf.xlu1 }
0x10c9   :  { %v3334_v59 = vadd.f32 %v3333_v35, %v8420_v0  ;;  %5878 = vmatprep.mubr.msk.bf16.mxu1 %vm599_vm1, %v3442_v14 }
0x10cb   :  { %v3335_v6 = vadd.f32 %v3334_v59, %v8414_v26 }
0x10cc   :  { %v3443_v20 = vpop.trf.xlu1 }
0x10cd   :  { %v3336_v7 = vadd.f32 %v3335_v6, %v8417_v30 }
0x10cf   :  { %v3337_v32 = vadd.f32 %v3336_v7, %v8404_v12  ;;  %5879 = vmatmul.mubr.msk.bf16.vlgmr.msra.gmra.mxu1 %vm599_vm1, %v3443_v20 }
0x10d0   :  { %v3444_v42 = vpop.trf.xlu1 }
0x10d1   :  { %v3338_v9 = vadd.f32 %v3337_v32, %v8407_v37  ;;  %5882 = vmatprep.mubr.msk.bf16.mxu1 %vm599_vm1, %v3444_v42 }
0x10d3   :  { %v3339_v37 = vrot.slane %v3338_v9, 4 }
0x10d4   :  { %v3445_v38 = vpop.trf.xlu1 }
0x10d5   :  { %v3340_v30 = vadd.f32 %v3339_v37, %v3338_v9 }
0x10d7   :  { %5883 = vmatmul.mubr.msk.bf16.gmra.mxu1 %vm599_vm1, %v3445_v38  ;;  %v3341_v57 = vrot.slane %v3340_v30, 2 }
0x10d8   :  { %v3446_v0 = vpop.trf.xlu1 }
0x10d9   :  { %5886 = vmatprep.mubr.msk.bf16.mxu1 %vm599_vm1, %v3446_v0  ;;  %v3342_v11 = vadd.f32 %v3341_v57, %v3340_v30 }
0x10db   :  { %v3343_v34 = vrot.slane %v3342_v11, 1 }
0x10dc   :  { %v3447_v47 = vpop.trf.xlu1 }
0x10dd   :  { %v3344_v19 = vadd.f32 %v3343_v34, %v3342_v11 }
0x10df   :  { %5887 = vmatmul.mubr.msk.bf16.gmra.mxu1 %vm599_vm1, %v3447_v47  ;;  %v3422_v2 = vadd.f32 1e-09, %v3344_v19 }
0x10e0   :  { %v3448_v26 = vpop.trf.xlu1 }
0x10e1   :  { %5890 = vmatprep.mubr.msk.bf16.mxu1 %vm599_vm1, %v3448_v26  ;;  %6412 = vrcp.f32 %v3422_v2 }
0x10e4   :  { %v3449_v12 = vpop.trf.xlu1 }
0x10e7   :  { %5891 = vmatmul.mubr.msk.bf16.gmra.mxu1 %vm599_vm1, %v3449_v12 }
0x10e8   :  { %4149 = vmatprep.mubr.bf16.mxu1 %v9571_v63 }
0x10ee   :  { %v6413_v55 = vpop.eup %6412 }
0x117f   :  { %v5870_v36 = vpop.f32.mrf.mxu1 }
0x1180   :  { %v3427_v3 = vmul.f32 %v6413_v55, %v5870_v36 }
0x1181   :  { %v3391_v56 = vpop.f32.mrf.mxu1 }
0x1182   :  { %v3425_v52 = vmul.f32 %v6413_v55, %v3391_v56  ;;  %v3853_v4 = vsub.f32 %v8149_v49, %v3427_v3 }
0x1183   :  { %v5871_v8 = vpop.f32.mrf.mxu1 }
0x1184   :  { %v3428_v27 = vmul.f32 %v6413_v55, %v5871_v8  ;;  %v3849_v44 = vsub.f32 %v8125_v23, %v3425_v52 }
0x1185   :  { %v3394_v39 = vpop.f32.mrf.mxu1 }
0x1186   :  { %v3855_v33 = vsub.f32 %v8160_v31, %v3428_v27  ;;  %v3426_v21 = vmul.f32 %v6413_v55, %v3394_v39 }
0x1187   :  { %v5874_v22 = vpop.f32.mrf.mxu1 }
0x1188   :  { %v8507_v58 = vpack.c.bf16 %v3855_v33, %v3853_v4  ;;  %v3851_v28 = vsub.f32 %v8137_v1, %v3426_v21  ;;  %v3431_v35 = vmul.f32 %v6413_v55, %v5874_v22 }
0x1189   :  { %v3407_v14 = vpop.f32.mrf.mxu1 }
0x118a   :  { %v8510_v59 = vpack.c.bf16 %v3851_v28, %v3849_v44  ;;  %v3429_v6 = vmul.f32 %v6413_v55, %v3407_v14  ;;  %v3861_v49 = vsub.f32 %v8195_v15, %v3431_v35 }
0x118b   :  { %v5875_v20 = vpop.f32.mrf.mxu1 }
0x118c   :  { %v3432_v7 = vmul.f32 %v6413_v55, %v5875_v20  ;;  %v3857_v23 = vsub.f32 %v8171_v53, %v3429_v6 }
0x118d   :  { %v3410_v32 = vpop.f32.mrf.mxu1 }
0x118e   :  { %v3863_v31 = vsub.f32 %v8208_v60, %v3432_v7  ;;  %v3430_v42 = vmul.f32 %v6413_v55, %v3410_v32 }
0x118f   :  { %v8514_v9 = vpop.f32.mrf.mxu1 }
0x1190   :  { %v8517_v38 = vpack.c.bf16 %v3863_v31, %v3861_v49  ;;  %v3859_v1 = vsub.f32 %v8182_v62, %v3430_v42 }
0x1191   :  { %v8520_v0 = vpop.f32.mrf.mxu1 }
0x1192   :  { %v8522_v47 = vpack.c.bf16 %v3859_v1, %v3857_v23 }
0x1193   :  { %v8524_v26 = vpop.f32.mrf.mxu1 }
0x1195   :  { %v8526_v12 = vpop.f32.mrf.mxu1 }
0x1197   :  { %v8528_v15 = vpop.f32.mrf.mxu1 }
0x1199   :  { %v8530_v60 = vpop.f32.mrf.mxu1 }
0x119b   :  { %v8532_v37 = vpop.f32.mrf.mxu1 }
0x119d   :  { %v8534_v30 = vpop.f32.mrf.mxu1 }
0x119f   :  { %v5888_v53 = vpop.f32.mrf.mxu1 }
0x11a1   :  { %v3540_v57 = vpop.f32.mrf.mxu1 }
0x11a3   :  { %v5889_v11 = vpop.f32.mrf.mxu1 }
0x11a5   :  { %v8536_v62 = vpop.f32.mrf.mxu1 }
0x11a7   :  { %v5892_v34 = vpop.f32.mrf.mxu1 }
0x11a8   :  { %3599 = vmax.xlane.f32.xlu0 %v5892_v34 }
0x11a9   :  { %v3556_v19 = vpop.f32.mrf.mxu1 }
0x11ab   :  { %v5893_v2 = vpop.f32.mrf.mxu1 }
0x11ac   :  { %3595 = vmax.xlane.f32.xlu0 %v3556_v19  ;;  %3601 = vmax.xlane.f32.xlu1 %v5893_v2 }
0x11ad   :  { %v3559_v55 = vpop.f32.mrf.mxu1 }
0x11b0   :  { %3591 = vmax.xlane.f32.xlu0 %v5888_v53  ;;  %3575 = vmax.xlane.f32.xlu1 %v8514_v9 }
0x11b4   :  { %3593 = vmax.xlane.f32.xlu0 %v5889_v11  ;;  %3571 = vmax.xlane.f32.xlu1 %v8520_v0 }
0x11b8   :  { %3587 = vmax.xlane.f32.xlu0 %v3540_v57 }
0x11bc   :  { %3589 = vmax.xlane.f32.xlu0 %v8536_v62 }
0x11c0   :  { %3597 = vmax.xlane.f32.xlu0 %v3559_v55 }
0x11c4   :  { %3583 = vmax.xlane.f32.xlu0 %v8528_v15 }
0x11c8   :  { %3585 = vmax.xlane.f32.xlu0 %v8532_v37 }
0x11cc   :  { %3579 = vmax.xlane.f32.xlu0 %v8530_v60 }
0x11d0   :  { %3581 = vmax.xlane.f32.xlu0 %v8534_v30 }
0x11d4   :  { %3577 = vmax.xlane.f32.xlu0 %v8524_v26 }
0x11d8   :  { %3573 = vmax.xlane.f32.xlu0 %v8526_v12 }
0x1231   :  { %v3600_v36 = vpop.xlane.xlu0 %3599 }
0x1232   :  { %v3617_v3 = vsub.f32 %v5892_v34, %v3600_v36 }
0x1234   :  { %v3647_v56 = vmul.f32 1.442695, %v3617_v3 }
0x1235   :  { %v3596_v52 = vpop.xlane.xlu0 %3595  ;;  %v3602_v8 = vpop.xlane.xlu1 %3601 }
0x1236   :  { %6414 = vpow2.f32 %v3647_v56  ;;  %v3615_v27 = vsub.f32 %v3556_v19, %v3596_v52  ;;  %v3618_v39 = vsub.f32 %v5893_v2, %v3602_v8 }
0x1238   :  { %v3643_v4 = vmul.f32 1.442695, %v3615_v27  ;;  %v3649_v33 = vmul.f32 1.442695, %v3618_v39 }
0x1239   :  { %v3592_v21 = vpop.xlane.xlu0 %3591  ;;  %v3576_v36 = vpop.xlane.xlu1 %3575 }
0x123a   :  { %6416 = vpow2.f32 %v3643_v4  ;;  %v3613_v22 = vsub.f32 %v5888_v53, %v3592_v21  ;;  %v3605_v8 = vsub.f32 %v8514_v9, %v3576_v36 }
0x123b   :  { %6418 = vpow2.f32 %v3649_v33 }
0x123c   :  { %v3639_v44 = vmul.f32 1.442695, %v3613_v22  ;;  %v3623_v33 = vmul.f32 1.442695, %v3605_v8 }
0x123d   :  { %v3594_v28 = vpop.xlane.xlu0 %3593 }
0x123e   :  { %6420 = vpow2.f32 %v3639_v44  ;;  %v3614_v31 = vsub.f32 %v5889_v11, %v3594_v28 }
0x1241   :  { %v3588_v35 = vpop.xlane.xlu0 %3587 }
0x1242   :  { %v3611_v14 = vsub.f32 %v3540_v57, %v3588_v35  ;;  %v3641_v57 = vmul.f32 1.442695, %v3614_v31 }
0x1243   :  { %v8547_v6 = vpop.eup %6414 }
0x1244   :  { %v3635_v20 = vmul.f32 1.442695, %v3611_v14  ;;  %3679 = vadd.xlane.f32.xlu1 %v8547_v6 }
0x1245   :  { %v3590_v7 = vpop.xlane.xlu0 %3589 }
0x1246   :  { %6422 = vpow2.f32 %v3635_v20  ;;  %v3612_v19 = vsub.f32 %v8536_v62, %v3590_v7  ;;  %v3572_v62 = vpop.xlane.xlu1 %3571 }
0x1247   :  { %v8550_v32 = vpop.eup %6416  ;;  %v3603_v21 = vsub.f32 %v8520_v0, %v3572_v62 }
0x1248   :  { %v8552_v49 = vpop.eup %6418  ;;  %3675 = vadd.xlane.f32.xlu1 %v8550_v32  ;;  %v3637_v56 = vmul.f32 1.442695, %v3612_v19 }
0x1249   :  { %3681 = vadd.xlane.f32.xlu0 %v8552_v49  ;;  %v3598_v42 = vpop.xlane.xlu0 %3597  ;;  %v3619_v9 = vmul.f32 1.442695, %v3603_v21 }
0x124a   :  { %v3616_v23 = vsub.f32 %v3559_v55, %v3598_v42 }
0x124b   :  { %v8556_v1 = vpop.eup %6420 }
0x124c   :  { %v3645_v53 = vmul.f32 1.442695, %v3616_v23  ;;  %3671 = vadd.xlane.f32.xlu1 %v8556_v1 }
0x124d   :  { %v3584_v34 = vpop.xlane.xlu0 %3583 }
0x124e   :  { %6424 = vpow2.f32 %v3645_v53  ;;  %v3609_v2 = vsub.f32 %v8528_v15, %v3584_v34 }
0x124f   :  { %6426 = vpow2.f32 %v3641_v57 }
0x1250   :  { %v3631_v3 = vmul.f32 1.442695, %v3609_v2 }
0x1251   :  { %v3586_v11 = vpop.xlane.xlu0 %3585 }
0x1252   :  { %6428 = vpow2.f32 %v3631_v3  ;;  %v3610_v55 = vsub.f32 %v8532_v37, %v3586_v11 }
0x1253   :  { %v8562_v52 = vpop.eup %6422  ;;  %6430 = vpow2.f32 %v3637_v56 }
0x1254   :  { %3667 = vadd.xlane.f32.xlu1 %v8562_v52  ;;  %v3633_v27 = vmul.f32 1.442695, %v3610_v55 }
0x1255   :  { %v3580_v39 = vpop.xlane.xlu0 %3579 }
0x1256   :  { %v3607_v15 = vsub.f32 %v8530_v60, %v3580_v39  ;;  %6432 = vpow2.f32 %v3633_v27 }
0x1258   :  { %v3627_v4 = vmul.f32 1.442695, %v3607_v15 }
0x1259   :  { %v3582_v22 = vpop.xlane.xlu0 %3581 }
0x125a   :  { %6434 = vpow2.f32 %v3627_v4  ;;  %v3608_v37 = vsub.f32 %v8534_v30, %v3582_v22 }
0x125b   :  { %v8569_v44 = vpop.eup %6424  ;;  %6436 = vpow2.f32 %v3623_v33 }
0x125c   :  { %v3629_v28 = vmul.f32 1.442695, %v3608_v37  ;;  %3677 = vadd.xlane.f32.xlu0 %v8569_v44  ;;  %v8572_v14 = vpop.eup %6426 }
0x125d   :  { %v3578_v35 = vpop.xlane.xlu0 %3577 }
0x125e   :  { %6438 = vpow2.f32 %v3629_v28  ;;  %v3606_v60 = vsub.f32 %v8524_v26, %v3578_v35 }
0x125f   :  { %v8575_v20 = vpop.eup %6428  ;;  %6440 = vpow2.f32 %v3619_v9 }
0x1260   :  { %v3625_v0 = vmul.f32 1.442695, %v3606_v60  ;;  %3673 = vadd.xlane.f32.xlu0 %v8572_v14  ;;  %3663 = vadd.xlane.f32.xlu1 %v8575_v20  ;;  %v8580_v31 = vpop.eup %6430 }
0x1261   :  { %v3574_v30 = vpop.xlane.xlu0 %3573 }
0x1262   :  { %6442 = vpow2.f32 %v3625_v0  ;;  %v3604_v7 = vsub.f32 %v8526_v12, %v3574_v30 }
0x1263   :  { %v8583_v23 = vpop.eup %6432 }
0x1264   :  { %v3621_v42 = vmul.f32 1.442695, %v3604_v7  ;;  %3669 = vadd.xlane.f32.xlu0 %v8580_v31 }
0x1266   :  { %6444 = vpow2.f32 %v3621_v42 }
0x1267   :  { %v8585_v26 = vpop.eup %6434 }
0x1268   :  { %3665 = vadd.xlane.f32.xlu0 %v8583_v23  ;;  %3659 = vadd.xlane.f32.xlu1 %v8585_v26  ;;  %v8589_v53 = vpop.eup %6436 }
0x126b   :  { %v8591_v57 = vpop.eup %6438 }
0x126c   :  { %3655 = vadd.xlane.f32.xlu1 %v8589_v53  ;;  %3661 = vadd.xlane.f32.xlu0 %v8591_v57  ;;  %v8595_v12 = vpop.eup %6440 }
0x126f   :  { %v8597_v34 = vpop.eup %6442 }
0x1270   :  { %3651 = vadd.xlane.f32.xlu1 %v8595_v12  ;;  %3657 = vadd.xlane.f32.xlu0 %v8597_v34 }
0x1273   :  { %v8601_v19 = vpop.eup %6444 }
0x1274   :  { %3653 = vadd.xlane.f32.xlu0 %v8601_v19 }
0x12cd   :  { %v3680_v2 = vpop.xlane.xlu1 %3679 }
0x12ce   :  { %6446 = vrcp.f32 %v3680_v2 }
0x12d1   :  { %v3676_v11 = vpop.xlane.xlu1 %3675 }
0x12d2   :  { %v3682_v36 = vpop.xlane.xlu0 %3681 }
0x12d3   :  { %6448 = vrcp.f32 %v3682_v36 }
0x12d4   :  { %6450 = vrcp.f32 %v3676_v11 }
0x12d5   :  { %v3672_v39 = vpop.xlane.xlu1 %3671 }
0x12db   :  { %v6447_v3 = vpop.eup %6446 }
0x12dc   :  { %v8605_v55 = vmul.f32 %v6447_v3, %v8547_v6 }
0x12dd   :  { %v3668_v15 = vpop.xlane.xlu1 %3667 }
0x12e0   :  { %v6449_v56 = vpop.eup %6448 }
0x12e1   :  { %v8608_v8 = vmul.f32 %v6449_v56, %v8552_v49  ;;  %v6451_v21 = vpop.eup %6450 }
0x12e2   :  { %v8613_v28 = vmul.f32 %v6451_v21, %v8550_v32 }
0x12e3   :  { %v3763_v27 = vpack.c.bf16 %v8608_v8, %v8605_v55 }
0x12e5   :  { %5894 = vmatprep.subr.bf16.mxu0 %v3763_v27  ;;  %v3678_v62 = vpop.xlane.xlu0 %3677 }
0x12e6   :  { %5895 = vmatpush3.bf16.msra.mxu0 %v3763_v27  ;;  %6452 = vrcp.f32 %v3678_v62 }
0x12e7   :  { %6454 = vrcp.f32 %v3672_v39 }
0x12e9   :  { %v3674_v4 = vpop.xlane.xlu0 %3673  ;;  %v3664_v33 = vpop.xlane.xlu1 %3663 }
0x12ea   :  { %6456 = vrcp.f32 %v3674_v4 }
0x12eb   :  { %6458 = vrcp.f32 %v3668_v15 }
0x12ed   :  { %v3670_v6 = vpop.xlane.xlu0 %3669 }
0x12ee   :  { %6460 = vrcp.f32 %v3670_v6 }
0x12ef   :  { %6462 = vrcp.f32 %v3664_v33 }
0x12f1   :  { %v3660_v49 = vpop.xlane.xlu1 %3659  ;;  %v3666_v22 = vpop.xlane.xlu0 %3665 }
0x12f2   :  { %6464 = vrcp.f32 %v3666_v22 }
0x12f3   :  { %v6453_v37 = vpop.eup %6452  ;;  %6466 = vrcp.f32 %v3660_v49 }
0x12f4   :  { %v8616_v9 = vmul.f32 %v6453_v37, %v8569_v44  ;;  %v6455_v0 = vpop.eup %6454 }
0x12f5   :  { %v3656_v35 = vpop.xlane.xlu1 %3655  ;;  %v3662_v60 = vpop.xlane.xlu0 %3661  ;;  %v8621_v32 = vmul.f32 %v6455_v0, %v8556_v1 }
0x12f6   :  { %v3762_v30 = vpack.c.bf16 %v8616_v9, %v8613_v28  ;;  %6468 = vrcp.f32 %v3662_v60 }
0x12f7   :  { %v6457_v7 = vpop.eup %6456  ;;  %6470 = vrcp.f32 %v3656_v35 }
0x12f8   :  { %5896 = vmatprep.subr.bf16.mxu0 %v3762_v30  ;;  %v6459_v42 = vpop.eup %6458  ;;  %v8624_v44 = vmul.f32 %v6457_v7, %v8572_v14 }
0x12f9   :  { %v3652_v2 = vpop.xlane.xlu1 %3651  ;;  %5897 = vmatpush3.bf16.msra.mxu0 %v3762_v30  ;;  %v3658_v36 = vpop.xlane.xlu0 %3657  ;;  %v3723_v56 = vmul.f32 %v6459_v42, %v8562_v52  ;;  %v3017_v42 = vadd.f32 %v8456_v16, %v8434_v18  ;;  %v3025_v18 = vadd.f32 %v8479_v29, %v8502_v50  ;;  %v6700_v29 = vmov 7  }
0x12fa   :  { %6472 = vrcp.f32 %v3658_v36  ;;  %v3761_v11 = vpack.c.bf16 %v8624_v44, %v8621_v32  ;;  %6034 = vset.pattern.permute.xlu1 %v6700_v29  ;;  %6035 = vset.pattern.permute.xlu0 %v6700_v29 }
0x12fb   :  { %v6461_v3 = vpop.eup %6460  ;;  %6474 = vrcp.f32 %v3652_v2  ;;  %v3021_v2 = vadd.f32 %v8466_v17, %v8464_v46  ;;  %v3023_v46 = vadd.f32 %v8473_v48, %v8476_v5  ;;  %3898 = vperm.xlu1 %6034, %v8380_v25   ;;  %3902 = vperm.xlu0 %6035, %v8386_v54   ;;  %v8664_v48 = vld [vmem:[%s9480_s2] sm:$0xff] }
0x12fc   :  { %v3724_v27 = vmul.f32 %v6461_v3, %v8580_v31  ;;  %5898 = vmatprep.subr.bf16.mxu0 %v3761_v11  ;;  %v6463_v62 = vpop.eup %6462 }
0x12fd   :  { %v3654_v39 = vpop.xlane.xlu0 %3653  ;;  %5899 = vmatpush3.bf16.msra.mxu0 %v3761_v11  ;;  %v3721_v14 = vmul.f32 %v6463_v62, %v8575_v20 }
0x12fe   :  { %6476 = vrcp.f32 %v3654_v39  ;;  %v3760_v1 = vpack.c.bf16 %v3724_v27, %v3723_v56 }
0x12ff   :  { %v6465_v15 = vpop.eup %6464  ;;  %3890 = vperm.xlu1 %6034, %v8368_v45  }
0x1300   :  { %5900 = vmatprep.subr.bf16.mxu0 %v3760_v1  ;;  %v3722_v4 = vmul.f32 %v6465_v15, %v8583_v23  ;;  %v6467_v33 = vpop.eup %6466 }
0x1301   :  { %5901 = vmatpush3.bf16.msra.mxu0 %v3760_v1  ;;  %v3719_v52 = vmul.f32 %v6467_v33, %v8585_v26 }
0x1302   :  { %v3759_v6 = vpack.c.bf16 %v3722_v4, %v3721_v14 }
0x1303   :  { %v6469_v21 = vpop.eup %6468  ;;  %3894 = vperm.xlu1 %6034, %v8374_v61  }
0x1304   :  { %5902 = vmatprep.subr.bf16.mxu0 %v3759_v6  ;;  %v3720_v31 = vmul.f32 %v6469_v21, %v8591_v57  ;;  %v6471_v49 = vpop.eup %6470 }
0x1305   :  { %5903 = vmatpush3.bf16.msra.mxu0 %v3759_v6  ;;  %v3717_v60 = vmul.f32 %v6471_v49, %v8589_v53  ;;  %v8679_v49 = vld [vmem:[%s9483_s5 + $0xf8] sm:$0xff] }
0x1306   :  { %v3758_v22 = vpack.c.bf16 %v3720_v31, %v3719_v52 }
0x1307   :  { %v6473_v37 = vpop.eup %6472  ;;  %3882 = vperm.xlu1 %6034, %v8350_v51  }
0x1308   :  { %v6475_v35 = vpop.eup %6474  ;;  %5904 = vmatprep.subr.bf16.mxu0 %v3758_v22  ;;  %v3718_v20 = vmul.f32 %v6473_v37, %v8597_v34  ;;  %v3015_v34 = vadd.f32 %v8445_v43, %v8409_v24  ;;  %v3755_v24 = vpack.c.bf16 %v3025_v18, %v3023_v46 }
0x1309   :  { %5905 = vmatpush3.bf16.msra.mxu0 %v3758_v22  ;;  %v3715_v30 = vmul.f32 %v6475_v35, %v8595_v12  ;;  %v3019_v12 = vadd.f32 %v8461_v10, %v8454_v13 }
0x130a   :  { %v3757_v0 = vpack.c.bf16 %v3718_v20, %v3717_v60 }
0x130b   :  { %v6477_v23 = vpop.eup %6476  ;;  %v3754_v11 = vpack.c.bf16 %v3021_v2, %v3019_v12  ;;  %3886 = vperm.xlu1 %6034, %v8362_v41   ;;  %v8704_v2 = vld [vmem:[%s9483_s5 + $0xa8] sm:$0xff]  ;;  %v6659_v12 = vld [vmem:[%s9483_s5 + $0x98] sm:$0xff] }
0x130c   :  { %v3716_v7 = vmul.f32 %v6477_v23, %v8601_v19  ;;  %5906 = vmatprep.subr.bf16.mxu0 %v3757_v0  ;;  %v3753_v19 = vpack.c.bf16 %v3017_v42, %v3015_v34  ;;  %v8691_v23 = vld [vmem:[%s9483_s5 + $0xd8] sm:$0xff] }
0x130d   :  { %5907 = vmatpush3.bf16.msra.mxu0 %v3757_v0 }
0x130e   :  { %v3731_v26 = vadd.f32 %v3716_v7, %v3715_v30  ;;  %v3756_v57 = vpack.c.bf16 %v3716_v7, %v3715_v30  ;;  %v8697_v7 = vld [vmem:[%s9483_s5 + $0xb8] sm:$0xff] }
0x130f   :  { %3874 = vperm.xlu1 %6034, %v8664_v48  }
0x1310   :  { %v3732_v53 = vadd.f32 %v3731_v26, %v3717_v60  ;;  %5908 = vmatprep.subr.bf16.mxu0 %v3756_v57  ;;  %v8685_v60 = vld [vmem:[%s9483_s5 + $0xc8] sm:$0xff] }
0x1311   :  { %5909 = vmatpush3.bf16.msra.mxu0 %v3756_v57 }
0x1312   :  { %v3733_v36 = vadd.f32 %v3732_v53, %v3718_v20 }
0x1313   :  { %3878 = vperm.xlu1 %6034, %v8356_v40  }
0x1314   :  { %v3734_v3 = vadd.f32 %v3733_v36, %v3719_v52  ;;  %5911 = vmatmul.mubr.bf16.vlgmr.msra.gmra.mxu0 %v3753_v19  ;;  %v8673_v52 = vld [vmem:[%s9483_s5 + $0xe8] sm:$0xff] }
0x1315   :  { %5914 = vmatprep.mubr.bf16.mxu0 %v3754_v11 }
0x1316   :  { %v3735_v39 = vadd.f32 %v3734_v3, %v3720_v31 }
0x1318   :  { %v3736_v16 = vadd.f32 %v3735_v39, %v3721_v14  ;;  %v6071_v39 = vld [vmem:[%s9482_s4 + $0x40] sm:$0xff]  }
0x131a   :  { %v3737_v17 = vadd.f32 %v3736_v16, %v3722_v4 }
0x131c   :  { %v3738_v43 = vadd.f32 %v3737_v17, %v3723_v56  ;;  %5915 = vmatmul.mubr.bf16.gmra.mxu0 %v3755_v24 }
0x131d   :  { %3969 = vmatprep.mubr.bf16.mxu0 %v9571_v63 }
0x131e   :  { %v3739_v13 = vadd.f32 %v3738_v43, %v3724_v27 }
0x1320   :  { %v3740_v10 = vadd.f32 %v3739_v13, %v8621_v32 }
0x1322   :  { %v3741_v62 = vadd.f32 %v3740_v10, %v8624_v44 }
0x1324   :  { %v3742_v1 = vadd.f32 %v3741_v62, %v8613_v28 }
0x1326   :  { %v3743_v15 = vadd.f32 %v3742_v1, %v8616_v9 }
0x1328   :  { %v3744_v25 = vadd.f32 %v3743_v15, %v8605_v55 }
0x132a   :  { %v3745_v54 = vadd.f32 %v3744_v25, %v8608_v8 }
0x132c   :  { %v3746_v45 = vrot.slane %v3745_v54, 4 }
0x132e   :  { %v3747_v5 = vadd.f32 %v3746_v45, %v3745_v54  ;;  %v6661_v54 = vld [vmem:[%s9483_s5 + $0x80] sm:$0xff] }
0x1330   :  { %v3748_v61 = vrot.slane %v3747_v5, 2 }
0x1332   :  { %v3749_v50 = vadd.f32 %v3748_v61, %v3747_v5 }
0x1334   :  { %v3750_v51 = vrot.slane %v3749_v50, 1 }
0x1336   :  { %v3751_v28 = vadd.f32 %v3750_v51, %v3749_v50 }
0x1338   :  { %v3829_v41 = vadd.f32 1e-09, %v3751_v28 }
0x133a   :  { %6478 = vrcp.f32 %v3829_v41 }
0x1347   :  { %v6479_v14 = vpop.eup %6478 }
0x1376   :  { %v8735_v18 = vpop.permute.xlu1 %3898 }
0x137a   :  { %v3891_v16 = vpop.permute.xlu1 %3890 }
0x137e   :  { %v8737_v46 = vpop.permute.xlu1 %3894 }
0x1382   :  { %v3883_v17 = vpop.permute.xlu1 %3882 }
0x1386   :  { %v3887_v24 = vpop.permute.xlu1 %3886 }
0x138a   :  { %v3875_v43 = vpop.permute.xlu1 %3874 }
0x138e   :  { %v3879_v1 = vpop.permute.xlu1 %3878 }
0x13d4   :  { %v5912_v9 = vpop.f32.mrf.mxu0 }
0x13d5   :  { %v3834_v35 = vmul.f32 %v6479_v14, %v5912_v9 }
0x13d6   :  { %v3798_v32 = vpop.f32.mrf.mxu0 }
0x13d7   :  { %v3854_v53 = vsub.f32 %v8704_v2, %v3834_v35  ;;  %v3832_v34 = vmul.f32 %v6479_v14, %v3798_v32  ;;  %v6662_v32 = vld [vmem:[%s9483_s5 + $0x90] sm:$0xff] }
0x13d8   :  { %v5913_v44 = vpop.f32.mrf.mxu0 }
0x13d9   :  { %v3835_v21 = vmul.f32 %v6479_v14, %v5913_v44 }
0x13da   :  { %v3801_v56 = vpop.f32.mrf.mxu0 }
0x13db   :  { %v3856_v26 = vsub.f32 %v8697_v7, %v3835_v21  ;;  %v3833_v57 = vmul.f32 %v6479_v14, %v3801_v56 }
0x13dc   :  { %v5916_v27 = vpop.f32.mrf.mxu0 }
0x13dd   :  { %v3838_v40 = vmul.f32 %v6479_v14, %v5916_v27  ;;  %v3852_v36 = vsub.f32 %v6659_v12, %v3833_v57  ;;  %v3868_v19 = vpack.c.bf16 %v3856_v26, %v3854_v53 }
0x13de   :  { %v3814_v4 = vpop.f32.mrf.mxu0 }
0x13df   :  { %v3836_v55 = vmul.f32 %v6479_v14, %v3814_v4  ;;  %v3862_v31 = vsub.f32 %v8673_v52, %v3838_v40 }
0x13e0   :  { %v5917_v33 = vpop.f32.mrf.mxu0 }
0x13e1   :  { %v3839_v6 = vmul.f32 %v6479_v14, %v5917_v33  ;;  %v3858_v20 = vsub.f32 %v8685_v60, %v3836_v55 }
0x13e2   :  { %v3817_v8 = vpop.f32.mrf.mxu0 }
0x13e3   :  { %v3864_v22 = vsub.f32 %v8679_v49, %v3839_v6  ;;  %v3837_v37 = vmul.f32 %v6479_v14, %v3817_v8  ;;  %v6663_v6 = vld [vmem:[%s9483_s5 + $0xa0] sm:$0xff] }
0x13e5   :  { %v3860_v0 = vsub.f32 %v8691_v23, %v3837_v37  ;;  %v3872_v30 = vpack.c.bf16 %v3864_v22, %v3862_v31 }
0x13e7   :  { %3945 = vmatprep.subr.bf16.mxu0 %v3872_v30  ;;  %v3870_v42 = vpack.c.bf16 %v3860_v0, %v3858_v20  ;;  %v6664_v30 = vld [vmem:[%s9483_s5 + $0xb0] sm:$0xff] }
0x13e8   :  { %3946 = vmatpush1.bf16.msra.mxu0 %v8517_v38  ;;  %v6660_v38 = vld [vmem:[%s9483_s5 + $0x88] sm:$0xff] }
0x13e9   :  { %3947 = vmatprep.subr.bf16.mxu0 %v3870_v42  ;;  %v3850_v3 = vsub.f32 %v6660_v38, %v3832_v34 }
0x13eb   :  { %v3866_v11 = vpack.c.bf16 %v3852_v36, %v3850_v3 }
0x13ec   :  { %3948 = vmatpush1.bf16.msra.mxu0 %v8522_v47  ;;  %v6072_v47 = vld [vmem:[%s9482_s4 + $0x48] sm:$0xff]  }
0x13ed   :  { %3949 = vmatprep.subr.bf16.mxu0 %v3868_v19  ;;  %v6665_v19 = vld [vmem:[%s9483_s5 + $0xc0] sm:$0xff] }
0x13f0   :  { %3950 = vmatpush1.bf16.msra.mxu0 %v8507_v58  ;;  %v6073_v58 = vld [vmem:[%s9482_s4 + $0x50] sm:$0xff]  }
0x13f1   :  { %3951 = vmatprep.subr.bf16.mxu0 %v3866_v11 }
0x13f4   :  { %3952 = vmatpush1.bf16.msra.mxu0 %v8510_v59  ;;  %v6074_v59 = vld [vmem:[%s9482_s4 + $0x58] sm:$0xff]  }
0x13f7   :  { %5442 = vmatmul.mubr.msk.bf16.vlgmr.msra.gmra.mxu0 %vm121_vm0, %v6071_v39 }
0x13f8   :  { %3979 = vmatprep.mubr.bf16.mxu0 %v9571_v63 }
0x13ff   :  { %5443 = vmatmul.mubr.msk.bf16.gmra.mxu0 %vm121_vm0, %v6072_v47 }
0x1400   :  { %3989 = vmatprep.mubr.bf16.mxu0 %v9571_v63 }
0x1407   :  { %5444 = vmatmul.mubr.msk.bf16.gmra.mxu0 %vm121_vm0, %v6073_v58 }
0x1408   :  { %3999 = vmatprep.mubr.bf16.mxu0 %v9571_v63 }
0x140f   :  { %5445 = vmatmul.mubr.msk.bf16.gmra.mxu0 %vm121_vm0, %v6074_v59 }
0x14b7   :  { %v3971_v13 = vpop.f32.mrf.mxu0 }
0x14b8   :  { %v3972_v10 = vadd.f32 %v3971_v13, %v3875_v43 }
0x14b9   :  { %v3973_v62 = vpop.f32.mrf.mxu0 }
0x14ba   :  { %v4010_v15 = vmax.f32 %v3972_v10, 0.0  ;;  %v3974_v29 = vadd.f32 %v3973_v62, %v3875_v43  ;;  %v3903_v10 = vpop.permute.xlu0 %3902 }
0x14bb   :  { %v3975_v25 = vpop.f32.mrf.mxu0 }
0x14bc   :  { %v8742_v45 = vadd.f32 %v6661_v54, %v4010_v15  ;;  %v4011_v5 = vmax.f32 %v3974_v29, 0.0  ;;  %v3976_v61 = vadd.f32 %v3975_v25, %v3879_v1  ;;  %v6667_v15 = vld [vmem:[%s9483_s5 + $0xe0] sm:$0xff] }
0x14bd   :  { %v3977_v50 = vpop.f32.mrf.mxu0 }
0x14be   :  { %4042 = vst [vmem:[%s9483_s5 + $0x100] sm:$0xff] %v8742_v45  ;;  %v8748_v51 = vadd.f32 %v6660_v38, %v4011_v5  ;;  %v4012_v28 = vmax.f32 %v3976_v61, 0.0  ;;  %v3978_v41 = vadd.f32 %v3977_v50, %v3879_v1  ;;  %v6668_v50 = vld [vmem:[%s9483_s5 + $0xf0] sm:$0xff] }
0x14bf   :  { %v3981_v9 = vpop.f32.mrf.mxu0 }
0x14c0   :  { %4043 = vst [vmem:[%s9483_s5 + $0x108] sm:$0xff] %v8748_v51  ;;  %v8757_v44 = vadd.f32 %v6662_v32, %v4012_v28  ;;  %v4013_v56 = vmax.f32 %v3978_v41, 0.0  ;;  %v3982_v27 = vadd.f32 %v3981_v9, %v3883_v17 }
0x14c1   :  { %v3983_v14 = vpop.f32.mrf.mxu0 }
0x14c2   :  { %4044 = vst [vmem:[%s9483_s5 + $0x110] sm:$0xff] %v8757_v44  ;;  %v8763_v4 = vadd.f32 %v6659_v12, %v4013_v56  ;;  %v4014_v40 = vmax.f32 %v3982_v27, 0.0  ;;  %v3984_v33 = vadd.f32 %v3983_v14, %v3883_v17 }
0x14c3   :  { %v3985_v55 = vpop.f32.mrf.mxu0 }
0x14c4   :  { %4045 = vst [vmem:[%s9483_s5 + $0x118] sm:$0xff] %v8763_v4  ;;  %v8772_v8 = vadd.f32 %v6663_v6, %v4014_v40  ;;  %v4015_v21 = vmax.f32 %v3984_v33, 0.0  ;;  %v3986_v31 = vadd.f32 %v3985_v55, %v3887_v24  ;;  %v4058_v33 = vpack.c.bf16 %v8757_v44, %v8742_v45  ;;  %v6075_v55 = vld [vmem:[%s9481_s3 + $0x78] sm:$0xff]  }
0x14c5   :  { %v3987_v22 = vpop.f32.mrf.mxu0 }
0x14c6   :  { %4046 = vst [vmem:[%s9483_s5 + $0x120] sm:$0xff] %v8772_v8  ;;  %v8779_v37 = vadd.f32 %v8704_v2, %v4015_v21  ;;  %v4016_v35 = vmax.f32 %v3986_v31, 0.0  ;;  %v3988_v20 = vadd.f32 %v3987_v22, %v3887_v24 }
0x14c7   :  { %v3991_v0 = vpop.f32.mrf.mxu0 }
0x14c8   :  { %4047 = vst [vmem:[%s9483_s5 + $0x128] sm:$0xff] %v8779_v37  ;;  %v4032_v26 = vadd.f32 %v6664_v30, %v4016_v35  ;;  %v4017_v57 = vmax.f32 %v3988_v20, 0.0  ;;  %v3992_v42 = vadd.f32 %v3991_v0, %v3891_v16 }
0x14c9   :  { %v3993_v53 = vpop.f32.mrf.mxu0 }
0x14ca   :  { %4048 = vst [vmem:[%s9483_s5 + $0x130] sm:$0xff] %v4032_v26  ;;  %v4033_v2 = vadd.f32 %v8697_v7, %v4017_v57  ;;  %v4018_v34 = vmax.f32 %v3992_v42, 0.0  ;;  %v3994_v12 = vadd.f32 %v3993_v53, %v3891_v16  ;;  %v6666_v16 = vld [vmem:[%s9483_s5 + $0xd0] sm:$0xff]  ;;  %v4060_v40 = vpack.c.bf16 %v4032_v26, %v8772_v8 }
0x14cb   :  { %v3995_v36 = vpop.f32.mrf.mxu0 }
0x14cc   :  { %4049 = vst [vmem:[%s9483_s5 + $0x138] sm:$0xff] %v4033_v2  ;;  %v4034_v38 = vadd.f32 %v6665_v19, %v4018_v34  ;;  %v4019_v3 = vmax.f32 %v3994_v12, 0.0  ;;  %v3996_v11 = vadd.f32 %v3995_v36, %v8737_v46  ;;  %v4061_v14 = vpack.c.bf16 %v4033_v2, %v8779_v37 }
0x14cd   :  { %v3997_v39 = vpop.f32.mrf.mxu0 }
0x14ce   :  { %4050 = vst [vmem:[%s9483_s5 + $0x140] sm:$0xff] %v4034_v38  ;;  %v4035_v7 = vadd.f32 %v8685_v60, %v4019_v3  ;;  %v4020_v47 = vmax.f32 %v3996_v11, 0.0  ;;  %v3998_v58 = vadd.f32 %v3997_v39, %v8737_v46 }
0x14cf   :  { %v4001_v59 = vpop.f32.mrf.mxu0 }
0x14d0   :  { %4051 = vst [vmem:[%s9483_s5 + $0x148] sm:$0xff] %v4035_v7  ;;  %v4036_v17 = vadd.f32 %v6666_v16, %v4020_v47  ;;  %v4021_v24 = vmax.f32 %v3998_v58, 0.0  ;;  %v4002_v43 = vadd.f32 %v4001_v59, %v8735_v18 }
0x14d1   :  { %v4003_v13 = vpop.f32.mrf.mxu0 }
0x14d2   :  { %4052 = vst [vmem:[%s9483_s5 + $0x150] sm:$0xff] %v4036_v17  ;;  %v4037_v60 = vadd.f32 %v8691_v23, %v4021_v24  ;;  %v4022_v46 = vmax.f32 %v4002_v43, 0.0  ;;  %v4004_v62 = vadd.f32 %v4003_v13, %v8735_v18  ;;  %v4062_v27 = vpack.c.bf16 %v4036_v17, %v4034_v38 }
0x14d3   :  { %v4005_v1 = vpop.f32.mrf.mxu0 }
0x14d4   :  { %4053 = vst [vmem:[%s9483_s5 + $0x158] sm:$0xff] %v4037_v60  ;;  %v4038_v29 = vadd.f32 %v6667_v15, %v4022_v46  ;;  %v4023_v25 = vmax.f32 %v4004_v62, 0.0  ;;  %v4006_v54 = vadd.f32 %v4005_v1, %v3903_v10  ;;  %v4063_v56 = vpack.c.bf16 %v4037_v60, %v4035_v7  ;;  %v6077_v15 = vld [vmem:[%s9481_s3 + $0x88] sm:$0xff]  }
0x14d5   :  { %v4007_v5 = vpop.f32.mrf.mxu0 }
0x14d6   :  { %4054 = vst [vmem:[%s9483_s5 + $0x160] sm:$0xff] %v4038_v29  ;;  %v4039_v23 = vadd.f32 %v8673_v52, %v4023_v25  ;;  %v4024_v18 = vmax.f32 %v4006_v54, 0.0  ;;  %v4008_v61 = vadd.f32 %v4007_v5, %v3903_v10  ;;  %v6076_v10 = vld [vmem:[%s9481_s3 + $0x80] sm:$0xff]  }
0x14d8   :  { %4055 = vst [vmem:[%s9483_s5 + $0x168] sm:$0xff] %v4039_v23  ;;  %v4040_v28 = vadd.f32 %v6668_v50, %v4024_v18  ;;  %v4025_v41 = vmax.f32 %v4008_v61, 0.0 }
0x14da   :  { %4056 = vst [vmem:[%s9483_s5 + $0x170] sm:$0xff] %v4040_v28  ;;  %v4041_v9 = vadd.f32 %v8679_v49, %v4025_v41  ;;  %v4064_v32 = vpack.c.bf16 %v4040_v28, %v4038_v29  ;;  %v4059_v49 = vpack.c.bf16 %v8763_v4, %v8748_v51 }
0x14dc   :  { %4057 = vst [vmem:[%s9483_s5 + $0x178] sm:$0xff] %v4041_v9  ;;  %v4065_v52 = vpack.c.bf16 %v4041_v9, %v4039_v23 }
0x14de   :  { %4125 = vmatprep.subr.bf16.mxu1 %v4065_v52 }
0x14df   :  { %4126 = vmatpush1.bf16.msra.mxu1 %v4064_v32 }
0x14e0   :  { %4127 = vmatprep.subr.bf16.mxu1 %v4063_v56 }
0x14e3   :  { %4128 = vmatpush1.bf16.msra.mxu1 %v4062_v27  ;;  %v6078_v27 = vld [vmem:[%s9481_s3 + $0x90] sm:$0xff]  }
0x14e4   :  { %4129 = vmatprep.subr.bf16.mxu1 %v4061_v14  ;;  %v6701_v14 = vmov 8  }
0x14e7   :  { %4130 = vmatpush1.bf16.msra.mxu1 %v4060_v40  ;;  %v6079_v40 = vld [vmem:[%s9481_s3 + $0x98] sm:$0xff]  }
0x14e8   :  { %4131 = vmatprep.subr.bf16.mxu1 %v4059_v49 }
0x14eb   :  { %4132 = vmatpush1.bf16.msra.mxu1 %v4058_v33 }
0x14ee   :  { %5461 = vmatmul.mubr.msk.bf16.vlgmr.msra.gmra.mxu1 %vm121_vm0, %v6075_v55 }
0x14ef   :  { %4159 = vmatprep.mubr.bf16.mxu1 %v9571_v63 }
0x14f6   :  { %5462 = vmatmul.mubr.msk.bf16.gmra.mxu1 %vm121_vm0, %v6076_v10 }
0x14f7   :  { %4169 = vmatprep.mubr.bf16.mxu1 %v9571_v63 }
0x14fe   :  { %5463 = vmatmul.mubr.msk.bf16.gmra.mxu1 %vm121_vm0, %v6077_v15 }
0x14ff   :  { %4179 = vmatprep.mubr.bf16.mxu1 %v9571_v63 }
0x1506   :  { %5464 = vmatmul.mubr.msk.bf16.gmra.mxu1 %vm121_vm0, %v6078_v27 }
0x1507   :  { %4189 = vmatprep.mubr.bf16.mxu1 %v9571_v63 }
0x150e   :  { %5465 = vmatmul.mubr.msk.bf16.gmra.mxu1 %vm121_vm0, %v6079_v40 }
0x15ae   :  { %v4151_v6 = vpop.f32.mrf.mxu1 }
0x15b0   :  { %v4153_v21 = vpop.f32.mrf.mxu1 }
0x15b2   :  { %v4155_v8 = vpop.f32.mrf.mxu1 }
0x15b3   :  { %v4248_v31 = vpack.c.bf16 %v4155_v8, %v4151_v6 }
0x15b4   :  { %v4157_v22 = vpop.f32.mrf.mxu1 }
0x15b5   :  { %v4655_v51 = vpack.c.bf16 %v4157_v22, %v4153_v21  ;;  %4249 = vxpose.xlu1.c.b16.start.end [1/1] (short) %v4248_v31, 128  ;;  %5918 = vmatprep.subr.bf16.mxu0 %v4248_v31 }
0x15b6   :  { %5919 = vmatpush3.bf16.msra.mxu0 %v4248_v31 }
0x15b7   :  { %4656 = vxpose.xlu0.c.b16.start.end [1/1] (short) %v4655_v51, 128  ;;  %5960 = vmatprep.subr.bf16.mxu0 %v4655_v51 }
0x15b9   :  { %6037 = vset.pattern.permute.xlu1 %v6701_v14 }
0x15c0   :  { %6036 = vset.pattern.permute.xlu0 %v6701_v14 }
0x1617   :  { %v4257_v45 = vpop.trf.xlu1 }
0x1618   :  { %5920 = vmatprep.mubr.msk.bf16.mxu0 %vm599_vm1, %v4257_v45 }
0x1619   :  { %v4664_v20 = vpop.trf.xlu0 }
0x161b   :  { %v4258_v44 = vpop.trf.xlu1 }
0x161c   :  { %5921 = vmatmul.mubr.msk.bf16.vlgmr.msra.gmra.mxu0 %vm599_vm1, %v4258_v44 }
0x161d   :  { %5961 = vmatpush3.bf16.msra.mxu0 %v4655_v51  ;;  %v4665_v30 = vpop.trf.xlu0 }
0x161f   :  { %v4259_v4 = vpop.trf.xlu1 }
0x1620   :  { %5924 = vmatprep.mubr.msk.bf16.mxu0 %vm599_vm1, %v4259_v4 }
0x1621   :  { %v4666_v42 = vpop.trf.xlu0 }
0x1623   :  { %v4260_v37 = vpop.trf.xlu1 }
0x1624   :  { %5925 = vmatmul.mubr.msk.bf16.gmra.mxu0 %vm599_vm1, %v4260_v37 }
0x1625   :  { %v4667_v53 = vpop.trf.xlu0 }
0x1627   :  { %v4261_v35 = vpop.trf.xlu1 }
0x1628   :  { %5928 = vmatprep.mubr.msk.bf16.mxu0 %vm599_vm1, %v4261_v35 }
0x1629   :  { %v4668_v2 = vpop.trf.xlu0 }
0x162b   :  { %v4262_v0 = vpop.trf.xlu1 }
0x162c   :  { %5929 = vmatmul.mubr.msk.bf16.gmra.mxu0 %vm599_vm1, %v4262_v0 }
0x162d   :  { %v4669_v34 = vpop.trf.xlu0 }
0x162f   :  { %v4263_v26 = vpop.trf.xlu1 }
0x1630   :  { %5932 = vmatprep.mubr.msk.bf16.mxu0 %vm599_vm1, %v4263_v26 }
0x1631   :  { %v4670_v12 = vpop.trf.xlu0 }
0x1633   :  { %v4264_v57 = vpop.trf.xlu1 }
0x1634   :  { %5933 = vmatmul.mubr.msk.bf16.gmra.mxu0 %vm599_vm1, %v4264_v57 }
0x1635   :  { %5962 = vmatprep.mubr.msk.bf16.mxu0 %vm599_vm1, %v4664_v20  ;;  %v4671_v36 = vpop.trf.xlu0 }
0x163c   :  { %5963 = vmatmul.mubr.msk.bf16.vlgmr.msra.gmra.mxu0 %vm599_vm1, %v4665_v30 }
0x163d   :  { %5966 = vmatprep.mubr.msk.bf16.mxu0 %vm599_vm1, %v4666_v42 }
0x1644   :  { %5967 = vmatmul.mubr.msk.bf16.gmra.mxu0 %vm599_vm1, %v4667_v53 }
0x1645   :  { %5970 = vmatprep.mubr.msk.bf16.mxu0 %vm599_vm1, %v4668_v2 }
0x164c   :  { %5971 = vmatmul.mubr.msk.bf16.gmra.mxu0 %vm599_vm1, %v4669_v34 }
0x164d   :  { %5974 = vmatprep.mubr.msk.bf16.mxu0 %vm599_vm1, %v4670_v12 }
0x1654   :  { %5975 = vmatmul.mubr.msk.bf16.gmra.mxu0 %vm599_vm1, %v4671_v36 }
0x1655   :  { %5191 = vmatprep.mubr.bf16.mxu0 %v9571_v63 }
0x16dc   :  { %v8867_v19 = vpop.f32.mrf.mxu0 }
0x16dd   :  { %4390 = vmax.xlane.f32.xlu0 %v8867_v19 }
0x16de   :  { %v8870_v38 = vpop.f32.mrf.mxu0 }
0x16e0   :  { %v8872_v3 = vpop.f32.mrf.mxu0 }
0x16e1   :  { %4392 = vmax.xlane.f32.xlu1 %v8872_v3  ;;  %4386 = vmax.xlane.f32.xlu0 %v8870_v38 }
0x16e2   :  { %v8876_v11 = vpop.f32.mrf.mxu0 }
0x16e4   :  { %v8878_v39 = vpop.f32.mrf.mxu0 }
0x16e5   :  { %4388 = vmax.xlane.f32.xlu1 %v8876_v11  ;;  %4398 = vmax.xlane.f32.xlu0 %v8878_v39 }
0x16e6   :  { %v8882_v7 = vpop.f32.mrf.mxu0 }
0x16e8   :  { %v8884_v47 = vpop.f32.mrf.mxu0 }
0x16e9   :  { %4400 = vmax.xlane.f32.xlu1 %v8884_v47  ;;  %4394 = vmax.xlane.f32.xlu0 %v8882_v7 }
0x16ea   :  { %v8888_v58 = vpop.f32.mrf.mxu0 }
0x16ec   :  { %v8890_v59 = vpop.f32.mrf.mxu0 }
0x16ed   :  { %4396 = vmax.xlane.f32.xlu1 %v8888_v58  ;;  %4406 = vmax.xlane.f32.xlu0 %v8890_v59 }
0x16ee   :  { %v8894_v16 = vpop.f32.mrf.mxu0 }
0x16f0   :  { %v8896_v17 = vpop.f32.mrf.mxu0 }
0x16f1   :  { %4408 = vmax.xlane.f32.xlu1 %v8896_v17  ;;  %4402 = vmax.xlane.f32.xlu0 %v8894_v16 }
0x16f2   :  { %v8900_v24 = vpop.f32.mrf.mxu0 }
0x16f4   :  { %v8902_v43 = vpop.f32.mrf.mxu0 }
0x16f5   :  { %4404 = vmax.xlane.f32.xlu1 %v8900_v24  ;;  %4414 = vmax.xlane.f32.xlu0 %v8902_v43 }
0x16f6   :  { %v8906_v13 = vpop.f32.mrf.mxu0 }
0x16f8   :  { %v8911_v60 = vpop.f32.mrf.mxu0 }
0x16f9   :  { %4416 = vmax.xlane.f32.xlu1 %v8911_v60  ;;  %4410 = vmax.xlane.f32.xlu0 %v8906_v13 }
0x16fa   :  { %v8915_v46 = vpop.f32.mrf.mxu0 }
0x16fc   :  { %v8919_v62 = vpop.f32.mrf.mxu0 }
0x16fd   :  { %4412 = vmax.xlane.f32.xlu1 %v8915_v46  ;;  %4797 = vmax.xlane.f32.xlu0 %v8919_v62 }
0x16fe   :  { %v8923_v1 = vpop.f32.mrf.mxu0 }
0x1700   :  { %v8928_v29 = vpop.f32.mrf.mxu0 }
0x1701   :  { %4793 = vmax.xlane.f32.xlu0 %v8923_v1  ;;  %4799 = vmax.xlane.f32.xlu1 %v8928_v29 }
0x1702   :  { %v8932_v25 = vpop.f32.mrf.mxu0 }
0x1704   :  { %v8936_v54 = vpop.f32.mrf.mxu0 }
0x1705   :  { %4795 = vmax.xlane.f32.xlu1 %v8932_v25  ;;  %4805 = vmax.xlane.f32.xlu0 %v8936_v54 }
0x1706   :  { %v8940_v5 = vpop.f32.mrf.mxu0 }
0x1708   :  { %v8942_v23 = vpop.f32.mrf.mxu0 }
0x1709   :  { %4801 = vmax.xlane.f32.xlu0 %v8940_v5  ;;  %4807 = vmax.xlane.f32.xlu1 %v8942_v23 }
0x170a   :  { %v8946_v18 = vpop.f32.mrf.mxu0 }
0x170c   :  { %v8948_v61 = vpop.f32.mrf.mxu0 }
0x170d   :  { %4803 = vmax.xlane.f32.xlu1 %v8946_v18  ;;  %4813 = vmax.xlane.f32.xlu0 %v8948_v61 }
0x170e   :  { %v8952_v50 = vpop.f32.mrf.mxu0 }
0x1710   :  { %v8954_v28 = vpop.f32.mrf.mxu0 }
0x1711   :  { %4809 = vmax.xlane.f32.xlu0 %v8952_v50  ;;  %4815 = vmax.xlane.f32.xlu1 %v8954_v28 }
0x1712   :  { %v8958_v41 = vpop.f32.mrf.mxu0 }
0x1714   :  { %v8960_v9 = vpop.f32.mrf.mxu0 }
0x1715   :  { %4811 = vmax.xlane.f32.xlu1 %v8958_v41  ;;  %4821 = vmax.xlane.f32.xlu0 %v8960_v9 }
0x1716   :  { %v8964_v52 = vpop.f32.mrf.mxu0 }
0x1718   :  { %v8966_v32 = vpop.f32.mrf.mxu0 }
0x1719   :  { %4817 = vmax.xlane.f32.xlu0 %v8964_v52  ;;  %4823 = vmax.xlane.f32.xlu1 %v8966_v32 }
0x171a   :  { %v8970_v56 = vpop.f32.mrf.mxu0 }
0x171d   :  { %4819 = vmax.xlane.f32.xlu1 %v8970_v56 }
0x1766   :  { %v4391_v49 = vpop.xlane.xlu0 %4390 }
0x1767   :  { %v4420_v33 = vsub.f32 %v8867_v19, %v4391_v49 }
0x1769   :  { %v4438_v55 = vmul.f32 1.442695, %v4420_v33 }
0x176a   :  { %v4393_v6 = vpop.xlane.xlu1 %4392  ;;  %v4387_v21 = vpop.xlane.xlu0 %4386 }
0x176b   :  { %6480 = vpow2.f32 %v4438_v55  ;;  %v4421_v8 = vsub.f32 %v8872_v3, %v4393_v6  ;;  %v4418_v31 = vsub.f32 %v8870_v38, %v4387_v21 }
0x176d   :  { %v4440_v22 = vmul.f32 1.442695, %v4421_v8  ;;  %v4434_v51 = vmul.f32 1.442695, %v4418_v31 }
0x176e   :  { %v4389_v45 = vpop.xlane.xlu1 %4388  ;;  %v4399_v44 = vpop.xlane.xlu0 %4398 }
0x176f   :  { %6482 = vpow2.f32 %v4440_v22  ;;  %v4419_v4 = vsub.f32 %v8876_v11, %v4389_v45  ;;  %v4424_v37 = vsub.f32 %v8878_v39, %v4399_v44 }
0x1770   :  { %6484 = vpow2.f32 %v4434_v51 }
0x1771   :  { %v4436_v35 = vmul.f32 1.442695, %v4419_v4  ;;  %v4446_v20 = vmul.f32 1.442695, %v4424_v37 }
0x1772   :  { %v4401_v0 = vpop.xlane.xlu1 %4400  ;;  %v4395_v30 = vpop.xlane.xlu0 %4394 }
0x1773   :  { %6486 = vpow2.f32 %v4436_v35  ;;  %v4425_v26 = vsub.f32 %v8884_v47, %v4401_v0  ;;  %v4422_v57 = vsub.f32 %v8882_v7, %v4395_v30 }
0x1774   :  { %6488 = vpow2.f32 %v4446_v20 }
0x1775   :  { %v4448_v42 = vmul.f32 1.442695, %v4425_v26  ;;  %v4442_v53 = vmul.f32 1.442695, %v4422_v57 }
0x1776   :  { %v4397_v2 = vpop.xlane.xlu1 %4396  ;;  %v4407_v34 = vpop.xlane.xlu0 %4406 }
0x1777   :  { %6490 = vpow2.f32 %v4448_v42  ;;  %v4423_v12 = vsub.f32 %v8888_v58, %v4397_v2  ;;  %v4428_v36 = vsub.f32 %v8890_v59, %v4407_v34 }
0x1778   :  { %v8991_v19 = vpop.eup %6480  ;;  %6492 = vpow2.f32 %v4442_v53 }
0x1779   :  { %v4444_v38 = vmul.f32 1.442695, %v4423_v12  ;;  %v4454_v3 = vmul.f32 1.442695, %v4428_v36  ;;  %4470 = vadd.xlane.f32.xlu0 %v8991_v19 }
0x177a   :  { %v4409_v11 = vpop.xlane.xlu1 %4408  ;;  %v4403_v39 = vpop.xlane.xlu0 %4402 }
0x177b   :  { %6494 = vpow2.f32 %v4444_v38  ;;  %v4429_v7 = vsub.f32 %v8896_v17, %v4409_v11  ;;  %v4426_v47 = vsub.f32 %v8894_v16, %v4403_v39 }
0x177c   :  { %v8996_v10 = vpop.eup %6482  ;;  %6496 = vpow2.f32 %v4454_v3 }
0x177d   :  { %v8998_v58 = vpop.eup %6484  ;;  %v4456_v59 = vmul.f32 1.442695, %v4429_v7  ;;  %v4450_v15 = vmul.f32 1.442695, %v4426_v47  ;;  %4472 = vadd.xlane.f32.xlu1 %v8996_v10 }
0x177e   :  { %4466 = vadd.xlane.f32.xlu0 %v8998_v58  ;;  %v4405_v27 = vpop.xlane.xlu1 %4404  ;;  %v4415_v14 = vpop.xlane.xlu0 %4414 }
0x177f   :  { %6498 = vpow2.f32 %v4456_v59  ;;  %v4427_v40 = vsub.f32 %v8900_v24, %v4405_v27  ;;  %v4432_v17 = vsub.f32 %v8902_v43, %v4415_v14 }
0x1780   :  { %v9004_v49 = vpop.eup %6486  ;;  %6500 = vpow2.f32 %v4450_v15 }
0x1781   :  { %v9006_v16 = vpop.eup %6488  ;;  %v4452_v33 = vmul.f32 1.442695, %v4427_v40  ;;  %v4462_v55 = vmul.f32 1.442695, %v4432_v17  ;;  %4468 = vadd.xlane.f32.xlu1 %v9004_v49 }
0x1782   :  { %4478 = vadd.xlane.f32.xlu0 %v9006_v16  ;;  %v4417_v6 = vpop.xlane.xlu1 %4416  ;;  %v4411_v21 = vpop.xlane.xlu0 %4410 }
0x1783   :  { %6502 = vpow2.f32 %v4452_v33  ;;  %v4433_v8 = vsub.f32 %v8911_v60, %v4417_v6  ;;  %v4430_v24 = vsub.f32 %v8906_v13, %v4411_v21 }
0x1784   :  { %v9012_v31 = vpop.eup %6490  ;;  %6504 = vpow2.f32 %v4462_v55 }
0x1785   :  { %v9014_v43 = vpop.eup %6492  ;;  %v4464_v22 = vmul.f32 1.442695, %v4433_v8  ;;  %v4458_v51 = vmul.f32 1.442695, %v4430_v24  ;;  %4480 = vadd.xlane.f32.xlu1 %v9012_v31 }
0x1786   :  { %4474 = vadd.xlane.f32.xlu0 %v9014_v43  ;;  %v4413_v45 = vpop.xlane.xlu1 %4412  ;;  %v9018_v44 = vpop.xlane.xlu0 %4797 }
0x1787   :  { %6506 = vpow2.f32 %v4464_v22  ;;  %v4431_v4 = vsub.f32 %v8915_v46, %v4413_v45 }
0x1788   :  { %v9021_v60 = vpop.eup %6494  ;;  %6508 = vpow2.f32 %v4458_v51 }
0x1789   :  { %v9023_v13 = vpop.eup %6496  ;;  %v4460_v37 = vmul.f32 1.442695, %v4431_v4  ;;  %4476 = vadd.xlane.f32.xlu1 %v9021_v60 }
0x178a   :  { %4486 = vadd.xlane.f32.xlu0 %v9023_v13  ;;  %v9027_v35 = vpop.xlane.xlu0 %4793  ;;  %v9029_v20 = vpop.xlane.xlu1 %4799 }
0x178b   :  { %6510 = vpow2.f32 %v4460_v37 }
0x178c   :  { %v9031_v0 = vpop.eup %6498 }
0x178d   :  { %v9033_v30 = vpop.eup %6500  ;;  %4488 = vadd.xlane.f32.xlu1 %v9031_v0 }
0x178e   :  { %4482 = vadd.xlane.f32.xlu0 %v9033_v30  ;;  %v9037_v46 = vpop.xlane.xlu1 %4795  ;;  %v4806_v26 = vpop.xlane.xlu0 %4805 }
0x178f   :  { %v4831_v57 = vsub.f32 %v8936_v54, %v4806_v26 }
0x1790   :  { %v9040_v42 = vpop.eup %6502 }
0x1791   :  { %v9042_v53 = vpop.eup %6504  ;;  %v4853_v2 = vmul.f32 1.442695, %v4831_v57  ;;  %4484 = vadd.xlane.f32.xlu1 %v9040_v42 }
0x1792   :  { %4494 = vadd.xlane.f32.xlu0 %v9042_v53  ;;  %v4802_v34 = vpop.xlane.xlu0 %4801  ;;  %v4808_v12 = vpop.xlane.xlu1 %4807 }
0x1793   :  { %v4829_v36 = vsub.f32 %v8940_v5, %v4802_v34  ;;  %v4832_v38 = vsub.f32 %v8942_v23, %v4808_v12  ;;  %6512 = vpow2.f32 %v4853_v2  ;;  %v9097_v12 = vld [vmem:[%s9480_s2 + $0x8] sm:$0xff] }
0x1794   :  { %v9048_v3 = vpop.eup %6506 }
0x1795   :  { %v9050_v11 = vpop.eup %6508  ;;  %v4849_v54 = vmul.f32 1.442695, %v4829_v36  ;;  %v4855_v39 = vmul.f32 1.442695, %v4832_v38  ;;  %4496 = vadd.xlane.f32.xlu1 %v9048_v3  ;;  %v9103_v36 = vld [vmem:[%s9480_s2 + $0x10] sm:$0xff]  ;;  %v9109_v38 = vld [vmem:[%s9480_s2 + $0x18] sm:$0xff] }
0x1796   :  { %4490 = vadd.xlane.f32.xlu0 %v9050_v11  ;;  %v4804_v7 = vpop.xlane.xlu1 %4803  ;;  %v4814_v47 = vpop.xlane.xlu0 %4813 }
0x1797   :  { %6514 = vpow2.f32 %v4849_v54  ;;  %v4830_v59 = vsub.f32 %v8946_v18, %v4804_v7  ;;  %v4835_v5 = vsub.f32 %v8948_v61, %v4814_v47  ;;  %v4828_v54 = vsub.f32 %v8928_v29, %v9029_v20 }
0x1798   :  { %v9056_v15 = vpop.eup %6510  ;;  %6516 = vpow2.f32 %v4855_v39  ;;  %v4827_v39 = vsub.f32 %v8919_v62, %v9018_v44 }
0x1799   :  { %v4851_v23 = vmul.f32 1.442695, %v4830_v59  ;;  %v4861_v27 = vmul.f32 1.442695, %v4835_v5  ;;  %4492 = vadd.xlane.f32.xlu1 %v9056_v15  ;;  %v4847_v7 = vmul.f32 1.442695, %v4828_v54  ;;  %v4825_v59 = vsub.f32 %v8923_v1, %v9027_v35 }
0x179a   :  { %v4810_v14 = vpop.xlane.xlu0 %4809  ;;  %v4816_v40 = vpop.xlane.xlu1 %4815  ;;  %v4845_v47 = vmul.f32 1.442695, %v4827_v39 }
0x179b   :  { %6518 = vpow2.f32 %v4851_v23  ;;  %v4833_v17 = vsub.f32 %v8952_v50, %v4810_v14  ;;  %v4836_v33 = vsub.f32 %v8954_v28, %v4816_v40  ;;  %v4841_v23 = vmul.f32 1.442695, %v4825_v59  ;;  %v9144_v40 = vld [vmem:[%s9480_s2 + $0x28] sm:$0xff] }
0x179c   :  { %6520 = vpow2.f32 %v4861_v27  ;;  %v4826_v27 = vsub.f32 %v8932_v25, %v9037_v46 }
0x179d   :  { %v4857_v55 = vmul.f32 1.442695, %v4833_v17  ;;  %v4863_v6 = vmul.f32 1.442695, %v4836_v33 }
0x179e   :  { %v4812_v18 = vpop.xlane.xlu1 %4811  ;;  %v4822_v21 = vpop.xlane.xlu0 %4821 }
0x179f   :  { %6522 = vpow2.f32 %v4857_v55  ;;  %v4834_v61 = vsub.f32 %v8958_v41, %v4812_v18  ;;  %v4839_v8 = vsub.f32 %v8960_v9, %v4822_v21 }
0x17a0   :  { %6524 = vpow2.f32 %v4863_v6  ;;  %v9063_v24 = vpop.eup %6512 }
0x17a1   :  { %v4859_v22 = vmul.f32 1.442695, %v4834_v61  ;;  %v4869_v51 = vmul.f32 1.442695, %v4839_v8  ;;  %4885 = vadd.xlane.f32.xlu0 %v9063_v24  ;;  %v9150_v8 = vld [vmem:[%s9480_s2 + $0x20] sm:$0xff] }
0x17a2   :  { %v4818_v50 = vpop.xlane.xlu0 %4817  ;;  %v4824_v5 = vpop.xlane.xlu1 %4823 }
0x17a3   :  { %6526 = vpow2.f32 %v4859_v22  ;;  %v4837_v28 = vsub.f32 %v8964_v52, %v4818_v50  ;;  %v4840_v14 = vsub.f32 %v8966_v32, %v4824_v5  ;;  %v9156_v50 = vld [vmem:[%s9480_s2 + $0x30] sm:$0xff] }
0x17a4   :  { %v9067_v45 = vpop.eup %6514  ;;  %6528 = vpow2.f32 %v4869_v51 }
0x17a5   :  { %v9069_v4 = vpop.eup %6516  ;;  %v4865_v37 = vmul.f32 1.442695, %v4837_v28  ;;  %4881 = vadd.xlane.f32.xlu0 %v9067_v45  ;;  %v4871_v20 = vmul.f32 1.442695, %v4840_v14 }
0x17a6   :  { %4887 = vadd.xlane.f32.xlu1 %v9069_v4  ;;  %v4820_v29 = vpop.xlane.xlu1 %4819 }
0x17a7   :  { %6530 = vpow2.f32 %v4865_v37  ;;  %v4838_v62 = vsub.f32 %v8970_v56, %v4820_v29 }
0x17a8   :  { %v9073_v41 = vpop.eup %6518  ;;  %6532 = vpow2.f32 %v4847_v7 }
0x17a9   :  { %v9075_v9 = vpop.eup %6520  ;;  %6534 = vpow2.f32 %v4845_v47  ;;  %v4867_v1 = vmul.f32 1.442695, %v4838_v62  ;;  %v9162_v47 = vld [vmem:[%s9480_s2 + $0x38] sm:$0xff] }
0x17aa   :  { %4893 = vadd.xlane.f32.xlu0 %v9075_v9  ;;  %4883 = vadd.xlane.f32.xlu1 %v9073_v41  ;;  %6536 = vpow2.f32 %v4841_v23 }
0x17ac   :  { %v9079_v52 = vpop.eup %6522 }
0x17ad   :  { %v9081_v26 = vpop.eup %6524 }
0x17ae   :  { %4889 = vadd.xlane.f32.xlu0 %v9079_v52  ;;  %4895 = vadd.xlane.f32.xlu1 %v9081_v26 }
0x17b0   :  { %v9085_v57 = vpop.eup %6526 }
0x17b1   :  { %v9087_v2 = vpop.eup %6528 }
0x17b2   :  { %4901 = vadd.xlane.f32.xlu0 %v9087_v2  ;;  %4891 = vadd.xlane.f32.xlu1 %v9085_v57 }
0x17b4   :  { %v9091_v34 = vpop.eup %6530 }
0x17b5   :  { %v9123_v44 = vpop.eup %6532 }
0x17b6   :  { %4897 = vadd.xlane.f32.xlu0 %v9091_v34  ;;  %v9126_v35 = vpop.eup %6534 }
0x17b7   :  { %v9129_v25 = vpop.eup %6536 }
0x17c3   :  { %4205 = vperm.xlu1 %6037, %v9097_v12  }
0x17c7   :  { %4209 = vperm.xlu1 %6037, %v9103_v36  }
0x17cb   :  { %4213 = vperm.xlu1 %6037, %v9109_v38  }
0x17cc   :  { %4201 = vperm.xlu0 %6036, %v8664_v48   ;;  %v4843_v48 = vmul.f32 1.442695, %v4826_v27 }
0x17ce   :  { %6538 = vpow2.f32 %v4843_v48 }
0x17cf   :  { %6540 = vpow2.f32 %v4871_v20 }
0x17d0   :  { %6542 = vpow2.f32 %v4867_v1 }
0x17db   :  { %v9132_v32 = vpop.eup %6538 }
0x17dc   :  { %v9135_v56 = vpop.eup %6540 }
0x17dd   :  { %v9138_v46 = vpop.eup %6542 }
0x17eb   :  { %4879 = vadd.xlane.f32.xlu0 %v9123_v44 }
0x17ef   :  { %4877 = vadd.xlane.f32.xlu1 %v9126_v35 }
0x17f3   :  { %4873 = vadd.xlane.f32.xlu1 %v9129_v25 }
0x17f7   :  { %4875 = vadd.xlane.f32.xlu1 %v9132_v32 }
0x17fb   :  { %4903 = vadd.xlane.f32.xlu1 %v9135_v56 }
0x17ff   :  { %4899 = vadd.xlane.f32.xlu1 %v9138_v46 }
0x1801   :  { %4221 = vperm.xlu0 %6036, %v9144_v40  }
0x1802   :  { %v4471_v17 = vpop.xlane.xlu0 %4470 }
0x1806   :  { %v4473_v33 = vpop.xlane.xlu1 %4472 }
0x1807   :  { %v4467_v55 = vpop.xlane.xlu0 %4466 }
0x1808   :  { %6544 = vrcp.f32 %v4467_v55 }
0x1809   :  { %6546 = vrcp.f32 %v4471_v17 }
0x180a   :  { %v4469_v6 = vpop.xlane.xlu1 %4468 }
0x180b   :  { %v4479_v18 = vpop.xlane.xlu0 %4478  ;;  %6548 = vrcp.f32 %v4469_v6 }
0x180c   :  { %6550 = vrcp.f32 %v4473_v33 }
0x180e   :  { %v4481_v21 = vpop.xlane.xlu1 %4480 }
0x180f   :  { %v4475_v61 = vpop.xlane.xlu0 %4474 }
0x1810   :  { %6552 = vrcp.f32 %v4475_v61  ;;  %4217 = vperm.xlu1 %6037, %v9150_v8  }
0x1811   :  { %6554 = vrcp.f32 %v4479_v18 }
0x1812   :  { %v4477_v22 = vpop.xlane.xlu1 %4476 }
0x1813   :  { %v4487_v51 = vpop.xlane.xlu0 %4486  ;;  %6556 = vrcp.f32 %v4477_v22 }
0x1814   :  { %4225 = vperm.xlu1 %6037, %v9156_v50   ;;  %6558 = vrcp.f32 %v4481_v21 }
0x1815   :  { %v6545_v28 = vpop.eup %6544 }
0x1816   :  { %v4489_v37 = vpop.xlane.xlu1 %4488  ;;  %v6547_v54 = vpop.eup %6546  ;;  %v9166_v59 = vmul.f32 %v6545_v28, %v8998_v58 }
0x1817   :  { %v4483_v39 = vpop.xlane.xlu0 %4482  ;;  %v9172_v14 = vmul.f32 %v6547_v54, %v8991_v19 }
0x1818   :  { %v6549_v7 = vpop.eup %6548  ;;  %6560 = vrcp.f32 %v4483_v39  ;;  %4229 = vperm.xlu1 %6037, %v9162_v47  }
0x1819   :  { %v9169_v5 = vmul.f32 %v6549_v7, %v9004_v49  ;;  %v6551_v23 = vpop.eup %6550  ;;  %6562 = vrcp.f32 %v4487_v51 }
0x181a   :  { %v4485_v27 = vpop.xlane.xlu1 %4484  ;;  %v9177_v58 = vmul.f32 %v6551_v23, %v8996_v10  ;;  %v9192_v23 = vpop.f32.mrf.mxu1 }
0x181b   :  { %v4495_v48 = vpop.xlane.xlu0 %4494  ;;  %6564 = vrcp.f32 %v4485_v27  ;;  %v4546_v29 = vadd.f32 %v9169_v5, %v9166_v59 }
0x181c   :  { %6566 = vrcp.f32 %v4489_v37 }
0x181d   :  { %v6553_v20 = vpop.eup %6552  ;;  %6568 = vrcp.f32 %v4495_v48  ;;  %v4547_v49 = vadd.f32 %v4546_v29, %v9172_v14 }
0x181e   :  { %v4497_v62 = vpop.xlane.xlu1 %4496  ;;  %v6555_v1 = vpop.eup %6554  ;;  %v9181_v33 = vmul.f32 %v6553_v20, %v9014_v43 }
0x181f   :  { %v4491_v17 = vpop.xlane.xlu0 %4490  ;;  %6570 = vrcp.f32 %v4497_v62  ;;  %v4548_v19 = vadd.f32 %v4547_v49, %v9177_v58  ;;  %v4536_v61 = vmul.f32 %v6555_v1, %v9006_v16 }
0x1820   :  { %v6557_v55 = vpop.eup %6556  ;;  %6572 = vrcp.f32 %v4491_v17 }
0x1821   :  { %v9185_v6 = vmul.f32 %v6557_v55, %v9021_v60  ;;  %v4549_v18 = vadd.f32 %v4548_v19, %v9181_v33  ;;  %v6559_v10 = vpop.eup %6558  ;;  %v4163_v19 = vpop.f32.mrf.mxu1 }
0x1822   :  { %v4493_v21 = vpop.xlane.xlu1 %4492  ;;  %v4537_v43 = vmul.f32 %v6559_v10, %v9012_v31 }
0x1823   :  { %6574 = vrcp.f32 %v4493_v21  ;;  %v4550_v22 = vadd.f32 %v4549_v18, %v9185_v6 }
0x1825   :  { %v6561_v51 = vpop.eup %6560  ;;  %v4551_v28 = vadd.f32 %v4550_v22, %v4536_v61 }
0x1826   :  { %v6563_v37 = vpop.eup %6562  ;;  %v4538_v54 = vmul.f32 %v6561_v51, %v9033_v30 }
0x1827   :  { %v4552_v39 = vadd.f32 %v4551_v28, %v4537_v43  ;;  %v4540_v16 = vmul.f32 %v6563_v37, %v9023_v13  ;;  %v4165_v28 = vpop.f32.mrf.mxu1 }
0x1828   :  { %v6565_v7 = vpop.eup %6564 }
0x1829   :  { %v6567_v60 = vpop.eup %6566  ;;  %v4539_v27 = vmul.f32 %v6565_v7, %v9040_v42  ;;  %v4553_v48 = vadd.f32 %v4552_v39, %v4538_v54 }
0x182a   :  { %v6569_v29 = vpop.eup %6568  ;;  %v9195_v20 = vpop.xlane.xlu0 %4885  ;;  %v4541_v17 = vmul.f32 %v6567_v60, %v9031_v0 }
0x182b   :  { %v4554_v49 = vadd.f32 %v4553_v48, %v4539_v27  ;;  %v4544_v1 = vmul.f32 %v6569_v29, %v9042_v53  ;;  %v4167_v60 = vpop.f32.mrf.mxu1  ;;  %6576 = vrcp.f32 %v9195_v20 }
0x182c   :  { %v6571_v62 = vpop.eup %6570  ;;  %v4576_v7 = vpack.c.bf16 %v4541_v17, %v4540_v16 }
0x182d   :  { %v6573_v31 = vpop.eup %6572  ;;  %v4545_v30 = vmul.f32 %v6571_v62, %v9048_v3  ;;  %v4555_v55 = vadd.f32 %v4554_v49, %v4540_v16  ;;  %v4171_v62 = vpop.f32.mrf.mxu1 }
0x182e   :  { %v9201_v18 = vpop.xlane.xlu0 %4881  ;;  %v4542_v21 = vmul.f32 %v6573_v31, %v9050_v11 }
0x182f   :  { %v9203_v42 = vpop.xlane.xlu1 %4887  ;;  %v4578_v10 = vpack.c.bf16 %v4545_v30, %v4544_v1  ;;  %v4556_v22 = vadd.f32 %v4555_v55, %v4541_v17  ;;  %6578 = vrcp.f32 %v9201_v18 }
0x1830   :  { %v6575_v13 = vpop.eup %6574 }
0x1831   :  { %5936 = vmatprep.subr.bf16.mxu1 %v4578_v10  ;;  %v4543_v51 = vmul.f32 %v6575_v13, %v9056_v15  ;;  %v4557_v53 = vadd.f32 %v4556_v22, %v4542_v21  ;;  %v4575_v15 = vpack.c.bf16 %v4539_v27, %v4538_v54  ;;  %v4572_v27 = vpack.c.bf16 %v9177_v58, %v9172_v14 }
0x1832   :  { %5937 = vmatpush3.bf16.msra.mxu1 %v4578_v10  ;;  %v4574_v10 = vpack.c.bf16 %v4537_v43, %v4536_v61 }
0x1833   :  { %v9207_v3 = vpop.xlane.xlu0 %4893  ;;  %v9209_v0 = vpop.xlane.xlu1 %4883  ;;  %v4577_v37 = vpack.c.bf16 %v4543_v51, %v4542_v21  ;;  %v4558_v39 = vadd.f32 %v4557_v53, %v4543_v51 }
0x1834   :  { %v4173_v21 = vpop.f32.mrf.mxu1 }
0x1835   :  { %5938 = vmatprep.subr.bf16.mxu1 %v4577_v37  ;;  %v4559_v48 = vadd.f32 %v4558_v39, %v4544_v1  ;;  %v4573_v1 = vpack.c.bf16 %v9185_v6, %v9181_v33  ;;  %v4571_v39 = vpack.c.bf16 %v9169_v5, %v9166_v59 }
0x1836   :  { %5939 = vmatpush3.bf16.msra.mxu1 %v4577_v37  ;;  %v4175_v17 = vpop.f32.mrf.mxu1 }
0x1837   :  { %v9211_v11 = vpop.xlane.xlu0 %4889  ;;  %v4896_v29 = vpop.xlane.xlu1 %4895  ;;  %5940 = vmatprep.subr.bf16.mxu1 %v4576_v7  ;;  %v9213_v49 = vadd.f32 %v4559_v48, %v4545_v30 }
0x1838   :  { %v4177_v54 = vpop.f32.mrf.mxu1  ;;  %v6577_v18 = vpop.eup %6576 }
0x183a   :  { %5941 = vmatpush3.bf16.msra.mxu1 %v4576_v7  ;;  %v4181_v59 = vpop.f32.mrf.mxu1 }
0x183b   :  { %v9215_v31 = vpop.xlane.xlu1 %4891  ;;  %5942 = vmatprep.subr.bf16.mxu1 %v4575_v15  ;;  %v4902_v55 = vpop.xlane.xlu0 %4901 }
0x183e   :  { %5943 = vmatpush3.bf16.msra.mxu1 %v4575_v15 }
0x183f   :  { %v4206_v16 = vpop.permute.xlu1 %4205  ;;  %5944 = vmatprep.subr.bf16.mxu1 %v4574_v10  ;;  %v4898_v22 = vpop.xlane.xlu0 %4897 }
0x1840   :  { %v4234_v13 = vadd.f32 %v4206_v16, %v4165_v28  ;;  %v9221_v51 = vadd.f32 %v4206_v16, %v4167_v60 }
0x1842   :  { %5945 = vmatpush3.bf16.msra.mxu1 %v4574_v10  ;;  %v9238_v10 = vpop.f32.mrf.mxu1 }
0x1843   :  { %v4210_v30 = vpop.permute.xlu1 %4209  ;;  %5946 = vmatprep.subr.bf16.mxu1 %v4573_v1 }
0x1844   :  { %v9223_v53 = vadd.f32 %v4210_v30, %v4173_v21  ;;  %v4236_v60 = vadd.f32 %v4210_v30, %v4171_v62  ;;  %v4185_v21 = vpop.f32.mrf.mxu1 }
0x1846   :  { %5947 = vmatpush3.bf16.msra.mxu1 %v4573_v1  ;;  %v6579_v1 = vpop.eup %6578 }
0x1847   :  { %v4202_v61 = vpop.permute.xlu0 %4201  ;;  %v4214_v43 = vpop.permute.xlu1 %4213  ;;  %5948 = vmatprep.subr.bf16.mxu1 %v4572_v27 }
0x1848   :  { %v4232_v33 = vadd.f32 %v4202_v61, %v9192_v23  ;;  %v9226_v6 = vadd.f32 %v4202_v61, %v4163_v19  ;;  %v9228_v37 = vadd.f32 %v4214_v43, %v4177_v54  ;;  %v4238_v28 = vadd.f32 %v4214_v43, %v4175_v17 }
0x184a   :  { %v4567_v7 = vpack.c.bf16 %v4234_v13, %v4232_v33  ;;  %v4974_v14 = vpack.c.bf16 %v9221_v51, %v9226_v6  ;;  %v4975_v58 = vpack.c.bf16 %v9228_v37, %v9223_v53  ;;  %5949 = vmatpush3.bf16.msra.mxu1 %v4572_v27  ;;  %v4568_v23 = vpack.c.bf16 %v4238_v28, %v4236_v60 }
0x184b   :  { %5950 = vmatprep.subr.bf16.mxu1 %v4571_v39  ;;  %v4561_v53 = vrot.slane %v9213_v49, 4 }
0x184c   :  { %5952 = vmatprep.mubr.bf16.mxu1 %v4567_v7 }
0x184e   :  { %5951 = vmatpush3.bf16.msra.mxu1 %v4571_v39 }
0x1851   :  { %5953 = vmatmul.mubr.bf16.vlgmr.msra.gmra.mxu1 %v4568_v23 }
0x1874   :  { %v4880_v5 = vpop.xlane.xlu0 %4879 }
0x1878   :  { %v4878_v19 = vpop.xlane.xlu1 %4877 }
0x187c   :  { %v4874_v48 = vpop.xlane.xlu1 %4873  ;;  %v9243_v16 = vpop.permute.xlu0 %4221 }
0x187d   :  { %6580 = vrcp.f32 %v4874_v48 }
0x187e   :  { %6582 = vrcp.f32 %v4878_v19 }
0x1880   :  { %v4876_v15 = vpop.xlane.xlu1 %4875 }
0x1881   :  { %6584 = vrcp.f32 %v4876_v15  ;;  %v4941_v15 = vmul.f32 %v6579_v1, %v9067_v45 }
0x1882   :  { %6586 = vrcp.f32 %v4902_v55  ;;  %v9245_v55 = vpop.f32.mrf.mxu1 }
0x1883   :  { %6588 = vrcp.f32 %v4880_v5 }
0x1884   :  { %6590 = vrcp.f32 %v9209_v0  ;;  %v4904_v62 = vpop.xlane.xlu1 %4903 }
0x1885   :  { %6592 = vrcp.f32 %v4904_v62 }
0x1886   :  { %6594 = vrcp.f32 %v4896_v29  ;;  %v4191_v29 = vpop.f32.mrf.mxu1 }
0x1887   :  { %6596 = vrcp.f32 %v4898_v22 }
0x1888   :  { %6598 = vrcp.f32 %v9207_v3  ;;  %v4900_v20 = vpop.xlane.xlu1 %4899  ;;  %v4242_v3 = vadd.f32 %v9243_v16, %v4185_v21  ;;  %v9261_v33 = vpop.f32.mrf.mxu1 }
0x1889   :  { %6600 = vrcp.f32 %v4900_v20 }
0x188a   :  { %6602 = vrcp.f32 %v9203_v42  ;;  %v6581_v0 = vpop.eup %6580 }
0x188b   :  { %6604 = vrcp.f32 %v9215_v31  ;;  %v6583_v30 = vpop.eup %6582  ;;  %v9254_v13 = vmul.f32 %v6581_v0, %v9129_v25 }
0x188c   :  { %v9248_v17 = vpop.permute.xlu1 %4217  ;;  %6606 = vrcp.f32 %v9211_v11  ;;  %v4939_v11 = vmul.f32 %v6583_v30, %v9126_v35 }
0x188d   :  { %v4240_v22 = vadd.f32 %v9248_v17, %v4181_v59  ;;  %v4195_v59 = vpop.f32.mrf.mxu1 }
0x188e   :  { %v6585_v54 = vpop.eup %6584 }
0x188f   :  { %v6587_v42 = vpop.eup %6586  ;;  %v4569_v27 = vpack.c.bf16 %v4242_v3, %v4240_v22  ;;  %v9257_v61 = vmul.f32 %v6585_v54, %v9132_v32 }
0x1890   :  { %v6589_v31 = vpop.eup %6588  ;;  %v9259_v43 = vpop.permute.xlu1 %4225  ;;  %v4951_v25 = vmul.f32 %v6587_v42, %v9087_v2 }
0x1891   :  { %v6591_v39 = vpop.eup %6590  ;;  %5956 = vmatprep.mubr.bf16.mxu1 %v4569_v27  ;;  %v4953_v7 = vadd.f32 %v9257_v61, %v9254_v13  ;;  %v4940_v32 = vmul.f32 %v6589_v31, %v9123_v44  ;;  %v4244_v35 = vadd.f32 %v9259_v43, %v4191_v29  ;;  %v4943_v27 = vmul.f32 %v6577_v18, %v9063_v24 }
0x1892   :  { %v6593_v28 = vpop.eup %6592 }
0x1893   :  { %v6595_v60 = vpop.eup %6594  ;;  %v4952_v23 = vmul.f32 %v6593_v28, %v9135_v56  ;;  %v4954_v19 = vadd.f32 %v4953_v7, %v4939_v11  ;;  %v4942_v56 = vmul.f32 %v6591_v39, %v9073_v41 }
0x1894   :  { %v6597_v48 = vpop.eup %6596  ;;  %v9269_v5 = vpop.permute.xlu1 %4229  ;;  %v4948_v2 = vmul.f32 %v6595_v60, %v9081_v26 }
0x1895   :  { %v6599_v62 = vpop.eup %6598  ;;  %v4246_v21 = vadd.f32 %v9269_v5, %v4195_v59  ;;  %v4985_v20 = vpack.c.bf16 %v4952_v23, %v4951_v25  ;;  %v4955_v0 = vadd.f32 %v4954_v19, %v4940_v32  ;;  %v4949_v22 = vmul.f32 %v6597_v48, %v9091_v34 }
0x1896   :  { %v6601_v30 = vpop.eup %6600  ;;  %v4947_v42 = vmul.f32 %v6599_v62, %v9075_v9  ;;  %v4979_v19 = vpack.c.bf16 %v4940_v32, %v4939_v11  ;;  %v4978_v59 = vpack.c.bf16 %v9257_v61, %v9254_v13  ;;  %v4241_v62 = vadd.f32 %v9248_v17, %v9238_v10  ;;  %v6676_v10 = vld [vmem:[%s9480_s2] sm:$0xff] }
0x1897   :  { %v6603_v44 = vpop.eup %6602  ;;  %v4570_v3 = vpack.c.bf16 %v4246_v21, %v4244_v35  ;;  %5978 = vmatprep.subr.bf16.mxu1 %v4985_v20  ;;  %v4950_v54 = vmul.f32 %v6601_v30, %v9138_v46  ;;  %v4956_v45 = vadd.f32 %v4955_v0, %v4941_v15  ;;  %v4197_v21 = vpop.f32.mrf.mxu1  ;;  %v4245_v13 = vadd.f32 %v9259_v43, %v9261_v33 }
0x1898   :  { %v6605_v1 = vpop.eup %6604  ;;  %5979 = vmatpush3.bf16.msra.mxu1 %v4985_v20  ;;  %v4983_v41 = vpack.c.bf16 %v4948_v2, %v4947_v42  ;;  %v4944_v46 = vmul.f32 %v6603_v44, %v9069_v4  ;;  %v4247_v11 = vadd.f32 %v9269_v5, %v4197_v21  ;;  %v9355_v21 = vld [vmem:[%s9483_s5 + $0x150] sm:$0xff] }
0x1899   :  { %5957 = vmatmul.mubr.bf16.gmra.mxu1 %v4570_v3  ;;  %v4984_v29 = vpack.c.bf16 %v4950_v54, %v4949_v22  ;;  %v4957_v31 = vadd.f32 %v4956_v45, %v4942_v56  ;;  %v6607_v26 = vpop.eup %6606  ;;  %v4946_v34 = vmul.f32 %v6605_v1, %v9085_v57 }
0x189a   :  { %5994 = vmatprep.mubr.bf16.mxu1 %v4974_v14  ;;  %v4945_v7 = vmul.f32 %v6607_v26, %v9079_v52  ;;  %v4981_v60 = vpack.c.bf16 %v4944_v46, %v4943_v27  ;;  %v4980_v14 = vpack.c.bf16 %v4942_v56, %v4941_v15  ;;  %v4243_v15 = vadd.f32 %v9243_v16, %v9245_v55 }
0x189b   :  { %5980 = vmatprep.subr.bf16.mxu1 %v4984_v29  ;;  %v4958_v39 = vadd.f32 %v4957_v31, %v4943_v27  ;;  %v4977_v61 = vpack.c.bf16 %v4247_v11, %v4245_v13  ;;  %v9361_v13 = vld [vmem:[%s9483_s5 + $0x138] sm:$0xff] }
0x189c   :  { %5981 = vmatpush3.bf16.msra.mxu1 %v4984_v29  ;;  %v4982_v28 = vpack.c.bf16 %v4946_v34, %v4945_v7  ;;  %v4976_v35 = vpack.c.bf16 %v4243_v15, %v4241_v62 }
0x189d   :  { %5982 = vmatprep.subr.bf16.mxu1 %v4983_v41  ;;  %v4959_v9 = vadd.f32 %v4958_v39, %v4944_v46 }
0x189f   :  { %v4960_v24 = vadd.f32 %v4959_v9, %v4945_v7 }
0x18a0   :  { %5983 = vmatpush3.bf16.msra.mxu1 %v4983_v41 }
0x18a1   :  { %5984 = vmatprep.subr.bf16.mxu1 %v4982_v28  ;;  %v4961_v18 = vadd.f32 %v4960_v24, %v4946_v34  ;;  %v9319_v34 = vld [vmem:[%s9483_s5 + $0x170] sm:$0xff] }
0x18a3   :  { %v4962_v51 = vadd.f32 %v4961_v18, %v4947_v42  ;;  %v9331_v18 = vld [vmem:[%s9483_s5 + $0x178] sm:$0xff] }
0x18a4   :  { %5985 = vmatpush3.bf16.msra.mxu1 %v4982_v28  ;;  %v9325_v28 = vld [vmem:[%s9483_s5 + $0x168] sm:$0xff] }
0x18a5   :  { %5986 = vmatprep.subr.bf16.mxu1 %v4981_v60  ;;  %v4963_v6 = vadd.f32 %v4962_v51, %v4948_v2 }
0x18a7   :  { %v4964_v57 = vadd.f32 %v4963_v6, %v4949_v22  ;;  %v9337_v6 = vld [vmem:[%s9483_s5 + $0x160] sm:$0xff] }
0x18a8   :  { %5987 = vmatpush3.bf16.msra.mxu1 %v4981_v60 }
0x18a9   :  { %5988 = vmatprep.subr.bf16.mxu1 %v4980_v14  ;;  %v4965_v4 = vadd.f32 %v4964_v57, %v4950_v54 }
0x18ab   :  { %v4966_v48 = vadd.f32 %v4965_v4, %v4951_v25  ;;  %v6702_v25 = vmov 9  }
0x18ac   :  { %5989 = vmatpush3.bf16.msra.mxu1 %v4980_v14  ;;  %6038 = vset.pattern.permute.xlu1 %v6702_v25 }
0x18ad   :  { %5990 = vmatprep.subr.bf16.mxu1 %v4979_v19  ;;  %v4967_v52 = vadd.f32 %v4966_v48, %v4952_v23  ;;  %6039 = vset.pattern.permute.xlu0 %v6702_v25 }
0x18ae   :  { %5096 = vperm.xlu1 %6038, %v6676_v10   ;;  %5100 = vperm.xlu0 %6039, %v9097_v12  }
0x18af   :  { %v4968_v37 = vrot.slane %v4967_v52, 4 }
0x18b0   :  { %5991 = vmatpush3.bf16.msra.mxu1 %v4979_v19  ;;  %v9343_v19 = vld [vmem:[%s9483_s5 + $0x148] sm:$0xff] }
0x18b1   :  { %5992 = vmatprep.subr.bf16.mxu1 %v4978_v59  ;;  %v4969_v12 = vadd.f32 %v4968_v37, %v4967_v52  ;;  %v9349_v52 = vld [vmem:[%s9483_s5 + $0x158] sm:$0xff]  ;;  %v9368_v37 = vld [vmem:[%s9483_s5 + $0x140] sm:$0xff] }
0x18b2   :  { %5104 = vperm.xlu1 %6038, %v9103_v36   ;;  %5112 = vperm.xlu0 %6039, %v9150_v8  }
0x18b3   :  { %v4970_v8 = vrot.slane %v4969_v12, 2 }
0x18b4   :  { %5993 = vmatpush3.bf16.msra.mxu1 %v4978_v59 }
0x18b5   :  { %v4971_v43 = vadd.f32 %v4970_v8, %v4969_v12  ;;  %v9374_v12 = vld [vmem:[%s9483_s5 + $0x128] sm:$0xff] }
0x18b6   :  { %5108 = vperm.xlu1 %6038, %v9109_v38   ;;  %5120 = vperm.xlu0 %6039, %v9156_v50  }
0x18b7   :  { %5995 = vmatmul.mubr.bf16.vlgmr.msra.gmra.mxu1 %v4975_v58  ;;  %v4562_v58 = vadd.f32 %v4561_v53, %v9213_v49 }
0x18b8   :  { %5998 = vmatprep.mubr.bf16.mxu1 %v4976_v35 }
0x18b9   :  { %v4563_v55 = vrot.slane %v4562_v58, 2 }
0x18ba   :  { %5116 = vperm.xlu1 %6038, %v9144_v40   ;;  %v4972_v40 = vrot.slane %v4971_v43, 1 }
0x18bb   :  { %v4564_v17 = vadd.f32 %v4563_v55, %v4562_v58 }
0x18bc   :  { %v4973_v32 = vadd.f32 %v4972_v40, %v4971_v43 }
0x18bd   :  { %v4565_v50 = vrot.slane %v4564_v17, 1 }
0x18be   :  { %5124 = vperm.xlu1 %6038, %v9162_v47   ;;  %v5051_v49 = vadd.f32 1e-09, %v4973_v32 }
0x18bf   :  { %5999 = vmatmul.mubr.bf16.gmra.mxu1 %v4977_v61  ;;  %v4566_v23 = vadd.f32 %v4565_v50, %v4564_v17  ;;  %v6688_v50 = vld [vmem:[%s9483_s5 + $0x118] sm:$0xff] }
0x18c1   :  { %v4644_v20 = vadd.f32 1e-09, %v4566_v23  ;;  %v6689_v23 = vld [vmem:[%s9483_s5 + $0x120] sm:$0xff] }
0x18c3   :  { %6608 = vrcp.f32 %v4644_v20  ;;  %v6690_v20 = vld [vmem:[%s9483_s5 + $0x108] sm:$0xff] }
0x18c4   :  { %6610 = vrcp.f32 %v5051_v49 }
0x18d0   :  { %v6609_v54 = vpop.eup %6608 }
0x18d1   :  { %v6611_v45 = vpop.eup %6610 }
0x1911   :  { %v9310_v16 = vpop.f32.mrf.mxu1 }
0x1912   :  { %v4649_v53 = vmul.f32 %v6609_v54, %v9310_v16  ;;  %v9380_v16 = vld [vmem:[%s9483_s5 + $0x130] sm:$0xff] }
0x1913   :  { %v9312_v36 = vpop.f32.mrf.mxu1 }
0x1914   :  { %v5075_v32 = vsub.f32 %v6689_v23, %v4649_v53 }
0x1915   :  { %v5955_v38 = vpop.f32.mrf.mxu1 }
0x1916   :  { %v4650_v15 = vmul.f32 %v6609_v54, %v5955_v38 }
0x1917   :  { %v9314_v33 = vpop.f32.mrf.mxu1 }
0x1918   :  { %v5077_v17 = vsub.f32 %v9380_v16, %v4650_v15  ;;  %v4648_v38 = vmul.f32 %v6609_v54, %v9314_v33 }
0x191a   :  { %v5089_v49 = vpack.c.bf16 %v5077_v17, %v5075_v32 }
0x1959   :  { %v5958_v47 = vpop.f32.mrf.mxu1 }
0x195a   :  { %v4653_v27 = vmul.f32 %v6609_v54, %v5958_v47 }
0x195b   :  { %v4629_v5 = vpop.f32.mrf.mxu1 }
0x195c   :  { %v5083_v14 = vsub.f32 %v9337_v6, %v4653_v27  ;;  %v4651_v57 = vmul.f32 %v6609_v54, %v4629_v5  ;;  %v4647_v5 = vmul.f32 %v6609_v54, %v9312_v36 }
0x195d   :  { %v5959_v0 = vpop.f32.mrf.mxu1 }
0x195e   :  { %v4654_v1 = vmul.f32 %v6609_v54, %v5959_v0  ;;  %v5079_v58 = vsub.f32 %v9368_v37, %v4651_v57  ;;  %v6691_v0 = vld [vmem:[%s9483_s5 + $0x110] sm:$0xff] }
0x195f   :  { %v4632_v30 = vpop.f32.mrf.mxu1 }
0x1960   :  { %v5085_v46 = vsub.f32 %v9319_v34, %v4654_v1  ;;  %v4652_v39 = vmul.f32 %v6609_v54, %v4632_v30  ;;  %v5073_v30 = vsub.f32 %v6691_v0, %v4648_v38  ;;  %v6082_v54 = vld [vmem:[%s9482_s4 + $0x70] sm:$0xff]   ;;  %v5097_v1 = vpop.permute.xlu1 %5096 }
0x1962   :  { %v5093_v35 = vpack.c.bf16 %v5085_v46, %v5083_v14  ;;  %v5081_v11 = vsub.f32 %v9355_v21, %v4652_v39 }
0x1964   :  { %v5091_v43 = vpack.c.bf16 %v5081_v11, %v5079_v58 }
0x1977   :  { %v5996_v2 = vpop.f32.mrf.mxu1 }
0x1978   :  { %v5056_v4 = vmul.f32 %v6611_v45, %v5996_v2 }
0x1979   :  { %v5020_v56 = vpop.f32.mrf.mxu1 }
0x197a   :  { %v5076_v55 = vsub.f32 %v9374_v12, %v5056_v4  ;;  %v5054_v8 = vmul.f32 %v6611_v45, %v5020_v56  ;;  %v6692_v56 = vld [vmem:[%s9483_s5 + $0x100] sm:$0xff] }
0x197b   :  { %v5997_v44 = vpop.f32.mrf.mxu1 }
0x197c   :  { %v5057_v9 = vmul.f32 %v6611_v45, %v5997_v44  ;;  %v5072_v33 = vsub.f32 %v6690_v20, %v5054_v8  ;;  %v5071_v44 = vsub.f32 %v6692_v56, %v4647_v5 }
0x197d   :  { %v5023_v3 = vpop.f32.mrf.mxu1 }
0x197e   :  { %v5078_v61 = vsub.f32 %v9361_v13, %v5057_v9  ;;  %v5055_v25 = vmul.f32 %v6611_v45, %v5023_v3  ;;  %v5087_v36 = vpack.c.bf16 %v5073_v30, %v5071_v44  ;;  %v6080_v3 = vld [vmem:[%s9482_s4 + $0x60] sm:$0xff]  }
0x197f   :  { %v6000_v22 = vpop.f32.mrf.mxu1 }
0x1980   :  { %v5060_v42 = vmul.f32 %v6611_v45, %v6000_v22  ;;  %v5074_v40 = vsub.f32 %v6688_v50, %v5055_v25  ;;  %v5090_v47 = vpack.c.bf16 %v5078_v61, %v5076_v55  ;;  %v6081_v22 = vld [vmem:[%s9482_s4 + $0x68] sm:$0xff]  }
0x1981   :  { %v5036_v29 = vpop.f32.mrf.mxu1 }
0x1982   :  { %v5058_v26 = vmul.f32 %v6611_v45, %v5036_v29  ;;  %v5084_v24 = vsub.f32 %v9325_v28, %v5060_v42  ;;  %v5088_v2 = vpack.c.bf16 %v5074_v40, %v5072_v33 }
0x1983   :  { %v6001_v31 = vpop.f32.mrf.mxu1 }
0x1984   :  { %v5061_v41 = vmul.f32 %v6611_v45, %v6001_v31  ;;  %v5080_v48 = vsub.f32 %v9343_v19, %v5058_v26  ;;  %v5101_v31 = vpop.permute.xlu0 %5100 }
0x1985   :  { %v5039_v7 = vpop.f32.mrf.mxu1 }
0x1986   :  { %v5086_v60 = vsub.f32 %v9331_v18, %v5061_v41  ;;  %v5059_v51 = vmul.f32 %v6611_v45, %v5039_v7  ;;  %v6083_v45 = vld [vmem:[%s9482_s4 + $0x78] sm:$0xff]  }
0x1988   :  { %v5082_v59 = vsub.f32 %v9349_v52, %v5059_v51  ;;  %v5094_v62 = vpack.c.bf16 %v5086_v60, %v5084_v24  ;;  %v5105_v60 = vpop.permute.xlu1 %5104  ;;  %v5113_v8 = vpop.permute.xlu0 %5112 }
0x198a   :  { %5167 = vmatprep.subr.bf16.mxu0 %v5094_v62  ;;  %v5092_v10 = vpack.c.bf16 %v5082_v59, %v5080_v48 }
0x198b   :  { %5168 = vmatpush1.bf16.msra.mxu0 %v5093_v35 }
0x198c   :  { %5169 = vmatprep.subr.bf16.mxu0 %v5092_v10  ;;  %v5109_v61 = vpop.permute.xlu1 %5108 }
0x198f   :  { %5170 = vmatpush1.bf16.msra.mxu0 %v5091_v43 }
0x1990   :  { %5171 = vmatprep.subr.bf16.mxu0 %v5090_v47  ;;  %v5117_v33 = vpop.permute.xlu1 %5116 }
0x1993   :  { %5172 = vmatpush1.bf16.msra.mxu0 %v5089_v49 }
0x1994   :  { %5173 = vmatprep.subr.bf16.mxu0 %v5088_v2 }
0x1997   :  { %5174 = vmatpush1.bf16.msra.mxu0 %v5087_v36  ;;  %v5121_v36 = vpop.permute.xlu0 %5120 }
0x199a   :  { %5494 = vmatmul.mubr.msk.bf16.vlgmr.msra.gmra.mxu0 %vm121_vm0, %v6080_v3 }
0x199b   :  { %5201 = vmatprep.mubr.bf16.mxu0 %v9571_v63 }
0x19a2   :  { %5495 = vmatmul.mubr.msk.bf16.gmra.mxu0 %vm121_vm0, %v6081_v22 }
0x19a3   :  { %5211 = vmatprep.mubr.bf16.mxu0 %v9571_v63 }
0x19aa   :  { %5496 = vmatmul.mubr.msk.bf16.gmra.mxu0 %vm121_vm0, %v6082_v54 }
0x19ab   :  { %5221 = vmatprep.mubr.bf16.mxu0 %v9571_v63 }
0x19b2   :  { %5497 = vmatmul.mubr.msk.bf16.gmra.mxu0 %vm121_vm0, %v6083_v45 }
0x1a5a   :  { %v5193_v29 = vpop.f32.mrf.mxu0 }
0x1a5b   :  { %v5194_v42 = vadd.f32 %v5193_v29, %v5097_v1 }
0x1a5c   :  { %v5195_v27 = vpop.f32.mrf.mxu0 }
0x1a5d   :  { %v5232_v26 = vmax.f32 %v5194_v42, 0.0  ;;  %v5196_v41 = vadd.f32 %v5195_v27, %v5097_v1  ;;  %v5125_v42 = vpop.permute.xlu1 %5124 }
0x1a5e   :  { %v5197_v46 = vpop.f32.mrf.mxu0 }
0x1a5f   :  { %v5248_v39 = vadd.f32 %v6692_v56, %v5232_v26  ;;  %v5233_v7 = vmax.f32 %v5196_v41, 0.0  ;;  %v5198_v9 = vadd.f32 %v5197_v46, %v5101_v31 }
0x1a60   :  { %v5199_v24 = vpop.f32.mrf.mxu0 }
0x1a61   :  { %5264 = vst [vmem:[%s9483_s5 + $0x180] sm:$0xff] %v5248_v39  ;;  %v5249_v63 = vadd.f32 %v6690_v20, %v5233_v7  ;;  %v5234_v51 = vmax.f32 %v5198_v9, 0.0  ;;  %v5200_v14 = vadd.f32 %v5199_v24, %v5101_v31 }
0x1a62   :  { %v5203_v57 = vpop.f32.mrf.mxu0 }
0x1a63   :  { %5265 = vst [vmem:[%s9483_s5 + $0x188] sm:$0xff] %v5249_v63  ;;  %v5250_v4 = vadd.f32 %v6691_v0, %v5234_v51  ;;  %v5235_v48 = vmax.f32 %v5200_v14, 0.0  ;;  %v5204_v59 = vadd.f32 %v5203_v57, %v5105_v60 }
0x1a64   :  { %v5205_v62 = vpop.f32.mrf.mxu0 }
0x1a65   :  { %5266 = vst [vmem:[%s9483_s5 + $0x190] sm:$0xff] %v5250_v4  ;;  %v5251_v15 = vadd.f32 %v6688_v50, %v5235_v48  ;;  %v5236_v35 = vmax.f32 %v5204_v59, 0.0  ;;  %v5206_v11 = vadd.f32 %v5205_v62, %v5105_v60 }
0x1a66   :  { %v5207_v25 = vpop.f32.mrf.mxu0 }
0x1a67   :  { %5267 = vst [vmem:[%s9483_s5 + $0x198] sm:$0xff] %v5251_v15  ;;  %v5252_v10 = vadd.f32 %v6689_v23, %v5236_v35  ;;  %v5237_v53 = vmax.f32 %v5206_v11, 0.0  ;;  %v5208_v58 = vadd.f32 %v5207_v25, %v5109_v61 }
0x1a68   :  { %v5209_v55 = vpop.f32.mrf.mxu0 }
0x1a69   :  { %5268 = vst [vmem:[%s9483_s5 + $0x1a0] sm:$0xff] %v5252_v10  ;;  %v5253_v17 = vadd.f32 %v9374_v12, %v5237_v53  ;;  %v5238_v38 = vmax.f32 %v5208_v58, 0.0  ;;  %v5210_v43 = vadd.f32 %v5209_v55, %v5109_v61 }
0x1a6a   :  { %v5213_v50 = vpop.f32.mrf.mxu0 }
0x1a6b   :  { %5269 = vst [vmem:[%s9483_s5 + $0x1a8] sm:$0xff] %v5253_v17  ;;  %v5254_v40 = vadd.f32 %v9380_v16, %v5238_v38  ;;  %v5239_v47 = vmax.f32 %v5210_v43, 0.0  ;;  %v5214_v23 = vadd.f32 %v5213_v50, %v5113_v8 }
0x1a6c   :  { %v5215_v32 = vpop.f32.mrf.mxu0 }
0x1a6d   :  { %5270 = vst [vmem:[%s9483_s5 + $0x1b0] sm:$0xff] %v5254_v40  ;;  %v5255_v5 = vadd.f32 %v9361_v13, %v5239_v47  ;;  %v5240_v20 = vmax.f32 %v5214_v23, 0.0  ;;  %v5216_v12 = vadd.f32 %v5215_v32, %v5113_v8 }
0x1a6e   :  { %v5217_v49 = vpop.f32.mrf.mxu0 }
0x1a6f   :  { %5271 = vst [vmem:[%s9483_s5 + $0x1b8] sm:$0xff] %v5255_v5  ;;  %v5256_v0 = vadd.f32 %v9368_v37, %v5240_v20  ;;  %v5241_v16 = vmax.f32 %v5216_v12, 0.0  ;;  %v5218_v30 = vadd.f32 %v5217_v49, %v5117_v33 }
0x1a70   :  { %v5219_v2 = vpop.f32.mrf.mxu0 }
0x1a71   :  { %5272 = vst [vmem:[%s9483_s5 + $0x1c0] sm:$0xff] %v5256_v0  ;;  %v5257_v56 = vadd.f32 %v9343_v19, %v5241_v16  ;;  %v5242_v13 = vmax.f32 %v5218_v30, 0.0  ;;  %v5220_v44 = vadd.f32 %v5219_v2, %v5117_v33 }
0x1a72   :  { %v5223_v3 = vpop.f32.mrf.mxu0 }
0x1a73   :  { %5273 = vst [vmem:[%s9483_s5 + $0x1c8] sm:$0xff] %v5257_v56  ;;  %v5258_v22 = vadd.f32 %v9355_v21, %v5242_v13  ;;  %v5243_v37 = vmax.f32 %v5220_v44, 0.0  ;;  %v5224_v54 = vadd.f32 %v5223_v3, %v5121_v36 }
0x1a74   :  { %v5225_v45 = vpop.f32.mrf.mxu0 }
0x1a75   :  { %5274 = vst [vmem:[%s9483_s5 + $0x1d0] sm:$0xff] %v5258_v22  ;;  %v5259_v1 = vadd.f32 %v9349_v52, %v5243_v37  ;;  %v5244_v19 = vmax.f32 %v5224_v54, 0.0  ;;  %v5226_v29 = vadd.f32 %v5225_v45, %v5121_v36 }
0x1a76   :  { %v5227_v27 = vpop.f32.mrf.mxu0 }
0x1a77   :  { %5275 = vst [vmem:[%s9483_s5 + $0x1d8] sm:$0xff] %v5259_v1  ;;  %v5260_v31 = vadd.f32 %v9337_v6, %v5244_v19  ;;  %v5245_v21 = vmax.f32 %v5226_v29, 0.0  ;;  %v5228_v26 = vadd.f32 %v5227_v27, %v5125_v42 }
0x1a78   :  { %v5229_v41 = vpop.f32.mrf.mxu0 }
0x1a79   :  { %5276 = vst [vmem:[%s9483_s5 + $0x1e0] sm:$0xff] %v5260_v31  ;;  %v5261_v46 = vadd.f32 %v9325_v28, %v5245_v21  ;;  %v5246_v52 = vmax.f32 %v5228_v26, 0.0  ;;  %v5230_v39 = vadd.f32 %v5229_v41, %v5125_v42 }
0x1a7b   :  { %5277 = vst [vmem:[%s9483_s5 + $0x1e8] sm:$0xff] %v5261_v46  ;;  %v5262_v7 = vadd.f32 %v9319_v34, %v5246_v52  ;;  %v5247_v9 = vmax.f32 %v5230_v39, 0.0 }
0x1a7d   :  { %5278 = vst [vmem:[%s9483_s5 + $0x1f0] sm:$0xff] %v5262_v7  ;;  %v5263_v6 = vadd.f32 %v9331_v18, %v5247_v9 }
0x1a7f   :  { %5279 = vst [vmem:[%s9483_s5 + $0x1f8] sm:$0xff] %v5263_v6 }

</bundles_post_ra>
